<compile_context>
chip_gen: v6e
topology: v6e:2x2x1
jax: 0.10.0
libtpu: 0.0.40
codegen_flags: <defaults>
</compile_context>

<pallas_src>
from functools import partial

import jax
import jax.numpy as jnp
from jax.experimental import pallas as pl
from jax.experimental.pallas import tpu as pltpu


def _round_up(x, m):
    return (x + m - 1) // m * m


# ----------------------------------------------------------------------------
# Fused kernel
#   x_ref    (TB, L_pad, E)     bf16   padded token embeddings
#   wc_ref   (ks_max*E, FP)     bf16   fused per-tap conv weights (all branches)
#   bc_ref   (1, FP)            f32    fused conv bias
#   mask_ref (T_all, FP)        f32    0 for valid window positions, -1e30 else
#   fcw_ref  (FP, TILE_N)       bf16   FC weight tile (block row order, padded)
#   fcb_ref  (1, TILE_N)        f32    FC bias tile
#   out_ref  (TB, TILE_N)       f32    FC output tile
#   feat_ref (TB, FP)           f32    pooled features (block order [k*F + f])
#   feat_sc  (TB, FP)           bf16   VMEM scratch, resident across the j axis
# ----------------------------------------------------------------------------
def fused_cnn_kernel(x_ref, wc_ref, bc_ref, mask_ref, fcw_ref, fcb_ref,
                     out_ref, feat_ref, feat_sc,
                     *, kernel_sizes, t_all, emb_dim):
    j = pl.program_id(1)
    ks_max = max(kernel_sizes)

    # Conv branches run once per batch tile (first FC-out tile of the sweep);
    # pooled features stay resident in VMEM scratch for the remaining tiles.
    # Requires the j axis to be innermost & sequential ("arbitrary") — it is.
    @pl.when(j == 0)
    def _():
        x = x_ref[...]                                   # (TB, L_pad, E) bf16
        tb = x.shape[0]
        fp = wc_ref.shape[1]
        # Per-tap accumulation against the branch-fused weight: ks_max small
        # matmuls with K = E, N = FP (lane-dense 128), f32 accumulation.
        acc = jnp.zeros((tb, t_all, fp), jnp.float32)
        for t in range(ks_max):
            xt = x[:, t:t + t_all, :]                    # (TB, T_all, E)
            wt = wc_ref[t * emb_dim:(t + 1) * emb_dim, :]  # (E, FP)
            acc = acc + jnp.einsum("ble,ef->blf", xt, wt,
                                   preferred_element_type=jnp.float32)
        # One bias + ReLU + validity-mask + global max-pool for all branches.
        acc = jnp.maximum(acc + bc_ref[...][None, :, :], 0.0)
        acc = acc + mask_ref[...][None, :, :]            # -1e30 on invalid pos
        pooled = jnp.max(acc, axis=1)                    # (TB, FP) f32
        feat_ref[...] = pooled
        feat_sc[...] = pooled.astype(jnp.bfloat16)

    # FC tile: (TB, FP) @ (FP, TILE_N) + bias (bf16 in, f32 accumulate).
    out_ref[...] = (jnp.dot(feat_sc[...], fcw_ref[...],
                            preferred_element_type=jnp.float32)
                    + fcb_ref[...])


# ----------------------------------------------------------------------------
# Forward pass (matches CNN.forward, inference mode).
# ----------------------------------------------------------------------------
def cnn_forward(token_ids, params, *, batch_tile=256, fc_tile_n=1024):
    kernel_sizes = tuple(params["kernel_sizes"])
    K = len(kernel_sizes)
    ks_max, ks_min = max(kernel_sizes), min(kernel_sizes)
    emb = params["embedding"]
    B, L = token_ids.shape
    E = emb.shape[1]
    F = params["conv_w"][0].shape[-1]
    assert L >= ks_max, "sentence_len must be >= max kernel_size"

    T_all = L - ks_min + 1            # window positions of the shortest kernel
    L_pad = T_all + ks_max - 1        # = L + ks_max - ks_min (zero padded)
    FP = _round_up(K * F, 128)        # lane-dense fused conv / feature width

    # Batch tile: large (MXU M dim, few grid steps, fc_w streamed ~1x) but
    # clamped so tiny batches stay tiny; batch is zero-padded to a multiple.
    TB = max(8, min(_round_up(batch_tile, 8), _round_up(B, 8)))
    B_pad = _round_up(B, TB)
    nb = B_pad // TB

    # Embedding lookup stays in plain-JAX glue (tiny gather); bf16 activations.
    # TODO(synk): could fold the gather into the kernel with
    # PrefetchScalarGridSpec + pl.Element row-gather if profiling shows the
    # x_emb round trip matters (it is small next to fc_w).
    x = emb[token_ids].astype(jnp.bfloat16)              # (B, L, E)
    x = jnp.pad(x, ((0, B_pad - B), (0, L_pad - L), (0, 0)))

    # Fused conv weight / bias / position-validity mask.
    #   column block b*F:(b+1)*F  <-> branch b (kernel size kernel_sizes[b])
    #   row block    t*E:(t+1)*E  <-> tap t (zero for taps the branch lacks)
    wc = jnp.zeros((ks_max * E, FP), jnp.float32)
    bc = jnp.zeros((1, FP), jnp.float32)
    mask = jnp.zeros((T_all, FP), jnp.float32)
    for bidx, (ks, w, b) in enumerate(zip(kernel_sizes, params["conv_w"],
                                          params["conv_b"])):
        wc = wc.at[:ks * E, bidx * F:(bidx + 1) * F].set(w.reshape(ks * E, F))
        bc = bc.at[:, bidx * F:(bidx + 1) * F].set(b)
        n_valid = L - ks + 1
        mask = mask.at[n_valid:, bidx * F:(bidx + 1) * F].set(-1e30)
    wc = wc.astype(jnp.bfloat16)

    # FC weight: permute rows from torch feature order [f*K + k] to the
    # kernel's block order [k*F + f]; pad rows to FP, cols to a 128 multiple.
    fc_w, fc_b = params["fc_w"], params["fc_b"]
    out_dim = fc_w.shape[1]
    out_pad = _round_up(out_dim, 128)
    fc_w_blk = fc_w.reshape(F, K, out_dim).transpose(1, 0, 2).reshape(K * F, out_dim)
    fc_w_blk = jnp.pad(fc_w_blk,
                       ((0, FP - K * F), (0, out_pad - out_dim))).astype(jnp.bfloat16)
    fc_b_pad = jnp.pad(fc_b, ((0, 0), (0, out_pad - out_dim))).astype(jnp.float32)

    tile_n = min(_round_up(fc_tile_n, 128), out_pad)
    nj = pl.cdiv(out_pad, tile_n)     # last tile may be partial (masked write)

    kernel = partial(fused_cnn_kernel, kernel_sizes=kernel_sizes,
                     t_all=T_all, emb_dim=E)

    in_specs = [
        pl.BlockSpec((TB, L_pad, E), lambda i, j: (i, 0, 0)),      # x
        pl.BlockSpec((ks_max * E, FP), lambda i, j: (0, 0)),       # fused conv w
        pl.BlockSpec((1, FP), lambda i, j: (0, 0)),                # fused conv b
        pl.BlockSpec((T_all, FP), lambda i, j: (0, 0)),            # validity mask
        pl.BlockSpec((FP, tile_n), lambda i, j: (0, j)),           # fc w tile
        pl.BlockSpec((1, tile_n), lambda i, j: (0, j)),            # fc b tile
    ]
    out_specs = [
        pl.BlockSpec((TB, tile_n), lambda i, j: (i, j)),           # FC out
        pl.BlockSpec((TB, FP), lambda i, j: (i, 0)),               # pooled feats
    ]

    out_padded, feat_blk = pl.pallas_call(
        kernel,
        out_shape=(
            jax.ShapeDtypeStruct((B_pad, out_pad), jnp.float32),
            jax.ShapeDtypeStruct((B_pad, FP), jnp.float32),
        ),
        grid_spec=pltpu.PrefetchScalarGridSpec(
            num_scalar_prefetch=0,
            grid=(nb, nj),
            in_specs=in_specs,
            out_specs=out_specs,
            scratch_shapes=[pltpu.VMEM((TB, FP), jnp.bfloat16)],
        ),
        compiler_params=pltpu.CompilerParams(
            # Batch axis parallel (megacore shards it when nb >= 2 on v7x);
            # FC-out axis must stay "arbitrary" for the j==0 scratch pattern.
            dimension_semantics=("parallel", "arbitrary"),
            vmem_limit_bytes=40 * 1024 * 1024,   # v7x-safe (64 MiB total)
        ),
    )(x, wc, bc, mask, fc_w_blk, fc_b_pad)

    # TODO(synk): F.dropout(p=0.5, training) is stochastic; inference-mode
    # identity is used here.
    out = out_padded[:B, :out_dim]
    # Re-interleave pooled features from kernel block order [k*F + f] back to
    # torch order [f*K + k] (torch.cat(dim=2).view) for feature_extracted.
    feat = feat_blk[:B, :K * F].reshape(B, K, F).transpose(0, 2, 1).reshape(B, K * F)
    return out, feat


# ----------------------------------------------------------------------------
# Pure-JAX f32 reference (loose numerical sanity check).
# ----------------------------------------------------------------------------
def reference_forward(token_ids, params):
    x = params["embedding"][token_ids]                   # (B, L, E) f32
    B, L, _ = x.shape
    pooled = []
    for ks, w, b in zip(params["kernel_sizes"], params["conv_w"],
                        params["conv_b"]):
        T = L - ks + 1
        acc = sum(jnp.einsum("bte,ef->btf", x[:, t:t + T, :], w[t])
                  for t in range(ks)) + b[None, :, :]
        pooled.append(jnp.max(jnp.maximum(acc, 0.0), axis=1))
    feat = jnp.stack(pooled, axis=2).reshape(B, -1)      # torch order
    out = feat @ params["fc_w"] + params["fc_b"]
    return out, feat


# ----------------------------------------------------------------------------
# Deterministic parameter construction
# ----------------------------------------------------------------------------
def make_params(key, *, vocab_size, embedding_dim, num_filters,
                kernel_sizes, output_chars):
    keys = jax.random.split(key, 3 + 2 * len(kernel_sizes))
    params = {"kernel_sizes": tuple(kernel_sizes)}
    params["embedding"] = (
        0.1 * jax.random.normal(keys[0], (vocab_size, embedding_dim),
                                jnp.float32))
    conv_w, conv_b = [], []
    for i, ks in enumerate(kernel_sizes):
        # stored as (k, E, F); PyTorch Conv1d weight is (F, E, k)
        conv_w.append(0.1 * jax.random.normal(
            keys[1 + 2 * i], (ks, embedding_dim, num_filters), jnp.float32))
        conv_b.append(0.01 * jax.random.normal(
            keys[2 + 2 * i], (1, num_filters), jnp.float32))
    params["conv_w"] = conv_w
    params["conv_b"] = conv_b

    fc_in = num_filters * len(kernel_sizes)
    fc_out = output_chars * vocab_size
    # stored pre-transposed: (in, out); in-rows in torch order [f*K + k]
    params["fc_w"] = 0.1 * jax.random.normal(
        keys[-2], (fc_in, fc_out), jnp.float32)
    params["fc_b"] = 0.01 * jax.random.normal(
        keys[-1], (1, fc_out), jnp.float32)
    return params


if __name__ == "__main__":
    BATCH = 2
    VOCAB = 50
    EMB_DIM = 16
    NUM_FILTERS = 32
    KERNEL_SIZES = (3, 4, 5)
    SENT_LEN = 16
    OUTPUT_CHARS = 4

    root = jax.random.PRNGKey(0)
    k_params, k_tokens = jax.random.split(root)

    params = make_params(
        k_params,
        vocab_size=VOCAB,
        embedding_dim=EMB_DIM,
        num_filters=NUM_FILTERS,
        kernel_sizes=KERNEL_SIZES,
        output_chars=OUTPUT_CHARS,
    )

    token_ids = jax.random.randint(
        k_tokens, (BATCH, SENT_LEN), 0, VOCAB, dtype=jnp.int32)

    # fc_tile_n=128 keeps the FC-out grid > 1 at this tiny test size so the
    # scratch-revisit (j > 0) path is exercised.
    out, feat = cnn_forward(token_ids, params, fc_tile_n=128)
    out = jax.block_until_ready(out)
    feat = jax.block_until_ready(feat)

    assert out.shape == (BATCH, OUTPUT_CHARS * VOCAB)
    assert feat.shape == (BATCH, NUM_FILTERS * len(KERNEL_SIZES))

    # Loose numerical check vs. the f32 reference (bf16 MXU inputs).
    out_ref, feat_ref = reference_forward(token_ids, params)
    assert jnp.allclose(feat, feat_ref, atol=3e-2, rtol=3e-2), (
        "feat max|diff|=%f" % float(jnp.max(jnp.abs(feat - feat_ref))))
    assert jnp.allclose(out, out_ref, atol=3e-2, rtol=3e-2), (
        "out max|diff|=%f" % float(jnp.max(jnp.abs(out - out_ref))))

    print("KERNEL_OK")
</pallas_src>

<mosaic_0001>
module attributes {stable_mosaic.version = 11 : i64} {
  func.func @fused_cnn_kernel(%arg0: i32, %arg1: i32, %arg2: memref<8x18x16xbf16, #tpu.memory_space<vmem>>, %arg3: memref<80x128xbf16, #tpu.memory_space<vmem>>, %arg4: memref<1x128xf32, #tpu.memory_space<vmem>>, %arg5: memref<14x128xf32, #tpu.memory_space<vmem>>, %arg6: memref<128x128xbf16, #tpu.memory_space<vmem>>, %arg7: memref<1x128xf32, #tpu.memory_space<vmem>>, %arg8: memref<8x128xf32, #tpu.memory_space<vmem>>, %arg9: memref<8x128xf32, #tpu.memory_space<vmem>>, %arg10: memref<8x128xbf16, #tpu.memory_space<vmem>>) attributes {dimension_semantics = [#tpu.dimension_semantics<parallel>, #tpu.dimension_semantics<arbitrary>], iteration_bounds = array<i64: 1, 2>, scalar_prefetch = 0 : i64, scratch_operands = 1 : i64, tpu.core_type = #tpu.core_type<tc>, window_params = [{transform_indices = @transform_0, window_bounds = array<i64: 8, 18, 16>}, {pipeline_mode = #tpu.pipeline_mode<synchronous>, transform_indices = @transform_1, window_bounds = array<i64: 80, 128>}, {pipeline_mode = #tpu.pipeline_mode<synchronous>, transform_indices = @transform_2, window_bounds = array<i64: 1, 128>}, {pipeline_mode = #tpu.pipeline_mode<synchronous>, transform_indices = @transform_3, window_bounds = array<i64: 14, 128>}, {transform_indices = @transform_4, window_bounds = array<i64: 128, 128>}, {transform_indices = @transform_5, window_bounds = array<i64: 1, 128>}, {transform_indices = @transform_6, window_bounds = array<i64: 8, 128>}, {transform_indices = @transform_7, window_bounds = array<i64: 8, 128>}]} {
    %c0_i32 = arith.constant 0 : i32
    %0 = arith.cmpi eq, %arg1, %c0_i32 : i32
    %1 = arith.extui %0 : i1 to i32
    %c0_i32_0 = arith.constant 0 : i32
    %2 = arith.cmpi ne, %1, %c0_i32_0 : i32
    scf.if %2 {
      %c0_8 = arith.constant 0 : index
      %c0_9 = arith.constant 0 : index
      %c0_10 = arith.constant 0 : index
      %10 = vector.load %arg2[%c0_8, %c0_9, %c0_10] : memref<8x18x16xbf16, #tpu.memory_space<vmem>>, vector<8x18x16xbf16>
      %cst_11 = arith.constant 0.000000e+00 : f32
      %11 = vector.broadcast %cst_11 : f32 to vector<8x14x128xf32>
      %12 = vector.extract_strided_slice %10 {offsets = [0, 0, 0], sizes = [8, 14, 16], strides = [1, 1, 1]} : vector<8x18x16xbf16> to vector<8x14x16xbf16>
      %c0_12 = arith.constant 0 : index
      %c0_13 = arith.constant 0 : index
      %13 = vector.load %arg3[%c0_12, %c0_13] : memref<80x128xbf16, #tpu.memory_space<vmem>>, vector<16x128xbf16>
      "tpu.trace_start"() <{level = 10 : i32, message = "ble,ef->blf"}> : () -> ()
      %cst_14 = arith.constant dense<0.000000e+00> : vector<8x14x128xf32>
      %14 = tpu.matmul %12, %13, %cst_14 {dimension_numbers = #tpu.dot_dimension_numbers<[2], [0], [0, 1], [1], [0, 0, 0, 1, 1, 1], [], []>} : vector<8x14x16xbf16>, vector<16x128xbf16>, vector<8x14x128xf32> -> vector<8x14x128xf32>
      "tpu.trace_stop"() : () -> ()
      %15 = arith.addf %11, %14 : vector<8x14x128xf32>
      %16 = vector.extract_strided_slice %10 {offsets = [0, 1, 0], sizes = [8, 14, 16], strides = [1, 1, 1]} : vector<8x18x16xbf16> to vector<8x14x16xbf16>
      %c16 = arith.constant 16 : index
      %c0_15 = arith.constant 0 : index
      %17 = vector.load %arg3[%c16, %c0_15] : memref<80x128xbf16, #tpu.memory_space<vmem>>, vector<16x128xbf16>
      "tpu.trace_start"() <{level = 10 : i32, message = "ble,ef->blf"}> : () -> ()
      %cst_16 = arith.constant dense<0.000000e+00> : vector<8x14x128xf32>
      %18 = tpu.matmul %16, %17, %cst_16 {dimension_numbers = #tpu.dot_dimension_numbers<[2], [0], [0, 1], [1], [0, 0, 0, 1, 1, 1], [], []>} : vector<8x14x16xbf16>, vector<16x128xbf16>, vector<8x14x128xf32> -> vector<8x14x128xf32>
      "tpu.trace_stop"() : () -> ()
      %19 = arith.addf %15, %18 : vector<8x14x128xf32>
      %20 = vector.extract_strided_slice %10 {offsets = [0, 2, 0], sizes = [8, 14, 16], strides = [1, 1, 1]} : vector<8x18x16xbf16> to vector<8x14x16xbf16>
      %c32 = arith.constant 32 : index
      %c0_17 = arith.constant 0 : index
      %21 = vector.load %arg3[%c32, %c0_17] : memref<80x128xbf16, #tpu.memory_space<vmem>>, vector<16x128xbf16>
      "tpu.trace_start"() <{level = 10 : i32, message = "ble,ef->blf"}> : () -> ()
      %cst_18 = arith.constant dense<0.000000e+00> : vector<8x14x128xf32>
      %22 = tpu.matmul %20, %21, %cst_18 {dimension_numbers = #tpu.dot_dimension_numbers<[2], [0], [0, 1], [1], [0, 0, 0, 1, 1, 1], [], []>} : vector<8x14x16xbf16>, vector<16x128xbf16>, vector<8x14x128xf32> -> vector<8x14x128xf32>
      "tpu.trace_stop"() : () -> ()
      %23 = arith.addf %19, %22 : vector<8x14x128xf32>
      %24 = vector.extract_strided_slice %10 {offsets = [0, 3, 0], sizes = [8, 14, 16], strides = [1, 1, 1]} : vector<8x18x16xbf16> to vector<8x14x16xbf16>
      %c48 = arith.constant 48 : index
      %c0_19 = arith.constant 0 : index
      %25 = vector.load %arg3[%c48, %c0_19] : memref<80x128xbf16, #tpu.memory_space<vmem>>, vector<16x128xbf16>
      "tpu.trace_start"() <{level = 10 : i32, message = "ble,ef->blf"}> : () -> ()
      %cst_20 = arith.constant dense<0.000000e+00> : vector<8x14x128xf32>
      %26 = tpu.matmul %24, %25, %cst_20 {dimension_numbers = #tpu.dot_dimension_numbers<[2], [0], [0, 1], [1], [0, 0, 0, 1, 1, 1], [], []>} : vector<8x14x16xbf16>, vector<16x128xbf16>, vector<8x14x128xf32> -> vector<8x14x128xf32>
      "tpu.trace_stop"() : () -> ()
      %27 = arith.addf %23, %26 : vector<8x14x128xf32>
      %28 = vector.extract_strided_slice %10 {offsets = [0, 4, 0], sizes = [8, 14, 16], strides = [1, 1, 1]} : vector<8x18x16xbf16> to vector<8x14x16xbf16>
      %c64 = arith.constant 64 : index
      %c0_21 = arith.constant 0 : index
      %29 = vector.load %arg3[%c64, %c0_21] : memref<80x128xbf16, #tpu.memory_space<vmem>>, vector<16x128xbf16>
      "tpu.trace_start"() <{level = 10 : i32, message = "ble,ef->blf"}> : () -> ()
      %cst_22 = arith.constant dense<0.000000e+00> : vector<8x14x128xf32>
      %30 = tpu.matmul %28, %29, %cst_22 {dimension_numbers = #tpu.dot_dimension_numbers<[2], [0], [0, 1], [1], [0, 0, 0, 1, 1, 1], [], []>} : vector<8x14x16xbf16>, vector<16x128xbf16>, vector<8x14x128xf32> -> vector<8x14x128xf32>
      "tpu.trace_stop"() : () -> ()
      %31 = arith.addf %27, %30 : vector<8x14x128xf32>
      %c0_23 = arith.constant 0 : index
      %c0_24 = arith.constant 0 : index
      %32 = vector.load %arg4[%c0_23, %c0_24] : memref<1x128xf32, #tpu.memory_space<vmem>>, vector<1x128xf32>
      %33 = vector.shape_cast %32 : vector<1x128xf32> to vector<1x1x128xf32>
      %34 = vector.broadcast %33 : vector<1x1x128xf32> to vector<8x14x128xf32>
      %35 = arith.addf %31, %34 : vector<8x14x128xf32>
      %cst_25 = arith.constant 0.000000e+00 : f32
      %36 = vector.broadcast %cst_25 : f32 to vector<8x14x128xf32>
      %37 = arith.maximumf %35, %36 : vector<8x14x128xf32>
      %c0_26 = arith.constant 0 : index
      %c0_27 = arith.constant 0 : index
      %38 = vector.load %arg5[%c0_26, %c0_27] : memref<14x128xf32, #tpu.memory_space<vmem>>, vector<14x128xf32>
      %39 = vector.shape_cast %38 : vector<14x128xf32> to vector<1x14x128xf32>
      %40 = vector.broadcast %39 : vector<1x14x128xf32> to vector<8x14x128xf32>
      %41 = arith.addf %37, %40 : vector<8x14x128xf32>
      %cst_28 = arith.constant dense<0xFF800000> : vector<8x128xf32>
      %42 = vector.multi_reduction <maximumf>, %41, %cst_28 [1] : vector<8x14x128xf32> to vector<8x128xf32>
      %c0_29 = arith.constant 0 : index
      %c0_30 = arith.constant 0 : index
      %43 = vector.load %arg9[%c0_29, %c0_30] : memref<8x128xf32, #tpu.memory_space<vmem>>, vector<8x128xf32>
      tpu.vector_store %arg9[%c0_29, %c0_30], %42 {strides = array<i32>} : memref<8x128xf32, #tpu.memory_space<vmem>>, vector<8x128xf32>,
      %44 = arith.truncf %42 : vector<8x128xf32> to vector<8x128xbf16>
      %c0_31 = arith.constant 0 : index
      %c0_32 = arith.constant 0 : index
      %45 = vector.load %arg10[%c0_31, %c0_32] : memref<8x128xbf16, #tpu.memory_space<vmem>>, vector<8x128xbf16>
      tpu.vector_store %arg10[%c0_31, %c0_32], %44 {strides = array<i32>} : memref<8x128xbf16, #tpu.memory_space<vmem>>, vector<8x128xbf16>,
    } else {
    }
    %c0 = arith.constant 0 : index
    %c0_1 = arith.constant 0 : index
    %3 = vector.load %arg10[%c0, %c0_1] : memref<8x128xbf16, #tpu.memory_space<vmem>>, vector<8x128xbf16>
    %c0_2 = arith.constant 0 : index
    %c0_3 = arith.constant 0 : index
    %4 = vector.load %arg6[%c0_2, %c0_3] : memref<128x128xbf16, #tpu.memory_space<vmem>>, vector<128x128xbf16>
    %cst = arith.constant dense<0.000000e+00> : vector<8x128xf32>
    %5 = tpu.matmul %3, %4, %cst {dimension_numbers = #tpu.dot_dimension_numbers<[1], [0], [0], [1], [0, 0, 1, 1], [], []>} : vector<8x128xbf16>, vector<128x128xbf16>, vector<8x128xf32> -> vector<8x128xf32>
    %c0_4 = arith.constant 0 : index
    %c0_5 = arith.constant 0 : index
    %6 = vector.load %arg7[%c0_4, %c0_5] : memref<1x128xf32, #tpu.memory_space<vmem>>, vector<1x128xf32>
    %7 = vector.broadcast %6 : vector<1x128xf32> to vector<8x128xf32>
    %8 = arith.addf %5, %7 : vector<8x128xf32>
    %c0_6 = arith.constant 0 : index
    %c0_7 = arith.constant 0 : index
    %9 = vector.load %arg8[%c0_6, %c0_7] : memref<8x128xf32, #tpu.memory_space<vmem>>, vector<8x128xf32>
    tpu.vector_store %arg8[%c0_6, %c0_7], %8 {strides = array<i32>} : memref<8x128xf32, #tpu.memory_space<vmem>>, vector<8x128xf32>,
    return
  }
  func.func @transform_0(%arg0: i32, %arg1: i32) -> (i32, i32, i32) {
    %c0_i32 = arith.constant 0 : i32
    %c0_i32_0 = arith.constant 0 : i32
    %c0_i32_1 = arith.constant 0 : i32
    return %arg0, %c0_i32, %c0_i32_0 : i32, i32, i32
  }
  func.func @transform_1(%arg0: i32, %arg1: i32) -> (i32, i32) {
    %c0_i32 = arith.constant 0 : i32
    %c0_i32_0 = arith.constant 0 : i32
    %c0_i32_1 = arith.constant 0 : i32
    return %c0_i32, %c0_i32_0 : i32, i32
  }
  func.func @transform_2(%arg0: i32, %arg1: i32) -> (i32, i32) {
    %c0_i32 = arith.constant 0 : i32
    %c0_i32_0 = arith.constant 0 : i32
    %c0_i32_1 = arith.constant 0 : i32
    return %c0_i32, %c0_i32_0 : i32, i32
  }
  func.func @transform_3(%arg0: i32, %arg1: i32) -> (i32, i32) {
    %c0_i32 = arith.constant 0 : i32
    %c0_i32_0 = arith.constant 0 : i32
    %c0_i32_1 = arith.constant 0 : i32
    return %c0_i32, %c0_i32_0 : i32, i32
  }
  func.func @transform_4(%arg0: i32, %arg1: i32) -> (i32, i32) {
    %c0_i32 = arith.constant 0 : i32
    %c0_i32_0 = arith.constant 0 : i32
    return %c0_i32, %arg1 : i32, i32
  }
  func.func @transform_5(%arg0: i32, %arg1: i32) -> (i32, i32) {
    %c0_i32 = arith.constant 0 : i32
    %c0_i32_0 = arith.constant 0 : i32
    return %c0_i32, %arg1 : i32, i32
  }
  func.func @transform_6(%arg0: i32, %arg1: i32) -> (i32, i32) {
    %c0_i32 = arith.constant 0 : i32
    return %arg0, %arg1 : i32, i32
  }
  func.func @transform_7(%arg0: i32, %arg1: i32) -> (i32, i32) {
    %c0_i32 = arith.constant 0 : i32
    %c0_i32_0 = arith.constant 0 : i32
    return %arg0, %c0_i32 : i32, i32
  }
}

</mosaic_0001>

<bundles_post_ra>
// kernel: tpu_custom_call.1
= control target key start
LH: loop header
LB: loop body
LE: loop exit
PB: predicated region body
PF: predicated region fallthrough
CT: control target
= control target key end

     0   :  { %13 = vsyncpa [#allocation4], 0  ;;  %s9129_s0 = inlined_call_operand.vmem [shape: bf16[8,18,16], index: 0, kind: input, shape index: {}]   ;;  %s9130_s1 = inlined_call_operand.hbm [shape: bf16[80,128], index: 1, kind: input, shape index: {}]   ;;  %s9131_s2 = inlined_call_operand.vmem [shape: f32[1,128], index: 2, kind: input, shape index: {}]   ;;  %s9132_s3 = inlined_call_operand.vmem [shape: f32[14,128], index: 3, kind: input, shape index: {}]   ;;  %s9133_s4 = inlined_call_operand.vmem [shape: bf16[128,256], index: 4, kind: input, shape index: {}]   ;;  %s9134_s5 = inlined_call_operand.vmem [shape: f32[1,256], index: 5, kind: input, shape index: {}]   ;;  %s9135_s6 = inlined_call_operand.hbm [shape: f32[8,256], index: 6, kind: output, shape index: {0}]   ;;  %s9136_s7 = inlined_call_operand.hbm [shape: f32[8,128], index: 7, kind: output, shape index: {1}]  }
   0x1   :  { %14 = vsyncpa [#allocation5], 0 }
   0x2   :  { %16 = vsyncpa [#allocation5 + $0x1], 0 }
   0x3   :  { %17 = vsyncpa [#allocation9], 0  ;;  %s6787_s24 = smov 0   ;;  %s6789_s25 = smov 0  }
   0x4   :  { %s6791_s26 = smov 0   ;;  %s6793_s27 = smov 0  }
   0x5   :  { %s6795_s28 = smov 0   ;;  %s6797_s29 = smov 0  }
   0x6 LB: > { %s6094_s30 = sadd.s32 4294967295, %s6734_s29   ;;  %s6095_s8 = sadd.s32 4294967294, %s6734_s29   ;;  %s6734_s29 = sphi %s6797_s29, %s23_s29   ;;  %s6730_s28 = sphi %s6795_s28, %s9453_s28   ;;  %s6726_s27 = sphi %s6793_s27, %s9452_s27   ;;  %s6722_s26 = sphi %s6791_s26, %s9451_s26   ;;  %s6718_s25 = sphi %s6789_s25, %s9450_s25   ;;  %s6714_s24 = sphi %s6787_s24, %s9449_s24  }
   0x7   : > { %s32_s9 = sadd.s32 1, %s6730_s28  ;;  %s131_s10 = sadd.s32 1, %s6722_s26 }
   0x8   : > { %p33_p0 = scmp.ge.s32.totalorder %s32_s9, 2  ;;  %p138_p1 = scmp.ne.s32.totalorder %s6722_s26, %s6718_s25 }
   0x9   : > { %p139_p2 = scmp.eq.s32.totalorder %s6734_s29, 0  ;;  %p6824_p3 = scmp.eq.s32.totalorder %s6094_s30, 1 }
   0xa   : > { %s9455_s9 = smov (%p33_p0, %s32_s9), 0  ;;  %p201_p6 = scmp.ne.s32.totalorder %s6718_s25, %s6714_s24 }
   0xb   : > { %s9228_s11 = scalar_select %p6824_p3, 1, 0 }
   0xc   : > { %9229 = sst [smem:[#allocation13_spill]] %s9455_s9  ;;  %p6830_p4 = por %p139_p2, %p138_p1 }
   0xd   : > { %p6836_p5 = por %p6824_p3, %p138_p1  ;;  %s128_s14 = ssub.s32 %s6730_s28, %s9455_s9 }
   0xe   : > { %p129_p7 = scmp.eq.s32.totalorder %s128_s14, 0  ;;  %p202_p8 = scmp.eq.s32.totalorder %s6095_s8, 1 }
   0xf   : > { %s9231_s13 = scalar_select %p6836_p5, 1, 0 }
  0x10   : > { %p6096_p9 = scmp.ge.s32.totalorder %s6734_s29, 1  ;;  %p235_p10 = scmp.lt.s32.totalorder %s6734_s29, 3 }
  0x11   : > { %s6847_s15 = scalar_select %p129_p7, %s6722_s26, %s131_s10  }
  0x12   : > { %p6849_p11 = por %p202_p8, %p201_p6  ;;  %p6853_p12 = pnand %p6096_p9, %p235_p10 }
  0x13   : > { %9232 = sst [smem:[#allocation14_spill]] %s6847_s15  ;;  %p6857_p13 = scmp.eq.s32.totalorder %s6094_s30, 0 }
  0x14   : > { %s9233_s16 = scalar_select %p6849_p11, 1, 0 }
  0x15   : > { %p6514_p0 = pneg %p6853_p12  ;;  %s6736_s19 = smov [#allocation3]  }
  0x16   : > { %s257_s20 = sshll.u32 %s6736_s19, 4  ;;  %s258_s20 = int_to_ptr.vmem [resolvable:$true] %s257_s20 }
  0x17   : > { %p6515_p1 = pnand %p6857_p13, %p6514_p0  ;;  %s6611_s21 = scalar_lea.vmem %s258_s20, 640 }
  0x18   : > { %p6612_p6 = scmp.ne.s32.totalorder %s258_s20, %s6611_s21  ;;  %p6619_p9 = scmp.lt.s32.totalorder %s258_s20, %s258_s20 }
  0x19   : > { %p6602_p2 = pneg %p6515_p1  ;;  %p6620_p10 = scmp.lt.s32.totalorder %s6611_s21, %s6611_s21 }
  0x1b   : > { %p6614_p7 = pnand %p6612_p6, %p6602_p2  ;;  %p6621_p11 = por %p6620_p10, %p6619_p9 }
  0x1d   : > { %p6615_p8 = pneg %p6614_p7 }
  0x1f   : > { %p6622_p5 = pnand %p6621_p11, %p6615_p8 }
  0x21   : > { %6625 = shalt.err (!%p6622_p5)
}
  0x22   : > { %s6737_s22 = smov 64   ;;  %s6738_s23 = smov 4  }
  0x23   : > { %6517 = dma.hbm_to_vmem [thread:$0]  (!%p6515_p1), %s9130_s1, 640, %s258_s20, [#allocation4], %s6737_s22, %s6737_s22, %s6738_s23  }
  0x24   : > { %p6099_p3 = scmp.ge.s32.totalorder %s6734_s29, 2 }
  0x26   : > { %273 = sbr.rel (%p6099_p3) target bundleno = 57 (0x39), region = 32 }
  0x2b   : > { %276 = sbr.rel (!%p6830_p4) target bundleno = 57 (0x39), region = 36  ;;  %s278_s10 = sand.u32 (%p6830_p4), 1, %s6722_s26  }
  0x2c   : > { %s6101_s14 = sshll.u32 (%p6830_p4), %s6730_s28, 2  ;;  %s6100_s19 = sshll.u32 (%p6830_p4), %s278_s10, 6 }
  0x2d   : > { %s6878_s15 = scalar_lea.vmem (%p6830_p4), %s9133_s4, %s6101_s14  ;;  %s280_s12 = scalar_lea.vmem (%p6830_p4), [#allocation6], %s6100_s19 }
  0x2e   : > { %v299_v0 = vld [vmem:[%s6878_s15] sm:$0xf] (%p6830_p4)  ;;  %v301_v1 = vld [vmem:[%s6878_s15 + $0x8] sm:$0xf] (%p6830_p4)  ;;  %v303_v2 = vld [vmem:[%s6878_s15 + $0x10] sm:$0xf] (%p6830_p4) }
  0x2f   : > { %300 = vst [vmem:[%s280_s12] sm:$0xf] (%p6830_p4), %v299_v0  ;;  %302 = vst [vmem:[%s280_s12 + $0x4] sm:$0xf] (%p6830_p4), %v301_v1  ;;  %v305_v3 = vld [vmem:[%s6878_s15 + $0x18] sm:$0xf] (%p6830_p4) }
  0x30   : > { %v307_v4 = vld [vmem:[%s6878_s15 + $0x20] sm:$0xf]  ;;  %304 = vst [vmem:[%s280_s12 + $0x8] sm:$0xf] %v303_v2  ;;  %306 = vst [vmem:[%s280_s12 + $0xc] sm:$0xf] %v305_v3 }
  0x31   : > { %308 = vst [vmem:[%s280_s12 + $0x10] sm:$0xf] %v307_v4  ;;  %v309_v5 = vld [vmem:[%s6878_s15 + $0x28] sm:$0xf]  ;;  %v311_v6 = vld [vmem:[%s6878_s15 + $0x30] sm:$0xf] }
  0x32   : > { %v313_v7 = vld [vmem:[%s6878_s15 + $0x38] sm:$0xf]  ;;  %310 = vst [vmem:[%s280_s12 + $0x14] sm:$0xf] %v309_v5  ;;  %312 = vst [vmem:[%s280_s12 + $0x18] sm:$0xf] %v311_v6 }
  0x33   : > { %314 = vst [vmem:[%s280_s12 + $0x1c] sm:$0xf] %v313_v7  ;;  %v315_v8 = vld [vmem:[%s6878_s15 + $0x40] sm:$0xf]  ;;  %v317_v9 = vld [vmem:[%s6878_s15 + $0x48] sm:$0xf] }
  0x34   : > { %v319_v10 = vld [vmem:[%s6878_s15 + $0x50] sm:$0xf]  ;;  %316 = vst [vmem:[%s280_s12 + $0x20] sm:$0xf] %v315_v8  ;;  %318 = vst [vmem:[%s280_s12 + $0x24] sm:$0xf] %v317_v9 }
  0x35   : > { %320 = vst [vmem:[%s280_s12 + $0x28] sm:$0xf] %v319_v10  ;;  %v321_v11 = vld [vmem:[%s6878_s15 + $0x58] sm:$0xf]  ;;  %v323_v12 = vld [vmem:[%s6878_s15 + $0x60] sm:$0xf] }
  0x36   : > { %v325_v13 = vld [vmem:[%s6878_s15 + $0x68] sm:$0xf]  ;;  %322 = vst [vmem:[%s280_s12 + $0x2c] sm:$0xf] %v321_v11  ;;  %324 = vst [vmem:[%s280_s12 + $0x30] sm:$0xf] %v323_v12 }
  0x37   : > { %326 = vst [vmem:[%s280_s12 + $0x34] sm:$0xf] %v325_v13  ;;  %v327_v14 = vld [vmem:[%s6878_s15 + $0x70] sm:$0xf]  ;;  %v329_v15 = vld [vmem:[%s6878_s15 + $0x78] sm:$0xf] }
  0x38   : > { %328 = vst [vmem:[%s280_s12 + $0x38] sm:$0xf] %v327_v14  ;;  %330 = vst [vmem:[%s280_s12 + $0x3c] sm:$0xf] %v329_v15 }
  0x39 PF: > { %395 = sbr.rel (%p6853_p12) target bundleno = 850 (0x352), region = 81 }
  0x3e   : > { %6701 = dma.done.wait (%p6857_p13), [#allocation4], 640  }
  0x3f   : > { %6703 = vsyncadd (%p6857_p13), [#allocation4], 4294966656  ;;  %s6903_s9 = sand.u32 1, %s6718_s25   ;;  %p449_p4 = scmp.lt.s32.totalorder %s6726_s27, 1 }
  0x40   : > { %s6104_s15 = sshll.u32 %s6903_s9, 6  ;;  %s6105_s20 = sshll.u32 %s6903_s9, 3 }
  0x41   : > { %s6909_s22 = scalar_select %p449_p4, %s6726_s27, 1 }
  0x42   : > { %s6915_s8 = scalar_lea.vmem [#allocation6], %s6104_s15  ;;  %s6917_s18 = scalar_lea.vmem [#allocation7], %s6105_s20 }
  0x43   : > { %s451_s30 = scalar_lea.vmem %s9134_s5, %s6909_s22  ;;  %p6106_p5 = scmp.ne.s32.totalorder %s6726_s27, 0 }
  0x45   : > { %456 = sbr.rel (%p6106_p5) target bundleno = 606 (0x25e), region = 93 }
  0x4a   : > { %v6585_v16 = vld [vmem:[#allocation3 + $0x8] sm:$0xff]   ;;  %v512_v17 = vlaneseq  ;;  %v9141_v18 = vmov 0.0   ;;  %v6107_v19 = vld.sshfl [vmem:[%s9129_s0] sm:$0x33 pattern:$0x75316420] }
  0x4b   : > { %6332 = vmatprep.subr.bf16.mxu0 %v9141_v18  ;;  %6502 = vmatprep.subr.bf16.mxu1 %v9141_v18  ;;  %v6108_v20 = vld.sshfl [vmem:[%s9129_s0 + $0x4] sm:$0x33 pattern:$0x75316420]  ;;  %vm6740_vm0 = vmmov 0   ;;  %v508_v25 = vcombine.high %v6107_v19, %v6107_v19 }
  0x4c   : > { %6333 = vmatpush3.bf16.msra.mxu0 %v6585_v16  ;;  %6503 = vmatpush3.bf16.msra.mxu1 %v6585_v16  ;;  %v6109_v21 = vld.sshfl [vmem:[%s9129_s0 + $0xc] sm:$0x33 pattern:$0x75316420]  ;;  %v6741_v22 = vmov 1966171168   ;;  %v532_v27 = vcombine.high %v6108_v20, %v6108_v20 }
  0x4d   : > { %6334 = vmatprep.mubr.msk.bf16.mxu0 %vm6740_vm0, %v9141_v18  ;;  %6350 = vmatprep.mubr.msk.bf16.mxu1 %vm6740_vm0, %v9141_v18  ;;  %v510_v23 = vunpack.c.l.s4 %v6741_v22  ;;  %v6935_v24 = vshrl.u32 %v512_v17, 7  ;;  %vm885_vm1 = vsmask.f32 256  ;;  %vm886_vm2 = vsmask.f32 1284 }
  0x4e   : > { %6392 = vmatprep.subr.bf16.mxu0 %v9141_v18  ;;  %vm888_vm3 = vsmask.f32 2312  ;;  %6362 = vmatprep.subr.bf16.mxu1 %v9141_v18  ;;  %vm887_vm4 = vmor %vm885_vm1, %vm886_vm2  ;;  %vm890_vm5 = vsmask.f32 3340  ;;  %vm892_vm6 = vsmask.f32 4368  ;;  %v556_v28 = vcombine.high %v6109_v21, %v6109_v21 }
  0x4f   : > { %9236 = vst [vmem:[#allocation15_spill] sm:$0xff] %v6935_v24  ;;  %v511_v26 = vunpack.c.0.s8 %v510_v23  ;;  %vm889_vm7 = vmor %vm887_vm4, %vm888_vm3  ;;  %vm894_vm8 = vsmask.f32 5396  ;;  %vm896_vm9 = vsmask.f32 6424  ;;  %vm1705_vm1 = vcmask 130048  }
  0x50   : > { %vm891_vm10 = vmor %vm889_vm7, %vm890_vm5  ;;  %v6116_v30 = vld.sshfl [vmem:[%s9129_s0 + $0x34] sm:$0x33 pattern:$0x75316420]  ;;  %vm898_vm12 = vsmask.f32 7452 }
  0x51   : > { %v6940_v29 = vsub.s32 %v511_v26, %v6935_v24  ;;  %vm893_vm11 = vmor %vm891_vm10, %vm892_vm6  ;;  %v724_v31 = vcombine.high %v6116_v30, %v6116_v30  ;;  %v6117_v9 = vld.sshfl [vmem:[%s9129_s0 + $0x3c] sm:$0x33 pattern:$0x75316420]  ;;  %vm5762_vm2 = vcmask 1041409   ;;  %vm5764_vm3 = vcmask 1042434  }
  0x52   : > { %vm895_vm13 = vmor %vm893_vm11, %vm894_vm8  ;;  %v6118_v14 = vld.sshfl [vmem:[%s9129_s0 + $0x40] sm:$0x33 pattern:$0x75316420]  ;;  %v748_v22 = vcombine.high %v6117_v9, %v6117_v9  ;;  %vm5766_vm4 = vcmask 1043459   ;;  %vm5768_vm5 = vcmask 1044484  }
  0x53   : > { %v6946_v32 = vrot.slane %v6107_v19, %v6940_v29  ;;  %v6949_v33 = vrot.slane %v508_v25, %v6940_v29  ;;  %v6952_v34 = vrot.slane %v6108_v20, %v6940_v29  ;;  %v6955_v35 = vrot.slane %v532_v27, %v6940_v29  ;;  %vm897_vm14 = vmor %vm895_vm13, %vm896_vm9 }
  0x54   : > { %v6958_v36 = vrot.slane %v6109_v21, %v6940_v29  ;;  %v6961_v37 = vrot.slane %v556_v28, %v6940_v29  ;;  %v6964_v38 = vrot.slane %v6116_v30, %v6940_v29  ;;  %v6967_v39 = vrot.slane %v724_v31, %v6940_v29  ;;  %vm6986_vm15 = vmor %vm897_vm14, %vm898_vm12 }
  0x55   : > { %v6971_v40 = vcombine.high %v6946_v32, %v6946_v32  ;;  %v6975_v41 = vcombine.high %v6949_v33, %v6949_v33  ;;  %v6979_v42 = vcombine.high %v6952_v34, %v6952_v34  ;;  %v6983_v43 = vcombine.high %v6955_v35, %v6955_v35 }
  0x56   : > { %v901_v45 = vshrl.u32 %v6946_v32, 16  ;;  %v906_v46 = vshll.u32 %v6949_v33, 16  ;;  %v909_v47 = vshrl.u32 %v6949_v33, 16  ;;  %v930_v48 = vshll.u32 %v6952_v34, 16 }
  0x57   : > { %v914_v49 = vshll.u32 %v6971_v40, 16  ;;  %v917_v50 = vshrl.u32 %v6971_v40, 16  ;;  %v922_v51 = vshll.u32 %v6975_v41, 16  ;;  %v925_v52 = vshrl.u32 %v6975_v41, 16 }
  0x58   : > { %v908_v53 = vsel %vm6986_vm15, %v901_v45, %v906_v46  ;;  %v933_v54 = vshrl.u32 %v6952_v34, 16  ;;  %v938_v55 = vshll.u32 %v6955_v35, 16  ;;  %v941_v56 = vshrl.u32 %v6955_v35, 16 }
  0x59   : > { %v7005_v57 = vsel %vm6986_vm15, %v909_v47, %v914_v49  ;;  %v7009_v58 = vsel %vm6986_vm15, %v917_v50, %v922_v51  ;;  %v7013_v59 = vsel %vm6986_vm15, %v925_v52, %v930_v48  ;;  %v946_v60 = vshll.u32 %v6979_v42, 16 }
  0x5a   : > { %v7018_v61 = vsel %vm6986_vm15, %v933_v54, %v938_v55  ;;  %v949_v62 = vshrl.u32 %v6979_v42, 16  ;;  %v954_v63 = vshll.u32 %v6983_v43, 16  ;;  %v958_v0 = vshrl.u32 %v6958_v36, 16 }
  0x5b   : > { %v7025_v1 = vsel %vm6986_vm15, %v941_v56, %v946_v60  ;;  %v963_v2 = vshll.u32 %v6961_v37, 16  ;;  %v1356_v3 = vcombine.low %v908_v53, %v7005_v57  ;;  %v1357_v4 = vcombine.low %v7009_v58, %v7013_v59 }
  0x5c   : > { %v7033_v5 = vsel %vm6986_vm15, %v949_v62, %v954_v63  ;;  %v1358_v6 = vcombine.low %v7018_v61, %v7025_v1  ;;  %v7057_v19 = vcombine.high %v6964_v38, %v6964_v38  ;;  %v7061_v20 = vcombine.high %v6967_v39, %v6967_v39 }
  0x5d   : > { %v965_v10 = vsel %vm6986_vm15, %v958_v0, %v963_v2  ;;  %v1366_v11 = vrot.slane %v1356_v3, %v6940_v29  ;;  %v1373_v12 = vrot.slane %v1357_v4, %v6940_v29  ;;  %v7065_v23 = vrot.slane %v6117_v9, %v6940_v29  ;;  %v6586_v0 = vld [vmem:[#allocation3 + $0x10] sm:$0xff]  }
  0x5e   : > { %v1359_v15 = vcombine.low %v7033_v5, %v965_v10  ;;  %v1380_v16 = vrot.slane %v1358_v6, %v6940_v29  ;;  %9239 = vst [vmem:[#allocation16_spill] sm:$0xff] %v7061_v20  ;;  %v772_v25 = vcombine.high %v6118_v14, %v6118_v14  ;;  %v7069_v27 = vrot.slane %v6118_v14, %v6940_v29 }
  0x5f   : > { %v1388_v17 = vcombine.low %v1366_v11, %v1373_v12  ;;  %v1161_v28 = vshrl.u32 %v6964_v38, 16  ;;  %v1166_v30 = vshll.u32 %v6967_v39, 16  ;;  %v7074_v45 = vrot.slane %v748_v22, %v6940_v29 }
  0x60   : > { %v1387_v21 = vrot.slane %v1359_v15, %v6940_v29  ;;  %v7078_v46 = vcombine.high %v7065_v23, %v7065_v23  ;;  %v7081_v47 = vrot.slane %v772_v25, %v6940_v29  ;;  %v1169_v49 = vshrl.u32 %v6967_v39, 16 }
  0x61   : > { %v1396_v26 = vrot.slane %v1388_v17, %v6940_v29  ;;  %v7085_v48 = vsel %vm6986_vm15, %v1161_v28, %v1166_v30  ;;  %v1174_v50 = vshll.u32 %v7057_v19, 16  ;;  %v1177_v51 = vshrl.u32 %v7057_v19, 16  ;;  %v6111_v28 = vld.sshfl [vmem:[%s9129_s0 + $0x18] sm:$0x33 pattern:$0x75316420] }
  0x62   : > { %v1389_v31 = vcombine.low %v1380_v16, %v1387_v21  ;;  %9240 = vst [vmem:[#allocation17_spill] sm:$0xff] %v7081_v47  ;;  %9241 = vst [vmem:[#allocation18_spill] sm:$0xff] %v7085_v48  ;;  %v7093_v53 = vcombine.high %v7074_v45, %v7074_v45  ;;  %v1182_v54 = vshll.u32 %v7061_v20, 16  ;;  %v1186_v55 = vshrl.u32 %v7065_v23, 16 }
  0x63   : > { %v7099_v56 = vsel %vm6986_vm15, %v1169_v49, %v1174_v50  ;;  %v1191_v60 = vshll.u32 %v7074_v45, 16  ;;  %v1194_v62 = vshrl.u32 %v7074_v45, 16  ;;  %v1199_v63 = vshll.u32 %v7078_v46, 16 }
  0x64   : > { %v1403_v52 = vrot.slane %v1389_v31, %v6940_v29  ;;  %9242 = vst [vmem:[#allocation19_spill] sm:$0xff] %v7099_v56  ;;  %v7106_v3 = vsel %vm6986_vm15, %v1177_v51, %v1182_v54  ;;  %v1202_v4 = vshrl.u32 %v7078_v46, 16  ;;  %v1207_v6 = vshll.u32 %v7093_v53, 16 }
  0x65   : > { %9243 = vst [vmem:[#allocation20_spill] sm:$0xff] %v7106_v3  ;;  %v1193_v9 = vsel %vm6986_vm15, %v1186_v55, %v1191_v60  ;;  %v7114_v10 = vsel %vm6986_vm15, %v1194_v62, %v1199_v63  ;;  %v1210_v11 = vshrl.u32 %v7093_v53, 16  ;;  %v1215_v12 = vshll.u32 %v7069_v27, 16 }
  0x66   : > { %v1404_v2 = vcombine.low %v1396_v26, %v1403_v52  ;;  %9244 = vst [vmem:[#allocation21_spill] sm:$0xff] %v7114_v10  ;;  %v7121_v14 = vsel %vm6986_vm15, %v1202_v4, %v1207_v6  ;;  %v1218_v15 = vshrl.u32 %v7069_v27, 16  ;;  %v1223_v16 = vshll.u32 %v7081_v47, 16 }
  0x67   : > { %9245 = vst [vmem:[#allocation22_spill] sm:$0xff] %v7121_v14  ;;  %v1552_v17 = vcombine.low %v7085_v48, %v7099_v56  ;;  %v6110_v21 = vld.sshfl [vmem:[%s9129_s0 + $0x10] sm:$0x33 pattern:$0x75316420]  ;;  %v7132_v22 = vsel %vm6986_vm15, %v1210_v11, %v1215_v12  ;;  %v1553_v25 = vcombine.low %v7106_v3, %v1193_v9  ;;  %v1554_v26 = vcombine.low %v7114_v10, %v7121_v14 }
  0x68   : > { %6335 = vmatmul.mubr.msk.bf16.vlgmr.msra.gmra.mxu0 %vm1705_vm1, %v1404_v2  ;;  %9246 = vst [vmem:[#allocation23_spill] sm:$0xff] %v7132_v22  ;;  %v966_v30 = vshrl.u32 %v6961_v37, 16  ;;  %v7145_v31 = vsel %vm6986_vm15, %v1218_v15, %v1223_v16  ;;  %v7150_v50 = vcombine.high %v6958_v36, %v6958_v36  ;;  %v7154_v51 = vcombine.high %v6961_v37, %v6961_v37 }
  0x69   : > { %6393 = vmatpush3.bf16.msra.mxu0 %v6586_v0  ;;  %6338 = vmatprep.mubr.msk.bf16.mxu0 %vm6740_vm0, %v9141_v18  ;;  %9247 = vst [vmem:[#allocation24_spill] sm:$0xff] %v7145_v31  ;;  %v1562_v49 = vrot.slane %v1552_v17, %v6940_v29  ;;  %v1555_v52 = vcombine.low %v7132_v22, %v7145_v31  ;;  %vm5770_vm6 = vcmask 1045509   ;;  %vm5772_vm7 = vcmask 1046534  }
  0x6a   : > { %6452 = vmatprep.subr.bf16.mxu0 %v9141_v18  ;;  %v1569_v54 = vrot.slane %v1553_v25, %v6940_v29  ;;  %v1576_v55 = vrot.slane %v1554_v26, %v6940_v29  ;;  %v580_v60 = vcombine.high %v6110_v21, %v6110_v21  ;;  %v7162_v62 = vrot.slane %v6110_v21, %v6940_v29 }
  0x6b   : > { %v604_v63 = vcombine.high %v6111_v28, %v6111_v28  ;;  %v7165_v0 = vrot.slane %v6111_v28, %v6940_v29  ;;  %v971_v2 = vshll.u32 %v7150_v50, 16  ;;  %v1583_v4 = vrot.slane %v1555_v52, %v6940_v29 }
  0x6c   : > { %v1584_v6 = vcombine.low %v1562_v49, %v1569_v54  ;;  %v7170_v9 = vrot.slane %v580_v60, %v6940_v29  ;;  %v974_v11 = vshrl.u32 %v7150_v50, 16  ;;  %v7175_v12 = vcombine.high %v7162_v62, %v7162_v62 }
  0x6d   : > { %v7178_v15 = vrot.slane %v604_v63, %v6940_v29  ;;  %v7182_v16 = vcombine.high %v7165_v0, %v7165_v0  ;;  %v7186_v17 = vsel %vm6986_vm15, %v966_v30, %v971_v2  ;;  %v1585_v21 = vcombine.low %v1576_v55, %v1583_v4  ;;  %v6587_v4 = vld [vmem:[#allocation3] sm:$0xff]  }
  0x6e   : > { %9248 = vst [vmem:[#allocation25_spill] sm:$0xff] %v7186_v17  ;;  %v1592_v25 = vrot.slane %v1584_v6, %v6940_v29  ;;  %v7191_v26 = vcombine.high %v7170_v9, %v7170_v9  ;;  %v979_v28 = vshll.u32 %v7154_v51, 16  ;;  %v982_v49 = vshrl.u32 %v7154_v51, 16 }
  0x6f   : > { %v987_v52 = vshll.u32 %v7162_v62, 16  ;;  %v990_v54 = vshrl.u32 %v7162_v62, 16  ;;  %v995_v60 = vshll.u32 %v7170_v9, 16  ;;  %v1599_v30 = vrot.slane %v1585_v21, %v6940_v29 }
  0x70   : > { %9249 = vst [vmem:[#allocation26_spill] sm:$0xff] %v7191_v26  ;;  %v7201_v55 = vsel %vm6986_vm15, %v974_v11, %v979_v28  ;;  %v998_v63 = vshrl.u32 %v7170_v9, 16  ;;  %v1003_v2 = vshll.u32 %v7175_v12, 16  ;;  %v1006_v8 = vshrl.u32 %v7175_v12, 16 }
  0x71   : > { %9250 = vst [vmem:[#allocation27_spill] sm:$0xff] %v7201_v55  ;;  %v7207_v6 = vsel %vm6986_vm15, %v982_v49, %v987_v52  ;;  %v7211_v13 = vsel %vm6986_vm15, %v990_v54, %v995_v60  ;;  %v1011_v21 = vshll.u32 %v7191_v26, 16  ;;  %v1600_v7 = vcombine.low %v1592_v25, %v1599_v30  ;;  %v6119_v25 = vld.sshfl [vmem:[%s9129_s0 + $0x48] sm:$0x33 pattern:$0x75316420] }
  0x72   : > { %9251 = vst [vmem:[#allocation28_spill] sm:$0xff] %v7207_v6  ;;  %9252 = vst [vmem:[#allocation29_spill] sm:$0xff] %v7211_v13  ;;  %v7217_v11 = vsel %vm6986_vm15, %v998_v63, %v1003_v2  ;;  %v1015_v28 = vshrl.u32 %v7165_v0, 16  ;;  %v1020_v18 = vshll.u32 %v7178_v15, 16  ;;  %v1023_v52 = vshrl.u32 %v7178_v15, 16 }
  0x73   : > { %9253 = vst [vmem:[#allocation30_spill] sm:$0xff] %v7217_v11  ;;  %v7223_v49 = vsel %vm6986_vm15, %v1006_v8, %v1011_v21  ;;  %v1028_v54 = vshll.u32 %v7182_v16, 16  ;;  %v1405_v60 = vcombine.low %v7186_v17, %v7201_v55  ;;  %6351 = vmatmul.mubr.msk.bf16.vlgmr.msra.gmra.mxu1 %vm1705_vm1, %v1600_v7  ;;  %v1406_v8 = vcombine.low %v7207_v6, %v7211_v13  ;;  %v6120_v2 = vld.sshfl [vmem:[%s9129_s0 + $0x4c] sm:$0x33 pattern:$0x75316420] }
  0x74   : > { %9254 = vst [vmem:[#allocation31_spill] sm:$0xff] %v7223_v49  ;;  %v1022_v30 = vsel %vm6986_vm15, %v1015_v28, %v1020_v18  ;;  %v1407_v63 = vcombine.low %v7217_v11, %v7223_v49  ;;  %6363 = vmatpush3.bf16.msra.mxu1 %v6587_v4  ;;  %v9255_v21 = vmov 0.0   ;;  %v9257_v28 = vcombine.low %v7005_v57, %v7009_v58 }
  0x75   : > { %6354 = vmatprep.mubr.msk.bf16.mxu1 %vm6740_vm0, %v9255_v21  ;;  %v7246_v7 = vsel %vm6986_vm15, %v1023_v52, %v1028_v54  ;;  %v1415_v18 = vrot.slane %v1405_v60, %v6940_v29  ;;  %v1422_v56 = vrot.slane %v1406_v8, %v6940_v29  ;;  %6422 = vmatprep.subr.bf16.mxu1 %v9255_v21  ;;  %vm5774_vm8 = vcmask 1047559  }
  0x76   : > { %9256 = vst [vmem:[#allocation32_spill] sm:$0xff] %v7246_v7  ;;  %v7253_v24 = vrot.slane %v9257_v28, %v6940_v29  ;;  %v1408_v10 = vcombine.low %v1022_v30, %v7246_v7  ;;  %v1429_v4 = vrot.slane %v1407_v63, %v6940_v29  ;;  %v7261_v52 = vcombine.high %v7069_v27, %v7069_v27 }
  0x77   : > { %v796_v54 = vcombine.high %v6119_v25, %v6119_v25  ;;  %v7264_v60 = vrot.slane %v6119_v25, %v6940_v29  ;;  %v820_v3 = vcombine.high %v6120_v2, %v6120_v2  ;;  %v1437_v58 = vcombine.low %v1415_v18, %v1422_v56 }
  0x78   : > { %9258 = vst [vmem:[#allocation33_spill] sm:$0xff] %v7253_v24  ;;  %9259 = vst [vmem:[#allocation34_spill] sm:$0xff] %v7261_v52  ;;  %v1436_v57 = vrot.slane %v1408_v10, %v6940_v29  ;;  %v7269_v30 = vcombine.high %v7081_v47, %v7081_v47  ;;  %v7272_v8 = vrot.slane %v6120_v2, %v6940_v29 }
  0x79   : > { %9260 = vst [vmem:[#allocation35_spill] sm:$0xff] %v7264_v60  ;;  %v9263_v63 = vcombine.low %v7013_v59, %v7018_v61  ;;  %v9265_v25 = vcombine.low %v7025_v1, %v7033_v5  ;;  %v7287_v56 = vrot.slane %v796_v54, %v6940_v29  ;;  %v7291_v10 = vcombine.high %v7264_v60, %v7264_v60 }
  0x7a   : > { %9261 = vst [vmem:[#allocation36_spill] sm:$0xff] %v7269_v30  ;;  %9262 = vst [vmem:[#allocation37_spill] sm:$0xff] %v7272_v8  ;;  %v1438_v2 = vcombine.low %v1429_v4, %v1436_v57  ;;  %v1445_v18 = vrot.slane %v1437_v58, %v6940_v29  ;;  %v7295_v59 = vrot.slane %v820_v3, %v6940_v29  ;;  %v1226_v61 = vshrl.u32 %v7081_v47, 16 }
  0x7b   : > { %v7278_v28 = vrot.slane %v9263_v63, %v6940_v29  ;;  %v7284_v31 = vrot.slane %v9265_v25, %v6940_v29  ;;  %9267 = vst [vmem:[#allocation40_spill] sm:$0xff] %v7287_v56  ;;  %9268 = vst [vmem:[#allocation41_spill] sm:$0xff] %v7291_v10  ;;  %v7300_v1 = vcombine.high %v7287_v56, %v7287_v56  ;;  %v1231_v54 = vshll.u32 %v7261_v52, 16 }
  0x7c   : > { %9269 = vst [vmem:[#allocation42_spill] sm:$0xff] %v7295_v59  ;;  %v7304_v5 = vcombine.high %v7272_v8, %v7272_v8  ;;  %v1234_v63 = vshrl.u32 %v7261_v52, 16  ;;  %v1452_v4 = vrot.slane %v1438_v2, %v6940_v29  ;;  %v1239_v57 = vshll.u32 %v7269_v30, 16 }
  0x7d   : > { %9264 = vst [vmem:[#allocation38_spill] sm:$0xff] %v7278_v28  ;;  %9266 = vst [vmem:[#allocation39_spill] sm:$0xff] %v7284_v31  ;;  %v1243_v3 = vshrl.u32 %v7264_v60, 16  ;;  %v1248_v58 = vshll.u32 %v7287_v56, 16  ;;  %v7314_v25 = vsel %vm6986_vm15, %v1226_v61, %v1231_v54  ;;  %v1251_v14 = vshrl.u32 %v7287_v56, 16 }
  0x7e   : > { %9270 = vst [vmem:[#allocation43_spill] sm:$0xff] %v7300_v1  ;;  %9271 = vst [vmem:[#allocation44_spill] sm:$0xff] %v7304_v5  ;;  %v1256_v22 = vshll.u32 %v7291_v10, 16  ;;  %v1259_v48 = vshrl.u32 %v7291_v10, 16  ;;  %v1453_v49 = vcombine.low %v1445_v18, %v1452_v4  ;;  %v7321_v2 = vsel %vm6986_vm15, %v1234_v63, %v1239_v57 }
  0x7f   : > { %9272 = vst [vmem:[#allocation45_spill] sm:$0xff] %v7314_v25  ;;  %9273 = vst [vmem:[#allocation46_spill] sm:$0xff] %v7321_v2  ;;  %v1250_v30 = vsel %vm6986_vm15, %v1243_v3, %v1248_v58  ;;  %v1264_v7 = vshll.u32 %v7300_v1, 16  ;;  %v1267_v13 = vshrl.u32 %v7300_v1, 16  ;;  %v1272_v18 = vshll.u32 %v7272_v8, 16 }
  0x80   : > { %v6112_v61 = vld.sshfl [vmem:[%s9129_s0 + $0x1c] sm:$0x33 pattern:$0x75316420]  ;;  %v7331_v54 = vsel %vm6986_vm15, %v1251_v14, %v1256_v22  ;;  %v1275_v63 = vshrl.u32 %v7272_v8, 16  ;;  %6339 = vmatmul.mubr.msk.bf16.gmra.mxu0 %vm1705_vm1, %v1453_v49  ;;  %v1280_v57 = vshll.u32 %v7295_v59, 16  ;;  %v1601_v22 = vcombine.low %v7314_v25, %v7321_v2 }
  0x81   : > { %9274 = vst [vmem:[#allocation47_spill] sm:$0xff] %v7331_v54  ;;  %v7339_v4 = vsel %vm6986_vm15, %v1259_v48, %v1264_v7  ;;  %v1283_v3 = vshrl.u32 %v7295_v59, 16  ;;  %v1288_v58 = vshll.u32 %v7304_v5, 16  ;;  %v7346_v14 = vsel %vm6986_vm15, %v1267_v13, %v1272_v18  ;;  %6342 = vmatprep.mubr.msk.bf16.mxu0 %vm6740_vm0, %v9255_v21 }
  0x82   : > { %9275 = vst [vmem:[#allocation48_spill] sm:$0xff] %v7339_v4  ;;  %9276 = vst [vmem:[#allocation49_spill] sm:$0xff] %v7346_v14  ;;  %v1602_v11 = vcombine.low %v1250_v30, %v7331_v54  ;;  %v6113_v48 = vld.sshfl [vmem:[%s9129_s0 + $0x24] sm:$0x33 pattern:$0x75316420]  ;;  %v7358_v49 = vcombine.high %v7178_v15, %v7178_v15  ;;  %v7362_v13 = vsel %vm6986_vm15, %v1275_v63, %v1280_v57 }
  0x83   : > { %9277 = vst [vmem:[#allocation50_spill] sm:$0xff] %v7362_v13  ;;  %v7366_v7 = vsel %vm6986_vm15, %v1283_v3, %v1288_v58  ;;  %v1603_v30 = vcombine.low %v7339_v4, %v7346_v14  ;;  %v628_v18 = vcombine.high %v6112_v61, %v6112_v61  ;;  %v1611_v54 = vrot.slane %v1601_v22, %v6940_v29 }
  0x84   : > { %9278 = vst [vmem:[#allocation51_spill] sm:$0xff] %v7366_v7  ;;  %v1604_v2 = vcombine.low %v7362_v13, %v7366_v7  ;;  %v1618_v25 = vrot.slane %v1602_v11, %v6940_v29  ;;  %v7375_v55 = vrot.slane %v6112_v61, %v6940_v29  ;;  %v652_v3 = vcombine.high %v6113_v48, %v6113_v48 }
  0x85   : > { %v1625_v63 = vrot.slane %v1603_v30, %v6940_v29  ;;  %v7379_v57 = vrot.slane %v628_v18, %v6940_v29  ;;  %v7382_v58 = vrot.slane %v6113_v48, %v6940_v29  ;;  %v1031_v11 = vshrl.u32 %v7182_v16, 16 }
  0x86   : > { %v1632_v14 = vrot.slane %v1604_v2, %v6940_v29  ;;  %v1633_v4 = vcombine.low %v1611_v54, %v1618_v25  ;;  %v7387_v22 = vcombine.high %v7375_v55, %v7375_v55  ;;  %v7395_v30 = vrot.slane %v652_v3, %v6940_v29 }
  0x87   : > { %v7392_v61 = vcombine.high %v7379_v57, %v7379_v57  ;;  %v7399_v48 = vcombine.high %v7382_v58, %v7382_v58  ;;  %v1036_v2 = vshll.u32 %v7358_v49, 16  ;;  %v1039_v18 = vshrl.u32 %v7358_v49, 16 }
  0x88   : > { %v1634_v25 = vcombine.low %v1625_v63, %v1632_v14  ;;  %v1641_v54 = vrot.slane %v1633_v4, %v6940_v29  ;;  %v1044_v7 = vshll.u32 %v7375_v55, 16  ;;  %v7407_v13 = vcombine.high %v7395_v30, %v7395_v30 }
  0x89   : > { %v7411_v3 = vsel %vm6986_vm15, %v1031_v11, %v1036_v2  ;;  %v1047_v6 = vshrl.u32 %v7375_v55, 16  ;;  %v1052_v26 = vshll.u32 %v7379_v57, 16  ;;  %v1055_v63 = vshrl.u32 %v7379_v57, 16 }
  0x8a   : > { %9279 = vst [vmem:[#allocation52_spill] sm:$0xff] %v7411_v3  ;;  %v1648_v14 = vrot.slane %v1634_v25, %v6940_v29  ;;  %v7418_v4 = vsel %vm6986_vm15, %v1039_v18, %v1044_v7  ;;  %v1060_v31 = vshll.u32 %v7387_v22, 16  ;;  %v1063_v11 = vshrl.u32 %v7387_v22, 16 }
  0x8b   : > { %9280 = vst [vmem:[#allocation53_spill] sm:$0xff] %v7418_v4  ;;  %v7424_v24 = vsel %vm6986_vm15, %v1047_v6, %v1052_v26  ;;  %v1068_v2 = vshll.u32 %v7392_v61, 16  ;;  %v1072_v28 = vshrl.u32 %v7382_v58, 16  ;;  %v1077_v7 = vshll.u32 %v7395_v30, 16 }
  0x8c   : > { %9281 = vst [vmem:[#allocation54_spill] sm:$0xff] %v7424_v24  ;;  %v1649_v1 = vcombine.low %v1641_v54, %v1648_v14  ;;  %v7431_v25 = vsel %vm6986_vm15, %v1055_v63, %v1060_v31  ;;  %v1080_v18 = vshrl.u32 %v7395_v30, 16  ;;  %v6121_v26 = vld.sshfl [vmem:[%s9129_s0 + $0x54] sm:$0x33 pattern:$0x75316420]  ;;  %v1454_v63 = vcombine.low %v7411_v3, %v7418_v4 }
  0x8d   : > { %9282 = vst [vmem:[#allocation55_spill] sm:$0xff] %v7431_v25  ;;  %v7440_v6 = vsel %vm6986_vm15, %v1063_v11, %v1068_v2  ;;  %v1085_v10 = vshll.u32 %v7399_v48, 16  ;;  %v1088_v54 = vshrl.u32 %v7399_v48, 16  ;;  %v1093_v14 = vshll.u32 %v7407_v13, 16 }
  0x8e   : > { %9283 = vst [vmem:[#allocation56_spill] sm:$0xff] %v7440_v6  ;;  %6355 = vmatmul.mubr.msk.bf16.gmra.mxu1 %vm1705_vm1, %v1649_v1  ;;  %v1079_v31 = vsel %vm6986_vm15, %v1072_v28, %v1077_v7  ;;  %v1455_v20 = vcombine.low %v7424_v24, %v7431_v25  ;;  %v6122_v11 = vld.sshfl [vmem:[%s9129_s0 + $0x58] sm:$0x33 pattern:$0x75316420]  ;;  %v7457_v2 = vcombine.high %v7295_v59, %v7295_v59  ;;  %v1158_v52 = vshll.u32 %v6964_v38, 16 }
  0x8f   : > { %6358 = vmatprep.mubr.msk.bf16.mxu1 %vm6740_vm0, %v9255_v21  ;;  %v7463_v28 = vsel %vm6986_vm15, %v1080_v18, %v1085_v10  ;;  %v7467_v1 = vsel %vm6986_vm15, %v1088_v54, %v1093_v14  ;;  %v1456_v7 = vcombine.low %v7440_v6, %v1079_v31  ;;  %v844_v25 = vcombine.high %v6121_v26, %v6121_v26 }
  0x90   : > { %9284 = vst [vmem:[#allocation57_spill] sm:$0xff] %v7457_v2  ;;  %9285 = vst [vmem:[#allocation58_spill] sm:$0xff] %v7463_v28  ;;  %v1457_v4 = vcombine.low %v7463_v28, %v7467_v1  ;;  %v1464_v24 = vrot.slane %v1454_v63, %v6940_v29  ;;  %v1471_v3 = vrot.slane %v1455_v20, %v6940_v29  ;;  %v1291_v20 = vshrl.u32 %v7304_v5, 16 }
  0x91   : > { %9286 = vst [vmem:[#allocation59_spill] sm:$0xff] %v7467_v1  ;;  %v7475_v17 = vrot.slane %v6121_v26, %v6940_v29  ;;  %v1478_v10 = vrot.slane %v1456_v7, %v6940_v29  ;;  %v7479_v18 = vrot.slane %v844_v25, %v6940_v29  ;;  %v868_v54 = vcombine.high %v6122_v11, %v6122_v11 }
  0x92   : > { %v7482_v14 = vrot.slane %v6122_v11, %v6940_v29  ;;  %v1485_v31 = vrot.slane %v1457_v4, %v6940_v29  ;;  %v1486_v6 = vcombine.low %v1464_v24, %v1471_v3  ;;  %v1296_v4 = vshll.u32 %v7457_v2, 16 }
  0x93   : > { %9287 = vst [vmem:[#allocation60_spill] sm:$0xff] %v7475_v17  ;;  %9288 = vst [vmem:[#allocation61_spill] sm:$0xff] %v7479_v18  ;;  %v7487_v63 = vcombine.high %v7475_v17, %v7475_v17  ;;  %v7492_v26 = vcombine.high %v7479_v18, %v7479_v18  ;;  %v7495_v25 = vrot.slane %v868_v54, %v6940_v29  ;;  %v1300_v7 = vshrl.u32 %v7475_v17, 16 }
  0x94   : > { %9289 = vst [vmem:[#allocation62_spill] sm:$0xff] %v7482_v14  ;;  %v7499_v11 = vcombine.high %v7482_v14, %v7482_v14  ;;  %v1487_v24 = vcombine.low %v1478_v10, %v1485_v31  ;;  %v1494_v3 = vrot.slane %v1486_v6, %v6940_v29  ;;  %v1305_v28 = vshll.u32 %v7479_v18, 16  ;;  %v6114_v17 = vld.sshfl [vmem:[%s9129_s0 + $0x28] sm:$0x33 pattern:$0x75316420] }
  0x95   : > { %9290 = vst [vmem:[#allocation63_spill] sm:$0xff] %v7487_v63  ;;  %9291 = vst [vmem:[#allocation64_spill] sm:$0xff] %v7492_v26  ;;  %v7507_v1 = vcombine.high %v7495_v25, %v7495_v25  ;;  %v7511_v54 = vsel %vm6986_vm15, %v1291_v20, %v1296_v4  ;;  %v1308_v5 = vshrl.u32 %v7479_v18, 16  ;;  %v1313_v8 = vshll.u32 %v7487_v63, 16 }
  0x96   : > { %9292 = vst [vmem:[#allocation65_spill] sm:$0xff] %v7495_v25  ;;  %9293 = vst [vmem:[#allocation66_spill] sm:$0xff] %v7499_v11  ;;  %v1501_v10 = vrot.slane %v1487_v24, %v6940_v29  ;;  %v1307_v6 = vsel %vm6986_vm15, %v1300_v7, %v1305_v28  ;;  %v1316_v31 = vshrl.u32 %v7487_v63, 16  ;;  %v1321_v2 = vshll.u32 %v7492_v26, 16 }
  0x97   : > { %9294 = vst [vmem:[#allocation67_spill] sm:$0xff] %v7507_v1  ;;  %9295 = vst [vmem:[#allocation68_spill] sm:$0xff] %v7511_v54  ;;  %v7525_v20 = vsel %vm6986_vm15, %v1308_v5, %v1313_v8  ;;  %v1324_v4 = vshrl.u32 %v7492_v26, 16  ;;  %v1329_v18 = vshll.u32 %v7482_v14, 16  ;;  %v1332_v24 = vshrl.u32 %v7482_v14, 16 }
  0x98   : > { %9296 = vst [vmem:[#allocation69_spill] sm:$0xff] %v7525_v20  ;;  %v1502_v59 = vcombine.low %v1494_v3, %v1501_v10  ;;  %v7532_v28 = vsel %vm6986_vm15, %v1316_v31, %v1321_v2  ;;  %v1337_v7 = vshll.u32 %v7495_v25, 16  ;;  %v1340_v63 = vshrl.u32 %v7495_v25, 16 }
  0x99   : > { %9297 = vst [vmem:[#allocation70_spill] sm:$0xff] %v7532_v28  ;;  %v7538_v60 = vsel %vm6986_vm15, %v1324_v4, %v1329_v18  ;;  %v1345_v8 = vshll.u32 %v7499_v11, 16  ;;  %v1348_v5 = vshrl.u32 %v7499_v11, 16  ;;  %v1353_v26 = vshll.u32 %v7507_v1, 16 }
  0x9a   : > { %9298 = vst [vmem:[#allocation71_spill] sm:$0xff] %v7538_v60  ;;  %6343 = vmatmul.mubr.msk.bf16.gmra.mxu0 %vm1705_vm1, %v1502_v59  ;;  %v7546_v2 = vsel %vm6986_vm15, %v1332_v24, %v1337_v7  ;;  %v1650_v3 = vcombine.low %v7511_v54, %v1307_v6  ;;  %v1651_v10 = vcombine.low %v7525_v20, %v7532_v28  ;;  %v6115_v18 = vld.sshfl [vmem:[%s9129_s0 + $0x30] sm:$0x33 pattern:$0x75316420] }
  0x9b   : > { %9299 = vst [vmem:[#allocation72_spill] sm:$0xff] %v7546_v2  ;;  %v676_v31 = vcombine.high %v6114_v17, %v6114_v17  ;;  %v7556_v4 = vsel %vm6986_vm15, %v1340_v63, %v1345_v8  ;;  %v7560_v59 = vsel %vm6986_vm15, %v1348_v5, %v1353_v26  ;;  %v1652_v24 = vcombine.low %v7538_v60, %v7546_v2 }
  0x9c   : > { %9300 = vst [vmem:[#allocation73_spill] sm:$0xff] %v7556_v4  ;;  %9301 = vst [vmem:[#allocation74_spill] sm:$0xff] %v7560_v59  ;;  %6346 = vmatprep.mubr.msk.bf16.mxu0 %vm6740_vm0, %v9255_v21  ;;  %v7567_v6 = vrot.slane %v6114_v17, %v6940_v29  ;;  %v1653_v7 = vcombine.low %v7556_v4, %v7560_v59  ;;  %v1660_v20 = vrot.slane %v1650_v3, %v6940_v29 }
  0x9d   : > { %v1667_v63 = vrot.slane %v1651_v10, %v6940_v29  ;;  %v7574_v8 = vrot.slane %v676_v31, %v6940_v29  ;;  %v1674_v26 = vrot.slane %v1652_v24, %v6940_v29  ;;  %v700_v2 = vcombine.high %v6115_v18, %v6115_v18 }
  0x9e   : > { %v7579_v5 = vcombine.high %v7567_v6, %v7567_v6  ;;  %v7582_v17 = vrot.slane %v6115_v18, %v6940_v29  ;;  %v1681_v28 = vrot.slane %v1653_v7, %v6940_v29  ;;  %v1096_v10 = vshrl.u32 %v7407_v13, 16 }
  0x9f   : > { %v1682_v59 = vcombine.low %v1660_v20, %v1667_v63  ;;  %v7587_v3 = vcombine.high %v7574_v8, %v7574_v8  ;;  %v7591_v31 = vrot.slane %v700_v2, %v6940_v29  ;;  %v1101_v4 = vshll.u32 %v7567_v6, 16 }
  0xa0   : > { %v7595_v24 = vcombine.high %v7582_v17, %v7582_v17  ;;  %v1104_v18 = vshrl.u32 %v7567_v6, 16  ;;  %v1683_v60 = vcombine.low %v1674_v26, %v1681_v28  ;;  %v1109_v7 = vshll.u32 %v7574_v8, 16 }
  0xa1   : > { %9302 = vst [vmem:[#allocation75_spill] sm:$0xff] %v7587_v3  ;;  %v1690_v20 = vrot.slane %v1682_v59, %v6940_v29  ;;  %v1112_v63 = vshrl.u32 %v7574_v8, 16  ;;  %v7604_v54 = vcombine.high %v7591_v31, %v7591_v31  ;;  %v7608_v2 = vsel %vm6986_vm15, %v1096_v10, %v1101_v4 }
  0xa2   : > { %v1117_v1 = vshll.u32 %v7579_v5, 16  ;;  %v1120_v25 = vshrl.u32 %v7579_v5, 16  ;;  %v1697_v28 = vrot.slane %v1683_v60, %v6940_v29  ;;  %v7615_v59 = vsel %vm6986_vm15, %v1104_v18, %v1109_v7 }
  0xa3   : > { %9303 = vst [vmem:[#allocation76_spill] sm:$0xff] %v7615_v59  ;;  %v1125_v26 = vshll.u32 %v7587_v3, 16  ;;  %v1129_v11 = vshrl.u32 %v7582_v17, 16  ;;  %v1134_v4 = vshll.u32 %v7591_v31, 16  ;;  %v1137_v10 = vshrl.u32 %v7591_v31, 16  ;;  %v9376_v44 = vld [vmem:[#allocation74_spill] sm:$0xff] }
  0xa4   : > { %v7621_v14 = vsel %vm6986_vm15, %v1112_v63, %v1117_v1  ;;  %v1142_v56 = vshll.u32 %v7595_v24, 16  ;;  %v1698_v47 = vcombine.low %v1690_v20, %v1697_v28  ;;  %v1145_v18 = vshrl.u32 %v7595_v24, 16 }
  0xa5   : > { %v7628_v60 = vsel %vm6986_vm15, %v1120_v25, %v1125_v26  ;;  %v1150_v7 = vshll.u32 %v7604_v54, 16  ;;  %v1136_v3 = vsel %vm6986_vm15, %v1129_v11, %v1134_v4  ;;  %v1153_v63 = vshrl.u32 %v7604_v54, 16 }
  0xa6   : > { %9304 = vst [vmem:[#allocation77_spill] sm:$0xff] %v7628_v60  ;;  %v7636_v1 = vsel %vm6986_vm15, %v1137_v10, %v1142_v56  ;;  %6359 = vmatmul.mubr.msk.bf16.gmra.mxu1 %vm1705_vm1, %v1698_v47  ;;  %v1503_v20 = vcombine.low %v7608_v2, %v7615_v59  ;;  %v1504_v11 = vcombine.low %v7621_v14, %v7628_v60 }
  0xa7   : > { %9305 = vst [vmem:[#allocation78_spill] sm:$0xff] %v7636_v1  ;;  %v7643_v25 = vsel %vm6986_vm15, %v1145_v18, %v1150_v7  ;;  %v1505_v28 = vcombine.low %v1136_v3, %v7636_v1  ;;  %6364 = vmatprep.mubr.msk.bf16.mxu1 %vm6740_vm0, %v9255_v21  ;;  %v7654_v56 = vsel %vm6986_vm15, %v1153_v63, %v1158_v52 }
  0xa8   : > { %9306 = vst [vmem:[#allocation79_spill] sm:$0xff] %v7643_v25  ;;  %9307 = vst [vmem:[#allocation80_spill] sm:$0xff] %v7654_v56  ;;  %v1816_v47 = vcombine.low %v6946_v32, %v6949_v33  ;;  %v6187_v26 = vcombine.high %v6946_v32, %v6949_v33  ;;  %v1818_v4 = vcombine.low %v6952_v34, %v6955_v35 }
  0xa9   : > { %v1506_v10 = vcombine.low %v7643_v25, %v7654_v56  ;;  %v1513_v3 = vrot.slane %v1503_v20, %v6940_v29  ;;  %v1520_v18 = vrot.slane %v1504_v11, %v6940_v29  ;;  %v1527_v7 = vrot.slane %v1505_v28, %v6940_v29 }
  0xaa   : > { %v1819_v52 = vcombine.low %v6979_v42, %v6958_v36  ;;  %v1826_v63 = vrot.slane %v1816_v47, %v6940_v29  ;;  %v7671_v60 = vrot.slane %v6187_v26, %v6940_v29  ;;  %v7674_v32 = vrot.slane %v1818_v4, %v6940_v29 }
  0xab   : > { %v1534_v1 = vrot.slane %v1506_v10, %v6940_v29  ;;  %v1535_v56 = vcombine.low %v1513_v3, %v1520_v18  ;;  %v1865_v20 = vcombine.low %v6961_v37, %v7150_v50  ;;  %v1866_v11 = vcombine.low %v7154_v51, %v7162_v62 }
  0xac   : > { %v1847_v28 = vrot.slane %v1819_v52, %v6940_v29  ;;  %v1848_v25 = vcombine.low %v1826_v63, %v7671_v60  ;;  %v1867_v47 = vcombine.low %v7170_v9, %v7175_v12  ;;  %v1868_v26 = vcombine.low %v7165_v0, %v7178_v15 }
  0xad   : > { %v1536_v4 = vcombine.low %v1527_v7, %v1534_v1  ;;  %v1543_v10 = vrot.slane %v1535_v56, %v6940_v29  ;;  %v1875_v3 = vrot.slane %v1865_v20, %v6940_v29  ;;  %v7690_v18 = vrot.slane %v1866_v11, %v6940_v29 }
  0xae   : > { %v1849_v51 = vcombine.low %v7674_v32, %v1847_v28  ;;  %v1856_v52 = vrot.slane %v1848_v25, %v6940_v29  ;;  %v7695_v63 = vrot.slane %v1867_v47, %v6940_v29  ;;  %v1896_v12 = vrot.slane %v1868_v26, %v6940_v29  ;;  %v6588_v26 = vld [vmem:[#allocation3 + $0x18] sm:$0xff]  }
  0xaf   : > { %v1550_v59 = vrot.slane %v1536_v4, %v6940_v29  ;;  %v1897_v1 = vcombine.low %v1875_v3, %v7690_v18  ;;  %v2585_v56 = vcombine.low %v6949_v33, %v6971_v40  ;;  %v2586_v7 = vcombine.low %v6975_v41, %v6952_v34 }
  0xb0   : > { %v1863_v20 = vrot.slane %v1849_v51, %v6940_v29  ;;  %v1898_v11 = vcombine.low %v7695_v63, %v1896_v12  ;;  %v2587_v25 = vcombine.low %v6955_v35, %v6979_v42  ;;  %v2588_v28 = vcombine.low %v6983_v43, %v6961_v37 }
  0xb1   : > { %v1551_v47 = vcombine.low %v1543_v10, %v1550_v59  ;;  %v1905_v4 = vrot.slane %v1897_v1, %v6940_v29  ;;  %v2595_v3 = vrot.slane %v2585_v56, %v6940_v29  ;;  %v2602_v33 = vrot.slane %v2586_v7, %v6940_v29 }
  0xb2   : > { %v1864_v40 = vcombine.low %v1856_v52, %v1863_v20  ;;  %v1912_v41 = vrot.slane %v1898_v11, %v6940_v29  ;;  %v2609_v51 = vrot.slane %v2587_v25, %v6940_v29  ;;  %v2616_v12 = vrot.slane %v2588_v28, %v6940_v29  ;;  %v6215_v25 = vld.sshfl [vmem:[%s9129_s0 + $0x8] sm:$0x1 pattern:$0x75316420] }
  0xb3   : > { %6347 = vmatmul.mubr.msk.bf16.gmra.mxu0 %vm1705_vm1, %v1551_v47  ;;  %v2617_v42 = vcombine.low %v2595_v3, %v2602_v33  ;;  %v6188_v59 = vcombine.high %v7165_v0, %v7178_v15  ;;  %v1915_v10 = vcombine.low %v7375_v55, %v7379_v57  ;;  %v1916_v1 = vcombine.low %v7387_v22, %v7382_v58 }
  0xb4   : > { %6365 = vmatmul.mubr.msk.bf16.vlgmr.msra.gmra.mxu1 %vm1705_vm1, %v1864_v40  ;;  %6394 = vmatprep.mubr.msk.bf16.mxu0 %vm6740_vm0, %v9255_v21  ;;  %v1913_v52 = vcombine.low %v1905_v4, %v1912_v41  ;;  %v2618_v56 = vcombine.low %v2609_v51, %v2616_v12  ;;  %v1917_v7 = vcombine.low %v7395_v30, %v7399_v48  ;;  %v6589_v12 = vld [vmem:[#allocation3 + $0x20] sm:$0xff]  }
  0xb5   : > { %6423 = vmatpush3.bf16.msra.mxu1 %v6588_v26  ;;  %6368 = vmatprep.mubr.msk.bf16.mxu1 %vm6740_vm0, %v9255_v21  ;;  %v2625_v0 = vrot.slane %v2617_v42, %v6940_v29  ;;  %v7732_v20 = vrot.slane %v6188_v59, %v6940_v29  ;;  %v7735_v11 = vrot.slane %v1915_v10, %v6940_v29 }
  0xb6   : > { %v2632_v28 = vrot.slane %v2618_v56, %v6940_v29  ;;  %v1938_v47 = vrot.slane %v1916_v1, %v6940_v29  ;;  %v1945_v26 = vrot.slane %v1917_v7, %v6940_v29  ;;  %v6199_v4 = vcombine.high %v6958_v36, %v6961_v37 }
  0xb7   : > { %v1946_v3 = vcombine.low %v7732_v20, %v7735_v11  ;;  %v2635_v33 = vcombine.low %v7162_v62, %v7170_v9  ;;  %v6200_v40 = vcombine.high %v7162_v62, %v7170_v9  ;;  %v2637_v41 = vcombine.low %v7178_v15, %v7182_v16 }
  0xb8   : > { %v2633_v51 = vcombine.low %v2625_v0, %v2632_v28  ;;  %v1947_v42 = vcombine.low %v1938_v47, %v1945_v26  ;;  %v2644_v59 = vrot.slane %v6199_v4, %v6940_v29  ;;  %v1963_v36 = vcombine.low %v7407_v13, %v7567_v6 }
  0xb9   : > { %v7757_v37 = vrot.slane %v6215_v25, %v6940_v29  ;;  %v2651_v10 = vrot.slane %v2635_v33, %v6940_v29  ;;  %v2658_v1 = vrot.slane %v6200_v40, %v6940_v29  ;;  %v2665_v62 = vrot.slane %v2637_v41, %v6940_v29 }
  0xba   : > { %v1954_v9 = vrot.slane %v1946_v3, %v6940_v29  ;;  %v1964_v15 = vcombine.low %v7574_v8, %v7579_v5  ;;  %v1965_v16 = vcombine.low %v7582_v17, %v7591_v31  ;;  %v6189_v13 = vcombine.high %v7582_v17, %v7591_v31 }
  0xbb   : > { %6395 = vmatmul.mubr.msk.bf16.vlgmr.msra.gmra.mxu0 %vm1705_vm1, %v2633_v51  ;;  %v2666_v56 = vcombine.low %v2644_v59, %v2651_v10  ;;  %v2667_v7 = vcombine.low %v2658_v1, %v2665_v62  ;;  %v7771_v0 = vrot.slane %v1963_v36, %v6940_v29  ;;  %v2683_v25 = vcombine.low %v7358_v49, %v7375_v55 }
  0xbc   : > { %v3530_v28 = vshrl.u32 %v6983_v43, 16  ;;  %6369 = vmatmul.mubr.msk.bf16.gmra.mxu1 %vm1705_vm1, %v1913_v52  ;;  %6453 = vmatpush3.bf16.msra.mxu0 %v6589_v12  ;;  %v1961_v5 = vrot.slane %v1947_v42, %v6940_v29  ;;  %v7779_v47 = vrot.slane %v1964_v15, %v6940_v29  ;;  %v1987_v17 = vrot.slane %v1965_v16, %v6940_v29 }
  0xbd   : > { %v3535_v26 = vshll.u32 %v7757_v37, 16  ;;  %6372 = vmatprep.mubr.msk.bf16.mxu1 %vm6740_vm0, %v9255_v21  ;;  %6398 = vmatprep.mubr.msk.bf16.mxu0 %vm6740_vm0, %v9255_v21  ;;  %v2674_v43 = vrot.slane %v2666_v56, %v6940_v29  ;;  %v2681_v49 = vrot.slane %v2667_v7, %v6940_v29  ;;  %v7790_v52 = vrot.slane %v6189_v13, %v6940_v29 }
  0xbe   : > { %v1995_v4 = vcombine.low %v7771_v0, %v7779_v47  ;;  %v2684_v3 = vcombine.low %v7379_v57, %v7387_v22  ;;  %v2685_v33 = vcombine.low %v7392_v61, %v7395_v30  ;;  %v6201_v40 = vcombine.high %v7382_v58, %v7395_v30 }
  0xbf   : > { %v2682_v41 = vcombine.low %v2674_v43, %v2681_v49  ;;  %v1996_v51 = vcombine.low %v1987_v17, %v7790_v52  ;;  %v2693_v12 = vrot.slane %v2683_v25, %v6940_v29  ;;  %v2012_v42 = vcombine.low %v6964_v38, %v6967_v39 }
  0xc0   : > { %v1962_v59 = vcombine.low %v1954_v9, %v1961_v5  ;;  %v2700_v36 = vrot.slane %v2684_v3, %v6940_v29  ;;  %v2707_v10 = vrot.slane %v2685_v33, %v6940_v29  ;;  %v2714_v22 = vrot.slane %v6201_v40, %v6940_v29 }
  0xc1   : > { %v2003_v1 = vrot.slane %v1995_v4, %v6940_v29  ;;  %v2013_v58 = vcombine.low %v7057_v19, %v7065_v23  ;;  %v2014_v30 = vcombine.low %v7074_v45, %v7078_v46  ;;  %v2015_v62 = vcombine.low %v7093_v53, %v7069_v27 }
  0xc2   : > { %v2715_v15 = vcombine.low %v2693_v12, %v2700_v36  ;;  %v2716_v16 = vcombine.low %v2707_v10, %v2714_v22  ;;  %v7815_v9 = vrot.slane %v2012_v42, %v6940_v29  ;;  %v2732_v13 = vcombine.low %v7567_v6, %v7574_v8  ;;  %v9313_v22 = vld [vmem:[#allocation42_spill] sm:$0xff] }
  0xc3   : > { %6399 = vmatmul.mubr.msk.bf16.gmra.mxu0 %vm1705_vm1, %v2682_v41  ;;  %v2010_v56 = vrot.slane %v1996_v51, %v6940_v29  ;;  %v2029_v7 = vrot.slane %v2013_v58, %v6940_v29  ;;  %v2036_v25 = vrot.slane %v2014_v30, %v6940_v29  ;;  %v7824_v5 = vrot.slane %v2015_v62, %v6940_v29  ;;  %v9310_v51 = vld [vmem:[#allocation17_spill] sm:$0xff] }
  0xc4   : > { %6373 = vmatmul.mubr.msk.bf16.gmra.mxu1 %vm1705_vm1, %v1962_v59  ;;  %6402 = vmatprep.mubr.msk.bf16.mxu0 %vm6740_vm0, %v9255_v21  ;;  %v2723_v53 = vrot.slane %v2715_v15, %v6940_v29  ;;  %v2730_v17 = vrot.slane %v2716_v16, %v6940_v29  ;;  %v6202_v43 = vcombine.high %v7567_v6, %v7574_v8  ;;  %v9309_v8 = vld [vmem:[#allocation34_spill] sm:$0xff]  ;;  %v9314_v58 = vld [vmem:[#allocation37_spill] sm:$0xff] }
  0xc5   : > { %9308 = vst [vmem:[#allocation81_spill] sm:$0xff] %v7824_v5  ;;  %v3537_v49 = vsel %vm6986_vm15, %v3530_v28, %v3535_v26  ;;  %6376 = vmatprep.mubr.msk.bf16.mxu1 %vm6740_vm0, %v9255_v21  ;;  %v2044_v4 = vcombine.low %v7815_v9, %v2029_v7  ;;  %v2734_v3 = vcombine.low %v7591_v31, %v7595_v24  ;;  %v9311_v31 = vld [vmem:[#allocation40_spill] sm:$0xff]  ;;  %v9312_v24 = vld [vmem:[#allocation35_spill] sm:$0xff]  ;;  %v9315_v62 = vld [vmem:[#allocation25_spill] sm:$0xff] }
  0xc6   : > { %v2735_v33 = vcombine.low %v7604_v54, %v6964_v38  ;;  %v2045_v40 = vcombine.low %v2036_v25, %v7824_v5  ;;  %v2742_v41 = vrot.slane %v2732_v13, %v6940_v29  ;;  %v2749_v6 = vrot.slane %v6202_v43, %v6940_v29  ;;  %v9317_v43 = vld [vmem:[#allocation16_spill] sm:$0xff] }
  0xc7   : > { %v2061_v28 = vcombine.low %v9310_v51, %v9309_v8  ;;  %v2011_v26 = vcombine.low %v2003_v1, %v2010_v56  ;;  %v2731_v12 = vcombine.low %v2723_v53, %v2730_v17  ;;  %v2756_v42 = vrot.slane %v2734_v3, %v6940_v29 }
  0xc8   : > { %v2763_v59 = vrot.slane %v2735_v33, %v6940_v29  ;;  %v2764_v36 = vcombine.low %v2742_v41, %v2749_v6  ;;  %v2062_v10 = vcombine.low %v9312_v24, %v9311_v31  ;;  %v6190_v54 = vcombine.high %v9312_v24, %v9311_v31 }
  0xc9   : > { %v2064_v30 = vcombine.low %v9314_v58, %v9313_v22  ;;  %v3597_v15 = vcombine.low %v3537_v49, %v9315_v62  ;;  %v2052_v16 = vrot.slane %v2044_v4, %v6940_v29  ;;  %v2781_v13 = vcombine.low %v6967_v39, %v7057_v19  ;;  %v9323_v62 = vld [vmem:[#allocation64_spill] sm:$0xff] }
  0xca   : > { %v2765_v1 = vcombine.low %v2756_v42, %v2763_v59  ;;  %v2059_v56 = vrot.slane %v2045_v40, %v6940_v29  ;;  %v2772_v7 = vrot.slane %v2764_v36, %v6940_v29  ;;  %v7862_v25 = vrot.slane %v2061_v28, %v6940_v29  ;;  %v9320_v59 = vld [vmem:[#allocation63_spill] sm:$0xff]  ;;  %v9321_v36 = vld [vmem:[#allocation61_spill] sm:$0xff] }
  0xcb   : > { %v2078_v53 = vrot.slane %v2062_v10, %v6940_v29  ;;  %6403 = vmatmul.mubr.msk.bf16.gmra.mxu0 %vm1705_vm1, %v2731_v12  ;;  %v2782_v49 = vcombine.low %v9317_v43, %v7074_v45  ;;  %v6203_v4 = vcombine.high %v7065_v23, %v7074_v45  ;;  %v2784_v19 = vcombine.low %v7069_v27, %v9310_v51  ;;  %v9319_v12 = vld [vmem:[#allocation44_spill] sm:$0xff] }
  0xcc   : > { %9316 = vst [vmem:[#allocation34_spill] sm:$0xff] %v7862_v25  ;;  %v2779_v17 = vrot.slane %v2765_v1, %v6940_v29  ;;  %6377 = vmatmul.mubr.msk.bf16.gmra.mxu1 %vm1705_vm1, %v2011_v26  ;;  %6406 = vmatprep.mubr.msk.bf16.mxu0 %vm6740_vm0, %v9255_v21  ;;  %v7877_v3 = vrot.slane %v6190_v54, %v6940_v29  ;;  %v9318_v26 = vld [vmem:[#allocation60_spill] sm:$0xff]  ;;  %v9324_v1 = vld [vmem:[#allocation66_spill] sm:$0xff] }
  0xcd   : > { %v7880_v33 = vrot.slane %v2064_v30, %v6940_v29  ;;  %v2791_v40 = vrot.slane %v2781_v13, %v6940_v29  ;;  %v3625_v41 = vrot.slane %v3597_v15, %v6940_v29  ;;  %6380 = vmatprep.mubr.msk.bf16.mxu1 %vm6740_vm0, %v9255_v21  ;;  %v2798_v23 = vrot.slane %v2782_v49, %v6940_v29  ;;  %v9322_v30 = vld [vmem:[#allocation62_spill] sm:$0xff]  ;;  %v9325_v13 = vld [vmem:[#allocation65_spill] sm:$0xff] }
  0xce   : > { %v2805_v45 = vrot.slane %v6203_v4, %v6940_v29  ;;  %v2812_v6 = vrot.slane %v2784_v19, %v6940_v29  ;;  %v2780_v8 = vcombine.low %v2772_v7, %v2779_v17  ;;  %v2093_v28 = vcombine.low %v7862_v25, %v2078_v53 }
  0xcf   : > { %v2110_v42 = vcombine.low %v9319_v12, %v9318_v26  ;;  %v2111_v24 = vcombine.low %v9321_v36, %v9320_v59  ;;  %v2813_v10 = vcombine.low %v2791_v40, %v2798_v23  ;;  %v2112_v15 = vcombine.low %v9323_v62, %v9322_v30 }
  0xd0   : > { %v2814_v54 = vcombine.low %v2805_v45, %v2812_v6  ;;  %v2113_v49 = vcombine.low %v9325_v13, %v9324_v1  ;;  %v2060_v4 = vcombine.low %v2052_v16, %v2059_v56  ;;  %v2094_v7 = vcombine.low %v7877_v3, %v7880_v33  ;;  %v9326_v56 = vld [vmem:[#allocation41_spill] sm:$0xff] }
  0xd1   : > { %v2120_v53 = vrot.slane %v2110_v42, %v6940_v29  ;;  %v6204_v17 = vcombine.high %v7069_v27, %v9310_v51  ;;  %v2821_v19 = vrot.slane %v2813_v10, %v6940_v29  ;;  %v2127_v40 = vrot.slane %v2111_v24, %v6940_v29  ;;  %v9327_v42 = vld [vmem:[#allocation43_spill] sm:$0xff] }
  0xd2   : > { %v7906_v23 = vrot.slane %v2112_v15, %v6940_v29  ;;  %v7909_v45 = vrot.slane %v2113_v49, %v6940_v29  ;;  %v2828_v16 = vrot.slane %v2814_v54, %v6940_v29  ;;  %v2831_v6 = vcombine.low %v9311_v31, %v9326_v56  ;;  %v9328_v54 = vld [vmem:[#allocation57_spill] sm:$0xff] }
  0xd3   : > { %v2832_v62 = vcombine.low %v9327_v42, %v9314_v58  ;;  %v2833_v27 = vcombine.low %v9313_v22, %v9319_v12  ;;  %6407 = vmatmul.mubr.msk.bf16.gmra.mxu0 %vm1705_vm1, %v2780_v8  ;;  %v2101_v51 = vrot.slane %v2093_v28, %v6940_v29  ;;  %v2840_v10 = vrot.slane %v6204_v17, %v6940_v29  ;;  %v9330_v42 = vld [vmem:[#allocation33_spill] sm:$0xff] }
  0xd4   : > { %v2143_v24 = vcombine.low %v7906_v23, %v7909_v45  ;;  %v2879_v15 = vcombine.low %v9328_v54, %v9321_v36  ;;  %6381 = vmatmul.mubr.msk.bf16.gmra.mxu1 %vm1705_vm1, %v2060_v4  ;;  %6410 = vmatprep.mubr.msk.bf16.mxu0 %vm6740_vm0, %v9255_v21  ;;  %v2108_v31 = vrot.slane %v2094_v7, %v6940_v29 }
  0xd5   : > { %v2847_v12 = vrot.slane %v2831_v6, %v6940_v29  ;;  %v2854_v8 = vrot.slane %v2832_v62, %v6940_v29  ;;  %6384 = vmatprep.mubr.msk.bf16.mxu1 %vm6740_vm0, %v9255_v21  ;;  %v2142_v28 = vcombine.low %v2120_v53, %v2127_v40  ;;  %v2861_v1 = vrot.slane %v2833_v27, %v6940_v29  ;;  %v9329_v6 = vld [vmem:[#allocation38_spill] sm:$0xff]  ;;  %v6216_v53 = vld.sshfl [vmem:[%s9129_s0 + $0x14] sm:$0x1 pattern:$0x75316420] }
  0xd6   : > { %v6205_v49 = vcombine.high %v9318_v26, %v9321_v36  ;;  %v2881_v4 = vcombine.low %v9322_v30, %v9325_v13  ;;  %v2829_v17 = vcombine.low %v2821_v19, %v2828_v16  ;;  %v6206_v7 = vcombine.high %v9322_v30, %v9325_v13  ;;  %v9331_v16 = vld [vmem:[#allocation39_spill] sm:$0xff] }
  0xd7   : > { %v2889_v56 = vrot.slane %v2879_v15, %v6940_v29  ;;  %v3626_v62 = vcombine.low %v9330_v42, %v9329_v6  ;;  %v2862_v40 = vcombine.low %v2840_v10, %v2847_v12  ;;  %v2863_v27 = vcombine.low %v2854_v8, %v2861_v1  ;;  %v9332_v42 = vld [vmem:[#allocation26_spill] sm:$0xff] }
  0xd8   : > { %v2896_v26 = vrot.slane %v6205_v49, %v6940_v29  ;;  %v2903_v36 = vrot.slane %v2881_v4, %v6940_v29  ;;  %v2109_v5 = vcombine.low %v2101_v51, %v2108_v31  ;;  %v2910_v19 = vrot.slane %v6206_v7, %v6940_v29  ;;  %v9333_v7 = vld [vmem:[#allocation28_spill] sm:$0xff] }
  0xd9   : > { %v3627_v30 = vcombine.low %v9331_v16, %v3625_v41  ;;  %v7951_v13 = vrot.slane %v3626_v62, %v6940_v29  ;;  %v7954_v6 = vrot.slane %v6216_v53, %v6940_v29  ;;  %v3538_v25 = vshrl.u32 %v9332_v42, 16 }
  0xda   : > { %v2911_v15 = vcombine.low %v2889_v56, %v2896_v26  ;;  %v2150_v10 = vrot.slane %v2142_v28, %v6940_v29  ;;  %v2912_v12 = vcombine.low %v2903_v36, %v2910_v19  ;;  %v2870_v51 = vrot.slane %v2862_v40, %v6940_v29  ;;  %v9334_v56 = vld [vmem:[#allocation27_spill] sm:$0xff]  ;;  %v9335_v40 = vld [vmem:[#allocation30_spill] sm:$0xff]  ;;  %v9337_v36 = vld [vmem:[#allocation52_spill] sm:$0xff] }
  0xdb   : > { %v7959_v8 = vrot.slane %v3627_v30, %v6940_v29  ;;  %6411 = vmatmul.mubr.msk.bf16.gmra.mxu0 %vm1705_vm1, %v2829_v17  ;;  %v2877_v41 = vrot.slane %v2863_v27, %v6940_v29  ;;  %v3543_v1 = vshll.u32 %v7954_v6, 16  ;;  %v2157_v28 = vrot.slane %v2143_v24, %v6940_v29  ;;  %v6217_v17 = vld.sshfl [vmem:[%s9129_s0 + $0x20] sm:$0x1 pattern:$0x75316420]  ;;  %v9336_v27 = vld [vmem:[#allocation29_spill] sm:$0xff] }
  0xdc   : > { %v7965_v31 = vrot.slane %v2911_v15, %v6940_v29  ;;  %6385 = vmatmul.mubr.msk.bf16.gmra.mxu1 %vm1705_vm1, %v2109_v5  ;;  %6414 = vmatprep.mubr.msk.bf16.mxu0 %vm6740_vm0, %v9255_v21  ;;  %v2926_v49 = vrot.slane %v2912_v12, %v6940_v29  ;;  %v3643_v62 = vcombine.low %v9334_v56, %v9333_v7  ;;  %v3546_v24 = vshrl.u32 %v7392_v61, 16  ;;  %v9338_v19 = vld [vmem:[#allocation32_spill] sm:$0xff] }
  0xdd   : > { %v3642_v4 = vcombine.low %v7951_v13, %v7959_v8  ;;  %6388 = vmatprep.mubr.msk.bf16.mxu1 %vm6740_vm0, %v9255_v21  ;;  %v3545_v5 = vsel %vm6986_vm15, %v3538_v25, %v3543_v1  ;;  %v3644_v26 = vcombine.low %v9336_v27, %v9335_v40  ;;  %v3646_v16 = vcombine.low %v9338_v19, %v9337_v36  ;;  %v9339_v1 = vld [vmem:[#allocation31_spill] sm:$0xff]  ;;  %v6218_v7 = vld.sshfl [vmem:[%s9129_s0 + $0x2c] sm:$0x1 pattern:$0x75316420]  ;;  %v9343_v40 = vld [vmem:[#allocation54_spill] sm:$0xff] }
  0xde   : > { %v2927_v53 = vcombine.low %v7965_v31, %v2926_v49  ;;  %v4435_v30 = vcombine.low %v7671_v60, %v7674_v32  ;;  %v2878_v15 = vcombine.low %v2870_v51, %v2877_v41  ;;  %v6239_v25 = vcombine.high %v6952_v34, %v6955_v35  ;;  %v9340_v60 = vld [vmem:[#allocation59_spill] sm:$0xff]  ;;  %v9344_v27 = vld [vmem:[#allocation53_spill] sm:$0xff] }
  0xdf   : > { %v4420_v12 = vcombine.low %v7757_v37, %v7150_v50  ;;  %v7997_v61 = vrot.slane %v6217_v17, %v6940_v29  ;;  %v2158_v31 = vcombine.low %v2150_v10, %v2157_v28  ;;  %v3645_v49 = vcombine.low %v9339_v1, %v3545_v5  ;;  %v9341_v51 = vld [vmem:[#allocation75_spill] sm:$0xff] }
  0xe0   : > { %v3695_v32 = vcombine.low %v9340_v60, %v7608_v2  ;;  %v3554_v34 = vshrl.u32 %v9341_v51, 16  ;;  %v3653_v35 = vrot.slane %v3643_v62, %v6940_v29  ;;  %v3660_v50 = vrot.slane %v3644_v26, %v6940_v29  ;;  %v9342_v62 = vld [vmem:[#allocation58_spill] sm:$0xff]  ;;  %v9346_v36 = vld [vmem:[#allocation55_spill] sm:$0xff] }
  0xe1   : > { %v3551_v56 = vshll.u32 %v7997_v61, 16  ;;  %v3674_v37 = vrot.slane %v3646_v16, %v6940_v29  ;;  %v4460_v10 = vcombine.low %v7690_v18, %v7695_v63  ;;  %v4427_v41 = vrot.slane %v6239_v25, %v6940_v29  ;;  %v9349_v60 = vld [vmem:[#allocation78_spill] sm:$0xff] }
  0xe2   : > { %v4434_v28 = vrot.slane %v4420_v12, %v6940_v29  ;;  %v3473_v17 = vrot.slane %v6218_v7, %v6940_v29  ;;  %v3667_v5 = vrot.slane %v3645_v49, %v6940_v29  ;;  %v3723_v63 = vrot.slane %v3695_v32, %v6940_v29 }
  0xe3   : > { %6415 = vmatmul.mubr.msk.bf16.gmra.mxu0 %vm1705_vm1, %v2878_v15  ;;  %v3553_v2 = vsel %vm6986_vm15, %v3546_v24, %v3551_v56  ;;  %v3692_v26 = vcombine.low %v9344_v27, %v9343_v40  ;;  %v9345_v24 = vld [vmem:[#allocation56_spill] sm:$0xff]  ;;  %v3675_v15 = vcombine.low %v3653_v35, %v3660_v50  ;;  %v4452_v12 = vcombine.low %v9332_v42, %v7954_v6  ;;  %v9348_v56 = vld [vmem:[#allocation79_spill] sm:$0xff]  ;;  %v6219_v35 = vld.sshfl [vmem:[%s9129_s0 + $0x38] sm:$0x1 pattern:$0x75316420] }
  0xe4   : > { %6389 = vmatmul.mubr.msk.bf16.gmra.mxu1 %vm1705_vm1, %v2158_v31  ;;  %6418 = vmatprep.mubr.msk.bf16.mxu0 %vm6740_vm0, %v9255_v21  ;;  %v3694_v18 = vcombine.low %v3553_v2, %v9342_v62  ;;  %v3693_v19 = vcombine.low %v9346_v36, %v9345_v24  ;;  %v3559_v16 = vshll.u32 %v3473_v17, 16  ;;  %v9347_v31 = vld [vmem:[#allocation76_spill] sm:$0xff]  ;;  %v4436_v49 = vcombine.low %v4427_v41, %v4434_v28  ;;  %v9350_v2 = vld [vmem:[#allocation18_spill] sm:$0xff]  ;;  %v9352_v6 = vld [vmem:[#allocation77_spill] sm:$0xff] }
  0xe5   : > { %6424 = vmatprep.mubr.msk.bf16.mxu1 %vm6740_vm0, %v9255_v21  ;;  %v3741_v1 = vcombine.low %v9347_v31, %v7621_v14  ;;  %v3743_v32 = vcombine.low %v9349_v60, %v9348_v56  ;;  %v9351_v62 = vld [vmem:[#allocation80_spill] sm:$0xff]  ;;  %v3676_v50 = vcombine.low %v3667_v5, %v3674_v37  ;;  %v3702_v41 = vrot.slane %v3692_v26, %v6940_v29 }
  0xe6   : > { %v3716_v25 = vrot.slane %v3694_v18, %v6940_v29  ;;  %v3561_v7 = vsel %vm6986_vm15, %v3554_v34, %v3559_v16  ;;  %v3744_v40 = vcombine.low %v9351_v62, %v9350_v2  ;;  %v3709_v34 = vrot.slane %v3693_v19, %v6940_v29  ;;  %v9354_v62 = vld [vmem:[#allocation22_spill] sm:$0xff] }
  0xe7   : > { %v3742_v42 = vcombine.low %v9352_v6, %v3561_v7  ;;  %v3751_v14 = vrot.slane %v3741_v1, %v6940_v29  ;;  %v3765_v28 = vrot.slane %v3743_v32, %v6940_v29  ;;  %v4443_v24 = vrot.slane %v4435_v30, %v6940_v29 }
  0xe8   : > { %v3725_v18 = vcombine.low %v3716_v25, %v3723_v63  ;;  %v3772_v27 = vrot.slane %v3744_v40, %v6940_v29  ;;  %v4459_v36 = vrot.slane %v4452_v12, %v6940_v29  ;;  %v8054_v37 = vrot.slane %v6219_v35, %v6940_v29  ;;  %v9355_v35 = vld [vmem:[#allocation45_spill] sm:$0xff] }
  0xe9   : > { %v3758_v16 = vrot.slane %v3742_v42, %v6940_v29  ;;  %v4450_v5 = vrot.slane %v4436_v49, %v6940_v29  ;;  %v6240_v26 = vcombine.high %v7375_v55, %v7379_v57  ;;  %v4478_v19 = vcombine.low %v7997_v61, %v7399_v48 }
  0xea   : > { %v3774_v63 = vcombine.low %v3765_v28, %v3772_v27  ;;  %v3683_v30 = vrot.slane %v3675_v15, %v6940_v29  ;;  %v3724_v55 = vcombine.low %v3702_v41, %v3709_v34  ;;  %v4461_v48 = vcombine.low %v4459_v36, %v7732_v20  ;;  %v9359_v41 = vld [vmem:[#allocation21_spill] sm:$0xff]  ;;  %v9360_v27 = vld [vmem:[#allocation36_spill] sm:$0xff] }
  0xeb   : > { %6419 = vmatmul.mubr.msk.bf16.gmra.mxu0 %vm1705_vm1, %v2927_v53  ;;  %v3690_v53 = vrot.slane %v3676_v50, %v6940_v29  ;;  %v3773_v25 = vcombine.low %v3751_v14, %v3758_v16  ;;  %v3562_v8 = vshrl.u32 %v9317_v43, 16  ;;  %v4451_v61 = vcombine.low %v4443_v24, %v4450_v5  ;;  %v6220_v43 = vld.sshfl [vmem:[%s9129_s0 + $0x44] sm:$0x1 pattern:$0x75316420]  ;;  %v9356_v50 = vld [vmem:[#allocation24_spill] sm:$0xff] }
  0xec   : > { %6425 = vmatmul.mubr.msk.bf16.vlgmr.msra.gmra.mxu1 %vm1705_vm1, %v3642_v4  ;;  %6454 = vmatprep.mubr.msk.bf16.mxu0 %vm6740_vm0, %v9255_v21  ;;  %v8073_v57 = vrot.slane %v3774_v63, %v6940_v29  ;;  %v3567_v4 = vshll.u32 %v8054_v37, 16  ;;  %v4485_v15 = vrot.slane %v6240_v26, %v6940_v29  ;;  %v4492_v12 = vrot.slane %v4478_v19, %v6940_v29 }
  0xed   : > { %6428 = vmatprep.mubr.msk.bf16.mxu1 %vm6740_vm0, %v9255_v21  ;;  %v8077_v13 = vrot.slane %v3773_v25, %v6940_v29  ;;  %v3691_v31 = vcombine.low %v3683_v30, %v3690_v53  ;;  %v4510_v49 = vcombine.low %v9341_v51, %v3473_v17  ;;  %v4519_v20 = vcombine.low %v7790_v52, %v7815_v9  ;;  %v9353_v17 = vld [vmem:[#allocation23_spill] sm:$0xff] }
  0xee   : > { %v3732_v7 = vrot.slane %v3724_v55, %v6940_v29  ;;  %v4468_v56 = vrot.slane %v4460_v10, %v6940_v29  ;;  %v3739_v60 = vrot.slane %v3725_v18, %v6940_v29  ;;  %v4475_v32 = vrot.slane %v4461_v48, %v6940_v29  ;;  %v6221_v55 = vld.sshfl [vmem:[%s9129_s0 + $0x50] sm:$0x1 pattern:$0x75316420] }
  0xef   : > { %v3789_v1 = vcombine.low %v8077_v13, %v8073_v57  ;;  %v3569_v2 = vsel %vm6986_vm15, %v3562_v8, %v3567_v4  ;;  %v4517_v51 = vrot.slane %v4510_v49, %v6940_v29  ;;  %v4493_v52 = vcombine.low %v7735_v11, %v4485_v15  ;;  %v9357_v11 = vld [vmem:[#allocation20_spill] sm:$0xff]  ;;  %v6222_v48 = vld.sshfl [vmem:[%s9129_s0 + $0x5c] sm:$0x1 pattern:$0x75316420] }
  0xf0   : > { %v4494_v9 = vcombine.low %v4492_v12, %v7771_v0  ;;  %v3792_v40 = vcombine.low %v9354_v62, %v9353_v17  ;;  %v3501_v10 = vrot.slane %v6220_v43, %v6940_v29  ;;  %v3793_v18 = vcombine.low %v9356_v50, %v9355_v35  ;;  %v9358_v0 = vld [vmem:[#allocation19_spill] sm:$0xff]  ;;  %v9361_v49 = vld [vmem:[#allocation48_spill] sm:$0xff] }
  0xf1   : > { %v4518_v6 = vcombine.low %v7779_v47, %v4517_v51  ;;  %v8111_v42 = vrot.slane %v4519_v20, %v6940_v29  ;;  %v3790_v14 = vcombine.low %v9358_v0, %v9357_v11  ;;  %v3791_v34 = vcombine.low %v3569_v2, %v9359_v41  ;;  %v9362_v20 = vld [vmem:[#allocation47_spill] sm:$0xff]  ;;  %v9365_v2 = vld [vmem:[#allocation49_spill] sm:$0xff]  ;;  %v9367_v17 = vld [vmem:[#allocation68_spill] sm:$0xff] }
  0xf2   : > { %v3570_v24 = vshrl.u32 %v9360_v27, 16  ;;  %v4476_v36 = vcombine.low %v4468_v56, %v4475_v32  ;;  %v4501_v16 = vrot.slane %v4493_v52, %v6940_v29  ;;  %v4508_v47 = vrot.slane %v4494_v9, %v6940_v29  ;;  %v9363_v56 = vld [vmem:[#allocation67_spill] sm:$0xff]  ;;  %v9364_v32 = vld [vmem:[#allocation50_spill] sm:$0xff] }
  0xf3   : > { %6455 = vmatmul.mubr.msk.bf16.vlgmr.msra.gmra.mxu0 %vm1705_vm1, %v4451_v61  ;;  %v8119_v28 = vrot.slane %v4518_v6, %v6940_v29  ;;  %v3575_v5 = vshll.u32 %v3501_v10, 16  ;;  %v3740_v63 = vcombine.low %v3732_v7, %v3739_v60  ;;  %v3814_v26 = vrot.slane %v3792_v40, %v6940_v29  ;;  %v9366_v52 = vld [vmem:[#allocation46_spill] sm:$0xff]  ;;  %v9368_v62 = vld [vmem:[#allocation51_spill] sm:$0xff] }
  0xf4   : > { %6429 = vmatmul.mubr.msk.bf16.gmra.mxu1 %vm1705_vm1, %v3691_v31  ;;  %6458 = vmatprep.mubr.msk.bf16.mxu0 %vm6740_vm0, %v9255_v21  ;;  %v3821_v19 = vrot.slane %v3793_v18, %v6940_v29  ;;  %v3800_v53 = vrot.slane %v3790_v14, %v6940_v29  ;;  %v3807_v25 = vrot.slane %v3791_v34, %v6940_v29  ;;  %v3578_v15 = vshrl.u32 %v9328_v54, 16 }
  0xf5   : > { %6432 = vmatprep.mubr.msk.bf16.mxu1 %vm6740_vm0, %v9255_v21  ;;  %v4534_v30 = vcombine.low %v8119_v28, %v8111_v42  ;;  %v4568_v8 = vcombine.low %v9360_v27, %v3501_v10  ;;  %v4509_v4 = vcombine.low %v4501_v16, %v4508_v47  ;;  %v3577_v61 = vsel %vm6986_vm15, %v3570_v24, %v3575_v5 }
  0xf6   : > { %v6242_v12 = vcombine.high %v9314_v58, %v9313_v22  ;;  %v3823_v31 = vcombine.low %v3814_v26, %v3821_v19  ;;  %v3840_v43 = vcombine.low %v9362_v20, %v9361_v49  ;;  %v3515_v7 = vrot.slane %v6221_v55, %v6940_v29  ;;  %v9370_v19 = vld [vmem:[#allocation81_spill] sm:$0xff] }
  0xf7   : > { %v3586_v60 = vshrl.u32 %v9363_v56, 16  ;;  %v3822_v54 = vcombine.low %v3800_v53, %v3807_v25  ;;  %v3841_v22 = vcombine.low %v9365_v2, %v9364_v32  ;;  %v3529_v58 = vrot.slane %v6222_v48, %v6940_v29  ;;  %v9371_v48 = vld [vmem:[#allocation71_spill] sm:$0xff]  ;;  %v9374_v20 = vld [vmem:[#allocation73_spill] sm:$0xff] }
  0xf8   : > { %v4576_v51 = vrot.slane %v4568_v8, %v6940_v29  ;;  %v3839_v9 = vcombine.low %v9366_v52, %v3577_v61  ;;  %v3842_v40 = vcombine.low %v9368_v62, %v9367_v17  ;;  %v4583_v10 = vrot.slane %v6242_v12, %v6940_v29  ;;  %v9372_v8 = vld [vmem:[#allocation70_spill] sm:$0xff] }
  0xf9   : > { %v4601_v35 = vcombine.low %v3515_v7, %v9320_v59  ;;  %v6241_v50 = vcombine.high %v6964_v38, %v6967_v39  ;;  %v4536_v18 = vcombine.low %v8054_v37, %v7078_v46  ;;  %v4602_v11 = vcombine.low %v9363_v56, %v3529_v58 }
  0xfa   : > { %v4584_v6 = vcombine.low %v4576_v51, %v7877_v3  ;;  %v3837_v0 = vrot.slane %v3823_v31, %v6940_v29  ;;  %v3856_v14 = vrot.slane %v3840_v43, %v6940_v29  ;;  %v4585_v41 = vcombine.low %v7880_v33, %v4583_v10  ;;  %v9373_v31 = vld [vmem:[#allocation69_spill] sm:$0xff] }
  0xfb   : > { %6459 = vmatmul.mubr.msk.bf16.gmra.mxu0 %vm1705_vm1, %v4476_v36  ;;  %v4609_v34 = vrot.slane %v4601_v35, %v6940_v29  ;;  %v3583_v27 = vshll.u32 %v3515_v7, 16  ;;  %v3591_v59 = vshll.u32 %v3529_v58, 16  ;;  %v4616_v38 = vrot.slane %v4602_v11, %v6940_v29 }
  0xfc   : > { %6433 = vmatmul.mubr.msk.bf16.gmra.mxu1 %vm1705_vm1, %v3740_v63  ;;  %6462 = vmatprep.mubr.msk.bf16.mxu0 %vm6740_vm0, %v9255_v21  ;;  %v4592_v24 = vrot.slane %v4584_v6, %v6940_v29  ;;  %v3863_v39 = vrot.slane %v3841_v22, %v6940_v29  ;;  %v3870_v46 = vrot.slane %v3842_v40, %v6940_v29 }
  0xfd   : > { %6436 = vmatprep.mubr.msk.bf16.mxu1 %vm6740_vm0, %v9255_v21  ;;  %v4599_v3 = vrot.slane %v4585_v41, %v6940_v29  ;;  %v4617_v37 = vcombine.low %v4609_v34, %v7906_v23  ;;  %v3849_v33 = vrot.slane %v3839_v9, %v6940_v29  ;;  %v4543_v36 = vrot.slane %v6241_v50, %v6940_v29 }
  0xfe   : > { %v4550_v16 = vrot.slane %v4536_v18, %v6940_v29  ;;  %v4618_v47 = vcombine.low %v7909_v45, %v4616_v38  ;;  %v3830_v23 = vrot.slane %v3822_v54, %v6940_v29  ;;  %v3585_v26 = vsel %vm6986_vm15, %v3578_v15, %v3583_v27  ;;  %v9375_v15 = vld [vmem:[#allocation72_spill] sm:$0xff] }
  0xff   : > { %v4600_v5 = vcombine.low %v4592_v24, %v4599_v3  ;;  %v4625_v63 = vrot.slane %v4617_v37, %v6940_v29  ;;  %v3593_v45 = vsel %vm6986_vm15, %v3586_v60, %v3591_v59  ;;  %v3872_v13 = vcombine.low %v3863_v39, %v3870_v46 }
 0x100   : > { %v4632_v57 = vrot.slane %v4618_v47, %v6940_v29  ;;  %v3871_v25 = vcombine.low %v3849_v33, %v3856_v14  ;;  %v4551_v55 = vcombine.low %v4543_v36, %v4550_v16  ;;  %v3838_v12 = vcombine.low %v3830_v23, %v3837_v0 }
 0x101   : > { %v3888_v49 = vcombine.low %v3585_v26, %v9373_v31  ;;  %v3890_v43 = vcombine.low %v9375_v15, %v9374_v20  ;;  %v3891_v7 = vcombine.low %v9376_v44, %v3593_v45  ;;  %v3886_v54 = vrot.slane %v3872_v13, %v6940_v29 }
 0x102   : > { %v4633_v61 = vcombine.low %v4625_v63, %v4632_v57  ;;  %v3879_v60 = vrot.slane %v3871_v25, %v6940_v29  ;;  %v4559_v32 = vrot.slane %v4551_v55, %v6940_v29  ;;  %v6742_v47 = vmov 1983009808   ;;  %v9377_v57 = vld [vmem:[#allocation15_spill] sm:$0xff] }
 0x103   : > { %6463 = vmatmul.mubr.msk.bf16.gmra.mxu0 %vm1705_vm1, %v4509_v4  ;;  %v3889_v4 = vcombine.low %v9372_v8, %v9371_v48  ;;  %v3898_v22 = vrot.slane %v3888_v49, %v6940_v29  ;;  %v3912_v58 = vrot.slane %v3890_v43, %v6940_v29  ;;  %v3919_v42 = vrot.slane %v3891_v7, %v6940_v29 }
 0x104   : > { %6437 = vmatmul.mubr.msk.bf16.gmra.mxu1 %vm1705_vm1, %v3789_v1  ;;  %6466 = vmatprep.mubr.msk.bf16.mxu0 %vm6740_vm0, %v9255_v21  ;;  %v9369_v1 = vld [vmem:[#allocation34_spill] sm:$0xff]  ;;  %v2291_v23 = vunpack.c.l.s4 %v6742_v47 }
 0x105   : > { %6440 = vmatprep.mubr.msk.bf16.mxu1 %vm6740_vm0, %v9255_v21  ;;  %v4552_v53 = vcombine.low %v9370_v19, %v9369_v1  ;;  %v3905_v2 = vrot.slane %v3889_v4, %v6940_v29  ;;  %v3921_v52 = vcombine.low %v3912_v58, %v3919_v42 }
 0x107   : > { %v4566_v56 = vrot.slane %v4552_v53, %v6940_v29  ;;  %v3920_v51 = vcombine.low %v3898_v22, %v3905_v2  ;;  %v3935_v17 = vrot.slane %v3921_v52, %v6940_v29  ;;  %v6251_v53 = vld [vmem:[%s9131_s2] ss:$0 sm:$0xff] }
 0x108   : > { %v5253_v52 = vld [vmem:[%s9132_s3] sm:$0xff] }
 0x109   : > { %v4567_v28 = vcombine.low %v4559_v32, %v4566_v56  ;;  %v3928_v9 = vrot.slane %v3920_v51, %v6940_v29 }
 0x10b   : > { %6467 = vmatmul.mubr.msk.bf16.gmra.mxu0 %vm1705_vm1, %v4534_v30  ;;  %v3887_v30 = vcombine.low %v3879_v60, %v3886_v54  ;;  %v3936_v62 = vcombine.low %v3928_v9, %v3935_v17 }
 0x10c   : > { %6441 = vmatmul.mubr.msk.bf16.gmra.mxu1 %vm1705_vm1, %v3838_v12  ;;  %6470 = vmatprep.mubr.msk.bf16.mxu0 %vm6740_vm0, %v9255_v21  ;;  %v5120_v12 = vcombine.high %v6251_v53, %v6251_v53 }
 0x10d   : > { %6444 = vmatprep.mubr.msk.bf16.mxu1 %vm6740_vm0, %v9255_v21 }
 0x113   : > { %6471 = vmatmul.mubr.msk.bf16.gmra.mxu0 %vm1705_vm1, %v4567_v28 }
 0x114   : > { %6445 = vmatmul.mubr.msk.bf16.gmra.mxu1 %vm1705_vm1, %v3887_v30  ;;  %6474 = vmatprep.mubr.msk.bf16.mxu0 %vm6740_vm0, %v9255_v21 }
 0x115   : > { %6448 = vmatprep.mubr.msk.bf16.mxu1 %vm6740_vm0, %v9255_v21 }
 0x11b   : > { %6475 = vmatmul.mubr.msk.bf16.gmra.mxu0 %vm1705_vm1, %v4600_v5  ;;  %v2292_v5 = vunpack.c.0.s8 %v2291_v23 }
 0x11c   : > { %6449 = vmatmul.mubr.msk.bf16.gmra.mxu1 %vm1705_vm1, %v3936_v62  ;;  %6478 = vmatprep.mubr.msk.bf16.mxu0 %vm6740_vm0, %v9255_v21  ;;  %vm5689_vm0 = vcmask 1045504  }
 0x11d   : > { %v8254_v13 = vsub.s32 %v2292_v5, %v9377_v57 }
 0x11f   : > { %v8264_v43 = vrot.slane %v6251_v53, %v8254_v13  ;;  %v8269_v22 = vrot.slane %v5120_v12, %v8254_v13 }
 0x123   : > { %6479 = vmatmul.mubr.msk.bf16.gmra.mxu0 %vm1705_vm1, %v4633_v61 }
 0x128   : > { %v1761_v40 = vpop.f32.mrf.mxu0 }
 0x12a   : > { %v6336_v10 = vpop.f32.mrf.mxu0 }
 0x12c   : > { %v1764_v35 = vpop.f32.mrf.mxu0 }
 0x12e   : > { %v6337_v50 = vpop.f32.mrf.mxu0 }
 0x133   : > { %v8235_v18 = vpop.f32.mrf.mxu1 }
 0x135   : > { %v6352_v29 = vpop.f32.mrf.mxu1 }
 0x137   : > { %v8237_v6 = vpop.f32.mrf.mxu1 }
 0x139   : > { %v6353_v11 = vpop.f32.mrf.mxu1 }
 0x140   : > { %v1769_v0 = vpop.f32.mrf.mxu0 }
 0x142   : > { %v6340_v14 = vpop.f32.mrf.mxu0 }
 0x144   : > { %v1772_v41 = vpop.f32.mrf.mxu0 }
 0x146   : > { %v6341_v34 = vpop.f32.mrf.mxu0 }
 0x14e   : > { %v8239_v27 = vpop.f32.mrf.mxu1 }
 0x150   : > { %v6356_v59 = vpop.f32.mrf.mxu1 }
 0x151   : > { %v8289_v59 = vcombine.high %v8269_v22, %v8269_v22 }
 0x152   : > { %v8241_v21 = vpop.f32.mrf.mxu1 }
 0x154   : > { %v6357_v24 = vpop.f32.mrf.mxu1 }
 0x155   : > { %v5257_v24 = vcombine.high %v5253_v52, %v5253_v52 }
 0x157   : > { %v8307_v12 = vrot.slane %v5257_v24, %v8254_v13 }
 0x15a   : > { %v8243_v38 = vpop.f32.mrf.mxu0 }
 0x15c   : > { %v6344_v39 = vpop.f32.mrf.mxu0 }
 0x15e   : > { %v8245_v46 = vpop.f32.mrf.mxu0 }
 0x160   : > { %v6345_v3 = vpop.f32.mrf.mxu0 }
 0x166   : > { %v8247_v37 = vpop.f32.mrf.mxu1 }
 0x168   : > { %v6360_v33 = vpop.f32.mrf.mxu1 }
 0x16a   : > { %v8249_v36 = vpop.f32.mrf.mxu1 }
 0x16c   : > { %v6361_v16 = vpop.f32.mrf.mxu1 }
 0x173   : > { %v8251_v63 = vpop.f32.mrf.mxu0 }
 0x174   : > { %v2220_v26 = vpop.f32.mrf.mxu1 }
 0x175   : > { %v2221_v45 = vadd.f32 %v2220_v26, %v1761_v40  ;;  %v6348_v1 = vpop.f32.mrf.mxu0  ;;  %v8280_v40 = vcombine.high %v8264_v43, %v8264_v43 }
 0x176   : > { %v6366_v19 = vpop.f32.mrf.mxu1 }
 0x177   : > { %v2289_v25 = vcombine.high %v2221_v45, %v2221_v45  ;;  %v8259_v55 = vpop.f32.mrf.mxu0  ;;  %v2296_v8 = vrot.slane %v2221_v45, %v8254_v13 }
 0x178   : > { %v2223_v48 = vpop.f32.mrf.mxu1 }
 0x179   : > { %v2224_v4 = vadd.f32 %v2223_v48, %v1764_v35  ;;  %v6349_v61 = vpop.f32.mrf.mxu0  ;;  %v2303_v49 = vrot.slane %v2289_v25, %v8254_v13  ;;  %v2304_v60 = vcombine.high %v2296_v8, %v2296_v8 }
 0x17a   : > { %v6367_v31 = vpop.f32.mrf.mxu1  ;;  %v8304_v61 = vrot.slane %v5253_v52, %v8254_v13 }
 0x17b   : > { %v2306_v20 = vcombine.high %v2224_v4, %v2224_v4  ;;  %v2989_v15 = vpop.f32.mrf.mxu0  ;;  %v2313_v54 = vrot.slane %v2224_v4, %v8254_v13  ;;  %v2305_v9 = vcombine.high %v2303_v49, %v2303_v49 }
 0x17c   : > { %v2228_v44 = vpop.f32.mrf.mxu1  ;;  %v3058_v7 = vcombine.high %v2989_v15, %v2989_v15  ;;  %v3065_v56 = vrot.slane %v2989_v15, %v8254_v13 }
 0x17d   : > { %v2229_v32 = vadd.f32 %v2228_v44, %v1769_v0  ;;  %v6396_v2 = vpop.f32.mrf.mxu0  ;;  %v2320_v58 = vrot.slane %v2306_v20, %v8254_v13  ;;  %v2321_v39 = vcombine.high %v2313_v54, %v2313_v54 }
 0x17e   : > { %v3072_v42 = vrot.slane %v3058_v7, %v8254_v13  ;;  %v3073_v28 = vcombine.high %v3065_v56, %v3065_v56  ;;  %v8273_v30 = vadd.f32 %v3065_v56, %v2296_v8  ;;  %v6370_v51 = vpop.f32.mrf.mxu1 }
 0x17f   : > { %v2323_v17 = vcombine.high %v2229_v32, %v2229_v32  ;;  %v2992_v62 = vpop.f32.mrf.mxu0  ;;  %v2322_v3 = vcombine.high %v2320_v58, %v2320_v58  ;;  %v2330_v23 = vrot.slane %v2229_v32, %v8254_v13 }
 0x180   : > { %v3074_v10 = vcombine.high %v3072_v42, %v3072_v42  ;;  %v8282_v35 = vadd.f32 %v3073_v28, %v2304_v60  ;;  %v8284_v50 = vadd.f32 %v3072_v42, %v2303_v49  ;;  %v2231_v29 = vpop.f32.mrf.mxu1  ;;  %v3075_v11 = vcombine.high %v2992_v62, %v2992_v62 }
 0x181   : > { %v2232_v0 = vadd.f32 %v2231_v29, %v1772_v41  ;;  %v3082_v14 = vrot.slane %v2992_v62, %v8254_v13  ;;  %v6397_v34 = vpop.f32.mrf.mxu0  ;;  %v2337_v5 = vrot.slane %v2323_v17, %v8254_v13  ;;  %v2338_v7 = vcombine.high %v2330_v23, %v2330_v23 }
 0x182   : > { %v8291_v33 = vadd.f32 %v3074_v10, %v2305_v9  ;;  %v3089_v16 = vrot.slane %v3075_v11, %v8254_v13  ;;  %v6371_v47 = vpop.f32.mrf.mxu1  ;;  %v8323_v62 = vcombine.high %v8304_v61, %v8304_v61 }
 0x183   : > { %v2340_v41 = vcombine.high %v2232_v0, %v2232_v0  ;;  %v3090_v26 = vcombine.high %v3082_v14, %v3082_v14  ;;  %v2997_v45 = vpop.f32.mrf.mxu0  ;;  %v8296_v1 = vadd.f32 %v3082_v14, %v2313_v54  ;;  %v2347_v31 = vrot.slane %v2232_v0, %v8254_v13 }
 0x184   : > { %v3091_v57 = vcombine.high %v3089_v16, %v3089_v16  ;;  %v8298_v19 = vadd.f32 %v3089_v16, %v2320_v58  ;;  %v2236_v53 = vpop.f32.mrf.mxu1  ;;  %v3092_v25 = vcombine.high %v2997_v45, %v2997_v45  ;;  %v3099_v20 = vrot.slane %v2997_v45, %v8254_v13 }
 0x185   : > { %v8300_v48 = vadd.f32 %v3090_v26, %v2321_v39  ;;  %v2237_v8 = vadd.f32 %v2236_v53, %v8243_v38  ;;  %v6400_v4 = vpop.f32.mrf.mxu0  ;;  %v2339_v56 = vcombine.high %v2337_v5, %v2337_v5  ;;  %v2354_v38 = vrot.slane %v2340_v41, %v8254_v13 }
 0x186   : > { %v8310_v49 = vadd.f32 %v3091_v57, %v2322_v3  ;;  %v3106_v15 = vrot.slane %v3092_v25, %v8254_v13  ;;  %v6374_v44 = vpop.f32.mrf.mxu1  ;;  %v3107_v32 = vcombine.high %v3099_v20, %v3099_v20  ;;  %v8315_v58 = vadd.f32 %v3099_v20, %v2330_v23 }
 0x187   : > { %v2357_v60 = vcombine.high %v2237_v8, %v2237_v8  ;;  %v3000_v54 = vpop.f32.mrf.mxu0  ;;  %v2364_v51 = vrot.slane %v2237_v8, %v8254_v13  ;;  %v2355_v10 = vcombine.high %v2347_v31, %v2347_v31  ;;  %v2356_v34 = vcombine.high %v2354_v38, %v2354_v38 }
 0x188   : > { %v3108_v2 = vcombine.high %v3106_v15, %v3106_v15  ;;  %v8317_v42 = vadd.f32 %v3106_v15, %v2337_v5  ;;  %v2239_v28 = vpop.f32.mrf.mxu1  ;;  %v3109_v9 = vcombine.high %v3000_v54, %v3000_v54  ;;  %v8325_v29 = vadd.f32 %v3107_v32, %v2338_v7 }
 0x189   : > { %v2240_v52 = vadd.f32 %v2239_v28, %v8245_v46  ;;  %v6401_v17 = vpop.f32.mrf.mxu0  ;;  %v3116_v0 = vrot.slane %v3000_v54, %v8254_v13  ;;  %v2371_v24 = vrot.slane %v2357_v60, %v8254_v13  ;;  %v2372_v26 = vcombine.high %v2364_v51, %v2364_v51 }
 0x18a   : > { %v8327_v11 = vadd.f32 %v3108_v2, %v2339_v56  ;;  %v6375_v14 = vpop.f32.mrf.mxu1  ;;  %v3123_v46 = vrot.slane %v3109_v9, %v8254_v13 }
 0x18b   : > { %v2374_v39 = vcombine.high %v2240_v52, %v2240_v52  ;;  %v3005_v3 = vpop.f32.mrf.mxu0  ;;  %v3124_v16 = vcombine.high %v3116_v0, %v3116_v0  ;;  %v8332_v47 = vadd.f32 %v3116_v0, %v2347_v31  ;;  %v2381_v45 = vrot.slane %v2240_v52, %v8254_v13 }
 0x18c   : > { %v2244_v23 = vpop.f32.mrf.mxu1  ;;  %v3126_v5 = vcombine.high %v3005_v3, %v3005_v3  ;;  %v3133_v41 = vrot.slane %v3005_v3, %v8254_v13  ;;  %v3125_v57 = vcombine.high %v3123_v46, %v3123_v46  ;;  %v8336_v53 = vadd.f32 %v3123_v46, %v2354_v38  ;;  %v5254_v38 = vld [vmem:[%s9132_s3 + $0x8] sm:$0x3f] }
 0x18d   : > { %v6404_v25 = vpop.f32.mrf.mxu0  ;;  %v8338_v8 = vadd.f32 %v3124_v16, %v2355_v10  ;;  %v2245_v4 = vadd.f32 %v2244_v23, %v8251_v63  ;;  %v2373_v44 = vcombine.high %v2371_v24, %v2371_v24  ;;  %v2388_v7 = vrot.slane %v2374_v39, %v8254_v13 }
 0x18e   : > { %v3140_v20 = vrot.slane %v3126_v5, %v8254_v13  ;;  %v3141_v15 = vcombine.high %v3133_v41, %v3133_v41  ;;  %v6378_v31 = vpop.f32.mrf.mxu1  ;;  %v8343_v56 = vadd.f32 %v3125_v57, %v2356_v34  ;;  %v8345_v60 = vadd.f32 %v3133_v41, %v2364_v51 }
 0x18f   : > { %v3008_v54 = vpop.f32.mrf.mxu0  ;;  %v2391_v32 = vcombine.high %v2245_v4, %v2245_v4  ;;  %v2398_v2 = vrot.slane %v2245_v4, %v8254_v13  ;;  %v2389_v14 = vcombine.high %v2381_v45, %v2381_v45  ;;  %v8361_v46 = vcombine.high %v8307_v12, %v8307_v12 }
 0x190   : > { %v3142_v63 = vcombine.high %v3140_v20, %v3140_v20  ;;  %v8351_v28 = vadd.f32 %v3141_v15, %v2372_v26  ;;  %v2247_v52 = vpop.f32.mrf.mxu1  ;;  %v8353_v9 = vadd.f32 %v3140_v20, %v2371_v24  ;;  %v3143_v10 = vcombine.high %v3008_v54, %v3008_v54 }
 0x191   : > { %v2248_v17 = vadd.f32 %v2247_v52, %v8259_v55  ;;  %v3150_v51 = vrot.slane %v3008_v54, %v8254_v13  ;;  %v6405_v0 = vpop.f32.mrf.mxu0  ;;  %v5274_v3 = vcombine.high %v5254_v38, %v5254_v38  ;;  %v2405_v16 = vrot.slane %v2391_v32, %v8254_v13 }
 0x192   : > { %v8357_v34 = vadd.f32 %v3142_v63, %v2373_v44  ;;  %v6379_v39 = vpop.f32.mrf.mxu1  ;;  %v3157_v24 = vrot.slane %v3143_v10, %v8254_v13  ;;  %v2390_v41 = vcombine.high %v2388_v7, %v2388_v7  ;;  %v2406_v20 = vcombine.high %v2398_v2, %v2398_v2 }
 0x193   : > { %v2408_v23 = vcombine.high %v2248_v17, %v2248_v17  ;;  %v3158_v5 = vcombine.high %v3150_v51, %v3150_v51  ;;  %v3013_v55 = vpop.f32.mrf.mxu0  ;;  %v8365_v26 = vadd.f32 %v3150_v51, %v2381_v45  ;;  %v2415_v15 = vrot.slane %v2248_v17, %v8254_v13 }
 0x194   : > { %v2252_v57 = vpop.f32.mrf.mxu1  ;;  %v3160_v25 = vcombine.high %v3013_v55, %v3013_v55  ;;  %v3167_v4 = vrot.slane %v3013_v55, %v8254_v13  ;;  %v3159_v31 = vcombine.high %v3157_v24, %v3157_v24  ;;  %v8371_v32 = vadd.f32 %v3157_v24, %v2388_v7 }
 0x195   : > { %9378 = vst [vmem:[#allocation17_spill] sm:$0xff] %v8365_v26  ;;  %v8369_v44 = vadd.f32 %v3158_v5, %v2389_v14  ;;  %v6408_v54 = vpop.f32.mrf.mxu0  ;;  %v2253_v63 = vadd.f32 %v2252_v57, %v8235_v18  ;;  %v2407_v51 = vcombine.high %v2405_v16, %v2405_v16  ;;  %v2422_v0 = vrot.slane %v2408_v23, %v8254_v13 }
 0x196   : > { %v3174_v52 = vrot.slane %v3160_v25, %v8254_v13  ;;  %v3175_v10 = vcombine.high %v3167_v4, %v3167_v4  ;;  %v6382_v45 = vpop.f32.mrf.mxu1  ;;  %v8376_v39 = vadd.f32 %v3159_v31, %v2390_v41  ;;  %v8378_v55 = vadd.f32 %v3167_v4, %v2398_v2 }
 0x197   : > { %v3016_v17 = vpop.f32.mrf.mxu0  ;;  %v2425_v26 = vcombine.high %v2253_v63, %v2253_v63  ;;  %v2432_v14 = vrot.slane %v2253_v63, %v8254_v13  ;;  %v2423_v41 = vcombine.high %v2415_v15, %v2415_v15  ;;  %v8390_v4 = vrot.slane %v5254_v38, %v8254_v13 }
 0x198   : > { %9379 = vst [vmem:[#allocation40_spill] sm:$0xff] %v8376_v39  ;;  %9380 = vst [vmem:[#allocation35_spill] sm:$0xff] %v8378_v55  ;;  %v3176_v5 = vcombine.high %v3174_v52, %v3174_v52  ;;  %v8381_v7 = vadd.f32 %v3175_v10, %v2406_v20  ;;  %v2255_v24 = vpop.f32.mrf.mxu1  ;;  %v8383_v18 = vadd.f32 %v3174_v52, %v2405_v16 }
 0x199   : > { %v2256_v57 = vadd.f32 %v2255_v24, %v8237_v6  ;;  %v3177_v25 = vcombine.high %v3016_v17, %v3016_v17  ;;  %v3184_v54 = vrot.slane %v3016_v17, %v8254_v13  ;;  %v6409_v23 = vpop.f32.mrf.mxu0  ;;  %v8393_v63 = vrot.slane %v5274_v3, %v8254_v13 }
 0x19a   : > { %9381 = vst [vmem:[#allocation42_spill] sm:$0xff] %v8381_v7  ;;  %9382 = vst [vmem:[#allocation37_spill] sm:$0xff] %v8383_v18  ;;  %v8387_v31 = vadd.f32 %v3176_v5, %v2407_v51  ;;  %v6383_v2 = vpop.f32.mrf.mxu1  ;;  %v2439_v20 = vrot.slane %v2425_v26, %v8254_v13  ;;  %v2424_v45 = vcombine.high %v2422_v0, %v2422_v0 }
 0x19b   : > { %v2442_v16 = vcombine.high %v2256_v57, %v2256_v57  ;;  %v3191_v52 = vrot.slane %v3177_v25, %v8254_v13  ;;  %v3192_v6 = vcombine.high %v3184_v54, %v3184_v54  ;;  %v3021_v10 = vpop.f32.mrf.mxu0  ;;  %v8397_v17 = vadd.f32 %v3184_v54, %v2415_v15 }
 0x19c   : > { %9383 = vst [vmem:[#allocation25_spill] sm:$0xff] %v8387_v31  ;;  %v2260_v24 = vpop.f32.mrf.mxu1  ;;  %v3194_v51 = vcombine.high %v3021_v10, %v3021_v10  ;;  %v3201_v5 = vrot.slane %v3021_v10, %v8254_v13  ;;  %v2440_v23 = vcombine.high %v2432_v14, %v2432_v14  ;;  %v2449_v38 = vrot.slane %v2256_v57, %v8254_v13 }
 0x19d   : > { %9384 = vst [vmem:[#allocation16_spill] sm:$0xff] %v8397_v17  ;;  %v3193_v2 = vcombine.high %v3191_v52, %v3191_v52  ;;  %v8401_v3 = vadd.f32 %v3192_v6, %v2423_v41  ;;  %v6412_v31 = vpop.f32.mrf.mxu0  ;;  %v8403_v26 = vadd.f32 %v3191_v52, %v2422_v0  ;;  %v2261_v25 = vadd.f32 %v2260_v24, %v8239_v27 }
 0x19e   : > { %v3208_v18 = vrot.slane %v3194_v51, %v8254_v13  ;;  %v3209_v7 = vcombine.high %v3201_v5, %v3201_v5  ;;  %v6386_v15 = vpop.f32.mrf.mxu1  ;;  %v2441_v54 = vcombine.high %v2439_v20, %v2439_v20  ;;  %v2456_v17 = vrot.slane %v2442_v16, %v8254_v13 }
 0x19f   : > { %9385 = vst [vmem:[#allocation60_spill] sm:$0xff] %v8401_v3  ;;  %9386 = vst [vmem:[#allocation44_spill] sm:$0xff] %v8403_v26  ;;  %v8408_v55 = vadd.f32 %v3193_v2, %v2424_v45  ;;  %v8410_v10 = vadd.f32 %v3201_v5, %v2432_v14  ;;  %v3024_v57 = vpop.f32.mrf.mxu0  ;;  %v2459_v39 = vcombine.high %v2261_v25, %v2261_v25 }
 0x1a0   : > { %v2466_v41 = vrot.slane %v2261_v25, %v8254_v13  ;;  %v3210_v31 = vcombine.high %v3208_v18, %v3208_v18  ;;  %v8413_v0 = vadd.f32 %v3209_v7, %v2440_v23  ;;  %v2263_v52 = vpop.f32.mrf.mxu1  ;;  %v8415_v27 = vadd.f32 %v3208_v18, %v2439_v20 }
 0x1a1   : > { %9387 = vst [vmem:[#allocation63_spill] sm:$0xff] %v8408_v55  ;;  %9388 = vst [vmem:[#allocation61_spill] sm:$0xff] %v8410_v10  ;;  %v2264_v6 = vadd.f32 %v2263_v52, %v8241_v21  ;;  %v3211_v24 = vcombine.high %v3024_v57, %v3024_v57  ;;  %v3218_v51 = vrot.slane %v3024_v57, %v8254_v13  ;;  %v6413_v16 = vpop.f32.mrf.mxu0 }
 0x1a2   : > { %9389 = vst [vmem:[#allocation62_spill] sm:$0xff] %v8413_v0  ;;  %9390 = vst [vmem:[#allocation64_spill] sm:$0xff] %v8415_v27  ;;  %v2457_v45 = vcombine.high %v2449_v38, %v2449_v38  ;;  %v2473_v14 = vrot.slane %v2459_v39, %v8254_v13  ;;  %v8420_v5 = vadd.f32 %v3210_v31, %v2441_v54  ;;  %v6387_v2 = vpop.f32.mrf.mxu1 }
 0x1a3   : > { %v8424_v25 = vcombine.high %v8390_v4, %v8390_v4  ;;  %v2476_v7 = vcombine.high %v2264_v6, %v2264_v6  ;;  %v2483_v18 = vrot.slane %v2264_v6, %v8254_v13  ;;  %v3225_v20 = vrot.slane %v3211_v24, %v8254_v13  ;;  %v3029_v23 = vpop.f32.mrf.mxu0 }
 0x1a4   : > { %9391 = vst [vmem:[#allocation66_spill] sm:$0xff] %v8420_v5  ;;  %v3226_v21 = vcombine.high %v3218_v51, %v3218_v51  ;;  %v2458_v15 = vcombine.high %v2456_v17, %v2456_v17  ;;  %v8428_v57 = vadd.f32 %v3218_v51, %v2449_v38  ;;  %v2268_v52 = vpop.f32.mrf.mxu1  ;;  %v3228_v16 = vcombine.high %v3029_v23, %v3029_v23 }
 0x1a5   : > { %v3235_v39 = vrot.slane %v3029_v23, %v8254_v13  ;;  %v2474_v54 = vcombine.high %v2466_v41, %v2466_v41  ;;  %v2490_v31 = vrot.slane %v2476_v7, %v8254_v13  ;;  %v3227_v2 = vcombine.high %v3225_v20, %v3225_v20  ;;  %v6416_v27 = vpop.f32.mrf.mxu0 }
 0x1a6   : > { %9392 = vst [vmem:[#allocation65_spill] sm:$0xff] %v8428_v57  ;;  %v8432_v5 = vadd.f32 %v3226_v21, %v2457_v45  ;;  %v8434_v0 = vadd.f32 %v3225_v20, %v2456_v17  ;;  %v2269_v6 = vadd.f32 %v2268_v52, %v8247_v37  ;;  %v3242_v24 = vrot.slane %v3228_v16, %v8254_v13  ;;  %v6390_v38 = vpop.f32.mrf.mxu1 }
 0x1a7   : > { %v3243_v10 = vcombine.high %v3235_v39, %v3235_v39  ;;  %v2475_v51 = vcombine.high %v2473_v14, %v2473_v14  ;;  %v2491_v57 = vcombine.high %v2483_v18, %v2483_v18  ;;  %v8438_v55 = vadd.f32 %v3227_v2, %v2458_v15  ;;  %v3032_v26 = vpop.f32.mrf.mxu0 }
 0x1a8   : > { %9393 = vst [vmem:[#allocation41_spill] sm:$0xff] %v8432_v5  ;;  %9394 = vst [vmem:[#allocation43_spill] sm:$0xff] %v8434_v0  ;;  %v8440_v23 = vadd.f32 %v3235_v39, %v2466_v41  ;;  %v2493_v7 = vcombine.high %v2269_v6, %v2269_v6  ;;  %v2500_v45 = vrot.slane %v2269_v6, %v8254_v13  ;;  %v2271_v17 = vpop.f32.mrf.mxu1 }
 0x1a9   : > { %9395 = vst [vmem:[#allocation57_spill] sm:$0xff] %v8438_v55  ;;  %v3244_v21 = vcombine.high %v3242_v24, %v3242_v24  ;;  %v8443_v27 = vadd.f32 %v3243_v10, %v2474_v54  ;;  %v8445_v20 = vadd.f32 %v3242_v24, %v2473_v14  ;;  %v2272_v37 = vadd.f32 %v2271_v17, %v8249_v36  ;;  %v6417_v38 = vpop.f32.mrf.mxu0 }
 0x1aa   : > { %9396 = vst [vmem:[#allocation38_spill] sm:$0xff] %v8440_v23  ;;  %v3245_v52 = vcombine.high %v3032_v26, %v3032_v26  ;;  %v3252_v16 = vrot.slane %v3032_v26, %v8254_v13  ;;  %v2492_v15 = vcombine.high %v2490_v31, %v2490_v31  ;;  %v2507_v41 = vrot.slane %v2493_v7, %v8254_v13  ;;  %v6391_v23 = vpop.f32.mrf.mxu1 }
 0x1ab   : > { %9397 = vst [vmem:[#allocation33_spill] sm:$0xff] %v8443_v27  ;;  %9398 = vst [vmem:[#allocation39_spill] sm:$0xff] %v8445_v20  ;;  %v2508_v39 = vcombine.high %v2500_v45, %v2500_v45  ;;  %v8450_v2 = vadd.f32 %v3244_v21, %v2475_v51  ;;  %v2510_v6 = vcombine.high %v2272_v37, %v2272_v37  ;;  %v3037_v24 = vpop.f32.mrf.mxu0 }
 0x1ac   : > { %v2517_v10 = vrot.slane %v2272_v37, %v8254_v13  ;;  %v3259_v54 = vrot.slane %v3245_v52, %v8254_v13  ;;  %v3260_v14 = vcombine.high %v3252_v16, %v3252_v16  ;;  %v2509_v27 = vcombine.high %v2507_v41, %v2507_v41  ;;  %v3998_v38 = vpop.f32.mrf.mxu1 }
 0x1ad   : > { %9399 = vst [vmem:[#allocation26_spill] sm:$0xff] %v8450_v2  ;;  %v8454_v36 = vadd.f32 %v3252_v16, %v2483_v18  ;;  %v3262_v17 = vcombine.high %v3037_v24, %v3037_v24  ;;  %v3269_v26 = vrot.slane %v3037_v24, %v8254_v13  ;;  %v2524_v7 = vrot.slane %v2510_v6, %v8254_v13  ;;  %v6420_v23 = vpop.f32.mrf.mxu0 }
 0x1ae   : > { %v2525_v20 = vcombine.high %v2517_v10, %v2517_v10  ;;  %v3261_v51 = vcombine.high %v3259_v54, %v3259_v54  ;;  %v8458_v21 = vadd.f32 %v3260_v14, %v2491_v57  ;;  %v8460_v2 = vadd.f32 %v3259_v54, %v2490_v31  ;;  %v6426_v18 = vpop.f32.mrf.mxu1 }
 0x1af   : > { %9400 = vst [vmem:[#allocation28_spill] sm:$0xff] %v8454_v36  ;;  %v3276_v37 = vrot.slane %v3262_v17, %v8254_v13  ;;  %v3277_v52 = vcombine.high %v3269_v26, %v3269_v26  ;;  %v8463_v55 = vadd.f32 %v3269_v26, %v2500_v45  ;;  %v2526_v16 = vcombine.high %v2524_v7, %v2524_v7  ;;  %v3040_v6 = vpop.f32.mrf.mxu0 }
 0x1b0   : > { %v8465_v36 = vadd.f32 %v3261_v51, %v2492_v15  ;;  %v4067_v24 = vcombine.high %v3998_v38, %v3998_v38  ;;  %v4074_v0 = vrot.slane %v3998_v38, %v8254_v13  ;;  %v3279_v31 = vcombine.high %v3040_v6, %v3040_v6  ;;  %v4001_v54 = vpop.f32.mrf.mxu1 }
 0x1b1   : > { %v3278_v5 = vcombine.high %v3276_v37, %v3276_v37  ;;  %v8468_v3 = vadd.f32 %v3277_v52, %v2508_v39  ;;  %v8470_v57 = vadd.f32 %v3276_v37, %v2507_v41  ;;  %v3286_v26 = vrot.slane %v3040_v6, %v8254_v13  ;;  %v6421_v15 = vpop.f32.mrf.mxu0 }
 0x1b2   : > { %v4081_v14 = vrot.slane %v4067_v24, %v8254_v13  ;;  %v4082_v17 = vcombine.high %v4074_v0, %v4074_v0  ;;  %v4361_v45 = vadd.f32 %v4074_v0, %v8273_v30  ;;  %v3293_v38 = vrot.slane %v3279_v31, %v8254_v13  ;;  %v6427_v52 = vpop.f32.mrf.mxu1 }
 0x1b3   : > { %9401 = vst [vmem:[#allocation27_spill] sm:$0xff] %v8468_v3  ;;  %9402 = vst [vmem:[#allocation30_spill] sm:$0xff] %v8470_v57  ;;  %v8475_v51 = vadd.f32 %v3278_v5, %v2509_v27  ;;  %v4084_v23 = vcombine.high %v4001_v54, %v4001_v54  ;;  %v4091_v39 = vrot.slane %v4001_v54, %v8254_v13  ;;  %v4695_v3 = vpop.f32.mrf.mxu0 }
 0x1b4   : > { %v4083_v41 = vcombine.high %v4081_v14, %v4081_v14  ;;  %v4362_v37 = vadd.f32 %v4082_v17, %v8282_v35  ;;  %v4363_v18 = vadd.f32 %v4081_v14, %v8284_v50  ;;  %v3294_v24 = vcombine.high %v3286_v26, %v3286_v26  ;;  %v4006_v27 = vpop.f32.mrf.mxu1 }
 0x1b5   : > { %9403 = vst [vmem:[#allocation29_spill] sm:$0xff] %v8475_v51  ;;  %v3295_v57 = vcombine.high %v3293_v38, %v3293_v38  ;;  %v8481_v30 = vadd.f32 %v3286_v26, %v2517_v10  ;;  %v8483_v0 = vadd.f32 %v3293_v38, %v2524_v7  ;;  %v4098_v5 = vrot.slane %v4084_v23, %v8254_v13  ;;  %v6456_v35 = vpop.f32.mrf.mxu0 }
 0x1b6   : > { %v4364_v6 = vadd.f32 %v4083_v41, %v8291_v33  ;;  %v8487_v31 = vadd.f32 %v3294_v24, %v2525_v20  ;;  %v4099_v54 = vcombine.high %v4091_v39, %v4091_v39  ;;  %v4365_v15 = vadd.f32 %v4091_v39, %v8296_v1  ;;  %v6430_v26 = vpop.f32.mrf.mxu1 }
 0x1b7   : > { %9404 = vst [vmem:[#allocation52_spill] sm:$0xff] %v8481_v30  ;;  %9405 = vst [vmem:[#allocation32_spill] sm:$0xff] %v8483_v0  ;;  %v8490_v17 = vadd.f32 %v3295_v57, %v2526_v16  ;;  %v4100_v50 = vcombine.high %v4098_v5, %v4098_v5  ;;  %v4367_v14 = vadd.f32 %v4098_v5, %v8298_v19  ;;  %v4698_v20 = vpop.f32.mrf.mxu0 }
 0x1b8   : > { %9406 = vst [vmem:[#allocation31_spill] sm:$0xff] %v8487_v31  ;;  %v4101_v10 = vcombine.high %v4006_v27, %v4006_v27  ;;  %v4366_v7 = vadd.f32 %v4099_v54, %v8300_v48  ;;  %v4108_v38 = vrot.slane %v4006_v27, %v8254_v13  ;;  %v4764_v23 = vcombine.high %v4695_v3, %v4695_v3  ;;  %v4009_v39 = vpop.f32.mrf.mxu1 }
 0x1b9   : > { %9407 = vst [vmem:[#allocation59_spill] sm:$0xff] %v8490_v17  ;;  %v4771_v33 = vrot.slane %v4695_v3, %v8254_v13  ;;  %v4368_v52 = vadd.f32 %v4100_v50, %v8310_v49  ;;  %v4781_v16 = vcombine.high %v4698_v20, %v4698_v20  ;;  %v4788_v57 = vrot.slane %v4698_v20, %v8254_v13  ;;  %v6457_v5 = vpop.f32.mrf.mxu0 }
 0x1ba   : > { %v4115_v1 = vrot.slane %v4101_v10, %v8254_v13  ;;  %v4116_v41 = vcombine.high %v4108_v38, %v4108_v38  ;;  %v8500_v19 = vadd.f32 %v4108_v38, %v8315_v58  ;;  %v4778_v48 = vrot.slane %v4764_v23, %v8254_v13  ;;  %v6431_v35 = vpop.f32.mrf.mxu1 }
 0x1bb   : > { %v4779_v24 = vcombine.high %v4771_v33, %v4771_v33  ;;  %v5058_v54 = vadd.f32 %v4771_v33, %v4361_v45  ;;  %v4118_v49 = vcombine.high %v4009_v39, %v4009_v39  ;;  %v8509_v17 = vpop.f32.mrf.mxu0  ;;  %v4125_v23 = vrot.slane %v4009_v39, %v8254_v13 }
 0x1bc   : > { %v4117_v27 = vcombine.high %v4115_v1, %v4115_v1  ;;  %v8504_v3 = vadd.f32 %v4115_v1, %v8317_v42  ;;  %v8507_v50 = vadd.f32 %v4116_v41, %v8325_v29  ;;  %v4780_v10 = vcombine.high %v4778_v48, %v4778_v48  ;;  %v4014_v45 = vpop.f32.mrf.mxu1 }
 0x1bd   : > { %v5059_v26 = vadd.f32 %v4779_v24, %v4362_v37  ;;  %v5060_v20 = vadd.f32 %v4778_v48, %v4363_v18  ;;  %v5141_v38 = vadd.f32 %v8264_v43, %v5058_v54  ;;  %v4132_v42 = vrot.slane %v4118_v49, %v8254_v13  ;;  %v6460_v18 = vpop.f32.mrf.mxu0 }
 0x1be   : > { %v8512_v58 = vadd.f32 %v4117_v27, %v8327_v11  ;;  %v5061_v33 = vadd.f32 %v4780_v10, %v4364_v6  ;;  %v4795_v37 = vrot.slane %v4781_v16, %v8254_v13  ;;  %v4133_v48 = vcombine.high %v4125_v23, %v4125_v23  ;;  %v6434_v5 = vpop.f32.mrf.mxu1 }
 0x1bf   : > { %v5142_v1 = vadd.f32 %v8280_v40, %v5059_v26  ;;  %v5143_v29 = vadd.f32 %v8269_v22, %v5060_v20  ;;  %v5197_v41 = vmax.f32 %v5141_v38, 0.0  ;;  %v4134_v24 = vcombine.high %v4132_v42, %v4132_v42  ;;  %v8527_v49 = vpop.f32.mrf.mxu0 }
 0x1c0   : > { %v8521_v11 = vadd.f32 %v4125_v23, %v8332_v47  ;;  %v5144_v39 = vadd.f32 %v8289_v59, %v5061_v33  ;;  %v8525_v6 = vadd.f32 %v4132_v42, %v8336_v53  ;;  %v8531_v16 = vadd.f32 %v4133_v48, %v8338_v8  ;;  %v4017_v26 = vpop.f32.mrf.mxu1 }
 0x1c1   : > { %v5198_v27 = vmax.f32 %v5142_v1, 0.0  ;;  %v5199_v54 = vmax.f32 %v5143_v29, 0.0  ;;  %v5297_v35 = vadd.f32 %v8304_v61, %v5197_v41  ;;  %v8534_v10 = vadd.f32 %v4134_v24, %v8343_v56  ;;  %v6461_v53 = vpop.f32.mrf.mxu0 }
 0x1c2   : > { %v4796_v47 = vcombine.high %v4788_v57, %v4788_v57  ;;  %v5200_v20 = vmax.f32 %v5144_v39, 0.0  ;;  %v4797_v33 = vcombine.high %v4795_v37, %v4795_v37  ;;  %v5062_v42 = vadd.f32 %v4788_v57, %v4365_v15  ;;  %v6435_v41 = vpop.f32.mrf.mxu1 }
 0x1c3   : > { %v5298_v38 = vadd.f32 %v8323_v62, %v5198_v27  ;;  %v5299_v23 = vadd.f32 %v8307_v12, %v5199_v54  ;;  %v5064_v29 = vadd.f32 %v4795_v37, %v4367_v14  ;;  %v4135_v18 = vcombine.high %v4014_v45, %v4014_v45  ;;  %v8540_v24 = vpop.f32.mrf.mxu0 }
 0x1c4   : > { %v5063_v1 = vadd.f32 %v4796_v47, %v4366_v7  ;;  %v5300_v8 = vadd.f32 %v8361_v46, %v5200_v20  ;;  %v5065_v5 = vadd.f32 %v4797_v33, %v4368_v52  ;;  %v4142_v56 = vrot.slane %v4014_v45, %v8254_v13  ;;  %v8546_v7 = vpop.f32.mrf.mxu1 }
 0x1c5   : > { %v5409_v48 = vcombine.low %v5297_v35, %v5298_v38  ;;  %v5145_v39 = vadd.f32 %v8264_v43, %v5062_v42  ;;  %v5147_v54 = vadd.f32 %v8269_v22, %v5064_v29  ;;  %v4149_v15 = vrot.slane %v4135_v18, %v8254_v13  ;;  %v6464_v45 = vpop.f32.mrf.mxu0 }
 0x1c6   : > { %v5146_v27 = vadd.f32 %v8280_v40, %v5063_v1  ;;  %v5410_v14 = vcombine.low %v5299_v23, %v5300_v8  ;;  %v5148_v37 = vadd.f32 %v8264_v43, %v5065_v5  ;;  %v4150_v52 = vcombine.high %v4142_v56, %v4142_v56  ;;  %v6438_v33 = vpop.f32.mrf.mxu1 }
 0x1c7   : > { %v5417_v57 = vrot.slane %v5409_v48, %v8254_v13  ;;  %v5201_v35 = vmax.f32 %v5145_v39, 0.0  ;;  %v5203_v20 = vmax.f32 %v5147_v54, 0.0  ;;  %v4151_v38 = vcombine.high %v4149_v15, %v4149_v15  ;;  %v8557_v29 = vpop.f32.mrf.mxu0 }
 0x1c8   : > { %v5202_v47 = vmax.f32 %v5146_v27, 0.0  ;;  %v5424_v53 = vrot.slane %v5410_v14, %v8254_v13  ;;  %v5204_v42 = vmax.f32 %v5148_v37, 0.0  ;;  %v8552_v1 = vadd.f32 %v4142_v56, %v8345_v60  ;;  %v8565_v5 = vpop.f32.mrf.mxu1 }
 0x1c9   : > { %v8555_v23 = vadd.f32 %v4150_v52, %v8351_v28  ;;  %v5301_v18 = vadd.f32 %v8390_v4, %v5201_v35  ;;  %v5303_v8 = vadd.f32 %v8393_v63, %v5203_v20  ;;  %v8563_v48 = vadd.f32 %v4149_v15, %v8353_v9  ;;  %v6465_v27 = vpop.f32.mrf.mxu0 }
 0x1ca   : > { %v5302_v41 = vadd.f32 %v8424_v25, %v5202_v47  ;;  %v5425_v39 = vcombine.low %v5417_v57, %v5424_v53  ;;  %v8568_v60 = vadd.f32 %v4151_v38, %v8357_v34  ;;  %v4798_v28 = vcombine.high %v8509_v17, %v8509_v17  ;;  %v6439_v15 = vpop.f32.mrf.mxu1 }
 0x1cb   : > { %v4805_v56 = vrot.slane %v8509_v17, %v8254_v13  ;;  %v5440_v14 = vrot.slane %v5303_v8, %v8254_v13  ;;  %v5304_v37 = vadd.f32 %v8304_v61, %v5204_v42  ;;  %v4152_v9 = vcombine.high %v4017_v26, %v4017_v26  ;;  %v8579_v35 = vpop.f32.mrf.mxu0 }
 0x1cc   : > { %v5426_v54 = vcombine.low %v5301_v18, %v5302_v41  ;;  %v4812_v52 = vrot.slane %v4798_v28, %v8254_v13  ;;  %v4159_v45 = vrot.slane %v4017_v26, %v8254_v13  ;;  %v4815_v20 = vcombine.high %v8527_v49, %v8527_v49  ;;  %v8587_v33 = vpop.f32.mrf.mxu1 }
 0x1cd   : > { %v4813_v57 = vcombine.high %v4805_v56, %v4805_v56  ;;  %v5066_v34 = vadd.f32 %v4805_v56, %v8500_v19  ;;  %v4166_v17 = vrot.slane %v4152_v9, %v8254_v13  ;;  %v4822_v38 = vrot.slane %v8527_v49, %v8254_v13  ;;  %v6468_v18 = vpop.f32.mrf.mxu0  ;;  %v9408_v56 = vld [vmem:[#allocation17_spill] sm:$0xff] }
 0x1ce   : > { %v5433_v47 = vrot.slane %v5426_v54, %v8254_v13  ;;  %v4814_v53 = vcombine.high %v4812_v52, %v4812_v52  ;;  %v5068_v19 = vadd.f32 %v4812_v52, %v8504_v3  ;;  %v4167_v8 = vcombine.high %v4159_v45, %v4159_v45  ;;  %v6442_v54 = vpop.f32.mrf.mxu1 }
 0x1cf   : > { %v5067_v42 = vadd.f32 %v4813_v57, %v8507_v50  ;;  %v5149_v26 = vadd.f32 %v8280_v40, %v5066_v34  ;;  %v4168_v28 = vcombine.high %v4166_v17, %v4166_v17  ;;  %v8593_v27 = vadd.f32 %v4159_v45, %v9408_v56  ;;  %v8598_v50 = vpop.f32.mrf.mxu0  ;;  %v9409_v57 = vld [vmem:[#allocation40_spill] sm:$0xff] }
 0x1d0   : > { %v5441_v41 = vcombine.low %v5433_v47, %v5440_v14  ;;  %v5069_v9 = vadd.f32 %v4814_v53, %v8512_v58  ;;  %v5151_v15 = vadd.f32 %v8289_v59, %v5068_v19  ;;  %v8602_v52 = vadd.f32 %v4167_v8, %v8369_v44  ;;  %v8610_v45 = vpop.f32.mrf.mxu1 }
 0x1d1   : > { %v5150_v49 = vadd.f32 %v8269_v22, %v5067_v42  ;;  %v5205_v0 = vmax.f32 %v5149_v26, 0.0  ;;  %v8605_v14 = vadd.f32 %v4166_v17, %v8371_v32  ;;  %v8608_v34 = vadd.f32 %v4168_v28, %v9409_v57  ;;  %v6469_v19 = vpop.f32.mrf.mxu0 }
 0x1d2   : > { %v5690_v3 = vsel %vm5689_vm0, %v5441_v41, -inf  ;;  %v5152_v47 = vadd.f32 %v8264_v43, %v5069_v9  ;;  %v5207_v42 = vmax.f32 %v5151_v15, 0.0  ;;  %v4829_v18 = vrot.slane %v4815_v20, %v8254_v13  ;;  %v6443_v32 = vpop.f32.mrf.mxu1 }
 0x1d3   : > { %v5691_v58 = vmax.f32 %v5425_v39, %v5690_v3  ;;  %v5206_v53 = vmax.f32 %v5150_v49, 0.0  ;;  %v5305_v26 = vadd.f32 %v8323_v62, %v5205_v0  ;;  %v4830_v44 = vcombine.high %v4822_v38, %v4822_v38  ;;  %v8618_v39 = vpop.f32.mrf.mxu0 }
 0x1d4   : > { %v5070_v41 = vadd.f32 %v4822_v38, %v8521_v11  ;;  %v5208_v8 = vmax.f32 %v5152_v47, 0.0  ;;  %v5307_v56 = vadd.f32 %v8361_v46, %v5207_v42  ;;  %v4831_v9 = vcombine.high %v4829_v18, %v4829_v18  ;;  %v8622_v15 = vpop.f32.mrf.mxu1 }
 0x1d5   : > { %v5692_v17 = vrot.slane %v5691_v58, 4  ;;  %v5306_v28 = vadd.f32 %v8307_v12, %v5206_v53  ;;  %v5442_v54 = vcombine.low %v5304_v37, %v5305_v26  ;;  %v5071_v49 = vadd.f32 %v4830_v44, %v8531_v16  ;;  %v6472_v57 = vpop.f32.mrf.mxu0 }
 0x1d6   : > { %v5072_v0 = vadd.f32 %v4829_v18, %v8525_v6  ;;  %v5153_v11 = vadd.f32 %v8280_v40, %v5070_v41  ;;  %v5308_v38 = vadd.f32 %v8390_v4, %v5208_v8  ;;  %v5073_v53 = vadd.f32 %v4831_v9, %v8534_v10  ;;  %v6446_v16 = vpop.f32.mrf.mxu1 }
 0x1d7   : > { %v5693_v20 = vmax.f32 %v5691_v58, %v5692_v17  ;;  %v5443_v3 = vcombine.low %v5306_v28, %v5307_v56  ;;  %v5450_v47 = vrot.slane %v5442_v54, %v8254_v13  ;;  %v5154_v37 = vadd.f32 %v8269_v22, %v5071_v49  ;;  %v8633_v18 = vpop.f32.mrf.mxu0 }
 0x1d8   : > { %v5155_v42 = vadd.f32 %v8264_v43, %v5072_v0  ;;  %v5209_v26 = vmax.f32 %v5153_v11, 0.0  ;;  %v4169_v58 = vcombine.high %v8546_v7, %v8546_v7  ;;  %v5156_v44 = vadd.f32 %v8280_v40, %v5073_v53  ;;  %v8638_v17 = vpop.f32.mrf.mxu1 }
 0x1d9   : > { %v5694_v19 = vrot.slane %v5693_v20, 2  ;;  %v5457_v6 = vrot.slane %v5443_v3, %v8254_v13  ;;  %v5210_v41 = vmax.f32 %v5154_v37, 0.0  ;;  %v4176_v10 = vrot.slane %v8546_v7, %v8254_v13  ;;  %v6473_v9 = vpop.f32.mrf.mxu0  ;;  %v9410_v7 = vld [vmem:[#allocation35_spill] sm:$0xff] }
 0x1da   : > { %v5211_v32 = vmax.f32 %v5155_v42, 0.0  ;;  %v5309_v56 = vadd.f32 %v8424_v25, %v5209_v26  ;;  %v4183_v54 = vrot.slane %v4169_v58, %v8254_v13  ;;  %v5212_v49 = vmax.f32 %v5156_v44, 0.0  ;;  %v6447_v57 = vpop.f32.mrf.mxu1  ;;  %v9412_v58 = vld [vmem:[#allocation37_spill] sm:$0xff] }
 0x1db   : > { %v5695_v8 = vmax.f32 %v5693_v20, %v5694_v19  ;;  %v5458_v28 = vcombine.low %v5450_v47, %v5457_v6  ;;  %v5310_v0 = vadd.f32 %v8393_v63, %v5210_v41  ;;  %v4184_v11 = vcombine.high %v4176_v10, %v4176_v10  ;;  %v8647_v20 = vpop.f32.mrf.mxu0  ;;  %v9411_v6 = vld [vmem:[#allocation42_spill] sm:$0xff] }
 0x1dc   : > { %v5311_v3 = vadd.f32 %v8304_v61, %v5211_v32  ;;  %v5459_v37 = vcombine.low %v5308_v38, %v5309_v56  ;;  %v4185_v42 = vcombine.high %v4183_v54, %v4183_v54  ;;  %v8645_v16 = vadd.f32 %v4176_v10, %v9410_v7  ;;  %v8657_v41 = vpop.f32.mrf.mxu1  ;;  %v9413_v10 = vld [vmem:[#allocation25_spill] sm:$0xff] }
 0x1dd   : > { %v5696_v53 = vrot.slane %v5695_v8, 1  ;;  %v5312_v47 = vadd.f32 %v8323_v62, %v5212_v49  ;;  %v5473_v19 = vrot.slane %v5310_v0, %v8254_v13  ;;  %v8652_v26 = vadd.f32 %v4184_v11, %v9411_v6  ;;  %v6476_v49 = vpop.f32.mrf.mxu0 }
 0x1de   : > { %v8655_v44 = vadd.f32 %v4183_v54, %v9412_v58  ;;  %v5466_v38 = vrot.slane %v5459_v37, %v8254_v13  ;;  %v8663_v56 = vadd.f32 %v4185_v42, %v9413_v10  ;;  %v4832_v9 = vcombine.high %v8540_v24, %v8540_v24  ;;  %v6450_v57 = vpop.f32.mrf.mxu1 }
 0x1df   : > { %v8659_v32 = vmax.f32 %v5695_v8, %v5696_v53  ;;  %v5475_v0 = vcombine.low %v5311_v3, %v5312_v47  ;;  %v4839_v11 = vrot.slane %v8540_v24, %v8254_v13  ;;  %v4186_v54 = vcombine.high %v8565_v5, %v8565_v5  ;;  %v8678_v3 = vpop.f32.mrf.mxu0 }
 0x1e0   : > { %v4193_v8 = vrot.slane %v8565_v5, %v8254_v13  ;;  %v5474_v37 = vcombine.low %v5466_v38, %v5473_v19  ;;  %v4846_v42 = vrot.slane %v4832_v9, %v8254_v13  ;;  %v4849_v7 = vcombine.high %v8557_v29, %v8557_v29  ;;  %9414 = vst [vmem:[#allocation75_spill] sm:$0xff] %v8678_v3  ;;  %v8685_v58 = vpop.f32.mrf.mxu1 }
 0x1e1   : > { %v6275_v53 = vpack.c.bf16 %v8659_v32, %v8659_v32  ;;  %v8681_v24 = vrot.slane %v5475_v0, %v8254_v13  ;;  %v4847_v47 = vcombine.high %v4839_v11, %v4839_v11  ;;  %v5074_v6 = vadd.f32 %v4839_v11, %v8552_v1  ;;  %9415 = vst [vmem:[#allocation58_spill] sm:$0xff] %v8685_v58  ;;  %v6477_v49 = vpop.f32.mrf.mxu0 }
 0x1e2   : > { %v4200_v5 = vrot.slane %v4186_v54, %v8254_v13  ;;  %v5698_v19 = vsel %vm5689_vm0, %v5474_v37, -inf  ;;  %v4848_v38 = vcombine.high %v4846_v42, %v4846_v42  ;;  %v5076_v9 = vadd.f32 %v4846_v42, %v8563_v48  ;;  %v6451_v30 = vpop.f32.mrf.mxu1  ;;  %v9417_v42 = vld [vmem:[#allocation60_spill] sm:$0xff] }
 0x1e3   : > { %v8687_v10 = vunpack.c.l.b16 %v6275_v53  ;;  %v5699_v57 = vmax.f32 %v5458_v28, %v5698_v19  ;;  %v5075_v3 = vadd.f32 %v4847_v47, %v8555_v23  ;;  %v5157_v0 = vadd.f32 %v8269_v22, %v5074_v6  ;;  %v9416_v53 = vld [vmem:[#allocation16_spill] sm:$0xff]  ;;  %v8698_v37 = vpop.f32.mrf.mxu0  ;;  %v9419_v19 = vld [vmem:[#allocation63_spill] sm:$0xff] }
 0x1e4   : > { %v4201_v31 = vcombine.high %v4193_v8, %v4193_v8  ;;  %v5077_v1 = vadd.f32 %v4848_v38, %v8568_v60  ;;  %v5159_v11 = vadd.f32 %v8264_v43, %v5076_v9  ;;  %v4202_v54 = vcombine.high %v4200_v5, %v4200_v5  ;;  %v9418_v60 = vld [vmem:[#allocation44_spill] sm:$0xff] }
 0x1e5   : > { %v8696_v58 = vadd.f32 %v4193_v8, %v9416_v53  ;;  %v5700_v51 = vrot.slane %v5699_v57, 4  ;;  %v5158_v48 = vadd.f32 %v8289_v59, %v5075_v3  ;;  %v5213_v28 = vmax.f32 %v5157_v0, 0.0  ;;  %v6480_v8 = vpop.f32.mrf.mxu0 }
 0x1e6   : > { %v8702_v23 = vadd.f32 %v4201_v31, %v9417_v42  ;;  %v5160_v30 = vadd.f32 %v8280_v40, %v5077_v1  ;;  %v5215_v47 = vmax.f32 %v5159_v11, 0.0  ;;  %v8706_v6 = vadd.f32 %v4200_v5, %v9418_v60 }
 0x1e7   : > { %v8709_v38 = vadd.f32 %v4202_v54, %v9419_v19  ;;  %v5701_v9 = vmax.f32 %v5699_v57, %v5700_v51  ;;  %v5214_v49 = vmax.f32 %v5158_v48, 0.0  ;;  %v5313_v53 = vadd.f32 %v8307_v12, %v5213_v28  ;;  %v8718_v11 = vpop.f32.mrf.mxu0 }
 0x1e8   : > { %v4856_v3 = vrot.slane %v8557_v29, %v8254_v13  ;;  %v5216_v31 = vmax.f32 %v5160_v30, 0.0  ;;  %v5315_v0 = vadd.f32 %v8390_v4, %v5215_v47  ;;  %v4863_v1 = vrot.slane %v4849_v7, %v8254_v13  ;;  %9420 = vst [vmem:[#allocation54_spill] sm:$0xff] %v8718_v11 }
 0x1e9   : > { %v4203_v5 = vcombine.high %v8587_v33, %v8587_v33  ;;  %v5702_v54 = vrot.slane %v5701_v9, 2  ;;  %v5314_v42 = vadd.f32 %v8361_v46, %v5214_v49  ;;  %v4210_v30 = vrot.slane %v8587_v33, %v8254_v13  ;;  %v6481_v7 = vpop.f32.mrf.mxu0 }
 0x1ea   : > { %v4864_v51 = vcombine.high %v4856_v3, %v4856_v3  ;;  %v5078_v57 = vadd.f32 %v4856_v3, %v8593_v27  ;;  %v5316_v48 = vadd.f32 %v8424_v25, %v5216_v31  ;;  %v4865_v28 = vcombine.high %v4863_v1, %v4863_v1 }
 0x1eb   : > { %v5080_v29 = vadd.f32 %v4863_v1, %v8605_v14  ;;  %v5703_v47 = vmax.f32 %v5701_v9, %v5702_v54  ;;  %v5476_v60 = vcombine.low %v5313_v53, %v5314_v42  ;;  %v4217_v3 = vrot.slane %v4203_v5, %v8254_v13 }
 0x1ec   : > { %v5079_v19 = vadd.f32 %v4864_v51, %v8602_v52  ;;  %v5161_v8 = vadd.f32 %v8269_v22, %v5078_v57  ;;  %v5492_v11 = vcombine.low %v5315_v0, %v5316_v48  ;;  %v5081_v49 = vadd.f32 %v4865_v28, %v8608_v34  ;;  %v9421_v28 = vld [vmem:[#allocation61_spill] sm:$0xff] }
 0x1ed   : > { %v5163_v27 = vadd.f32 %v8280_v40, %v5080_v29  ;;  %v5704_v31 = vrot.slane %v5703_v47, 1  ;;  %v5490_v14 = vrot.slane %v5476_v60, %v8254_v13  ;;  %v4218_v54 = vcombine.high %v4210_v30, %v4210_v30 }
 0x1ee   : > { %v5162_v1 = vadd.f32 %v8264_v43, %v5079_v19  ;;  %v5217_v33 = vmax.f32 %v5161_v8, 0.0  ;;  %v5164_v9 = vadd.f32 %v8269_v22, %v5081_v49  ;;  %v5499_v52 = vrot.slane %v5492_v11, %v8254_v13  ;;  %v9423_v8 = vld [vmem:[#allocation64_spill] sm:$0xff] }
 0x1ef   : > { %v5219_v53 = vmax.f32 %v5163_v27, 0.0  ;;  %v5705_v42 = vmax.f32 %v5703_v47, %v5704_v31  ;;  %v5491_v0 = vcombine.low %v8681_v24, %v5490_v14  ;;  %v4219_v48 = vcombine.high %v4217_v3, %v4217_v3  ;;  %v9422_v24 = vld [vmem:[#allocation62_spill] sm:$0xff] }
 0x1f0   : > { %v5218_v34 = vmax.f32 %v5162_v1, 0.0  ;;  %v5317_v51 = vadd.f32 %v8393_v63, %v5217_v33  ;;  %v5220_v57 = vmax.f32 %v5164_v9, 0.0  ;;  %v8739_v29 = vadd.f32 %v4210_v30, %v9421_v28  ;;  %v9424_v27 = vld [vmem:[#allocation66_spill] sm:$0xff] }
 0x1f1   : > { %v5319_v5 = vadd.f32 %v8323_v62, %v5219_v53  ;;  %v8743_v7 = vsel %vm5762_vm2, %v5705_v42, %v8659_v32  ;;  %v6276_v60 = vpack.c.bf16 %v5705_v42, %v5705_v42  ;;  %v8748_v19 = vadd.f32 %v4218_v54, %v9422_v24 }
 0x1f2   : > { %v5318_v11 = vadd.f32 %v8304_v61, %v5218_v34  ;;  %v5506_v47 = vrot.slane %v5317_v51, %v8254_v13  ;;  %v8751_v49 = vadd.f32 %v4217_v3, %v9423_v8  ;;  %v8754_v31 = vadd.f32 %v4219_v48, %v9424_v27 }
 0x1f3   : > { %v4866_v30 = vcombine.high %v8579_v35, %v8579_v35  ;;  %v5811_v14 = vunpack.c.l.b16 %v6276_v60  ;;  %v4873_v33 = vrot.slane %v8579_v35, %v8254_v13  ;;  %v5320_v53 = vadd.f32 %v8307_v12, %v5220_v57 }
 0x1f4   : > { %v5507_v32 = vcombine.low %v5499_v52, %v5506_v47  ;;  %v5508_v1 = vcombine.low %v5318_v11, %v5319_v5  ;;  %v4220_v3 = vcombine.high %v8610_v45, %v8610_v45  ;;  %v4227_v54 = vrot.slane %v8610_v45, %v8254_v13  ;;  %v9425_v11 = vld [vmem:[#allocation65_spill] sm:$0xff] }
 0x1f5   : > { %v4880_v9 = vrot.slane %v4866_v30, %v8254_v13  ;;  %v8768_v42 = vsel %vm5762_vm2, %v5811_v14, %v8687_v10  ;;  %v4881_v35 = vcombine.high %v4873_v33, %v4873_v33  ;;  %v5082_v57 = vadd.f32 %v4873_v33, %v8645_v16 }
 0x1f6   : > { %v8771_v52 = vrot.slane %v5508_v1, %v8254_v13  ;;  %v5706_v34 = vsel %vm5689_vm0, %v5507_v32, -inf  ;;  %v4234_v45 = vrot.slane %v4220_v3, %v8254_v13  ;;  %v4235_v60 = vcombine.high %v4227_v54, %v4227_v54  ;;  %v9428_v3 = vld [vmem:[#allocation57_spill] sm:$0xff] }
 0x1f7   : > { %v5707_v51 = vmax.f32 %v5491_v0, %v5706_v34  ;;  %v4882_v5 = vcombine.high %v4880_v9, %v4880_v9  ;;  %v5084_v48 = vadd.f32 %v4880_v9, %v8655_v44  ;;  %v5083_v28 = vadd.f32 %v4881_v35, %v8652_v26  ;;  %v9426_v44 = vld [vmem:[#allocation41_spill] sm:$0xff]  ;;  %v9427_v26 = vld [vmem:[#allocation43_spill] sm:$0xff] }
 0x1f8   : > { %v8779_v10 = vadd.f32 %v4227_v54, %v9425_v11  ;;  %v5165_v8 = vadd.f32 %v8289_v59, %v5082_v57  ;;  %v4236_v27 = vcombine.high %v4234_v45, %v4234_v45  ;;  %v8786_v30 = vadd.f32 %v4235_v60, %v9426_v44 }
 0x1f9   : > { %v5708_v47 = vrot.slane %v5707_v51, 4  ;;  %v5085_v24 = vadd.f32 %v4882_v5, %v8663_v56  ;;  %v5167_v0 = vadd.f32 %v8280_v40, %v5084_v48  ;;  %v5166_v16 = vadd.f32 %v8264_v43, %v5083_v28 }
 0x1fa   : > { %v8789_v14 = vadd.f32 %v4234_v45, %v9427_v26  ;;  %v5221_v33 = vmax.f32 %v5165_v8, 0.0  ;;  %v8793_v54 = vadd.f32 %v4236_v27, %v9428_v3  ;;  %v4883_v34 = vcombine.high %v8598_v50, %v8598_v50 }
 0x1fb   : > { %v5709_v32 = vmax.f32 %v5707_v51, %v5708_v47  ;;  %v5168_v1 = vadd.f32 %v8269_v22, %v5085_v24  ;;  %v5223_v9 = vmax.f32 %v5167_v0, 0.0  ;;  %v5222_v56 = vmax.f32 %v5166_v16, 0.0 }
 0x1fc   : > { %v4890_v35 = vrot.slane %v8598_v50, %v8254_v13  ;;  %v5321_v48 = vadd.f32 %v8361_v46, %v5221_v33  ;;  %v4897_v45 = vrot.slane %v4883_v34, %v8254_v13  ;;  %v4237_v50 = vcombine.high %v8622_v15, %v8622_v15 }
 0x1fd   : > { %v5710_v5 = vrot.slane %v5709_v32, 2  ;;  %v5224_v57 = vmax.f32 %v5168_v1, 0.0  ;;  %v5323_v51 = vadd.f32 %v8424_v25, %v5223_v9  ;;  %v5322_v28 = vadd.f32 %v8390_v4, %v5222_v56 }
 0x1fe   : > { %v4898_v60 = vcombine.high %v4890_v35, %v4890_v35  ;;  %v5086_v11 = vadd.f32 %v4890_v35, %v8696_v58  ;;  %v5509_v8 = vcombine.low %v5320_v53, %v5321_v48  ;;  %v4899_v16 = vcombine.high %v4897_v45, %v4897_v45 }
 0x1ff   : > { %v5711_v47 = vmax.f32 %v5709_v32, %v5710_v5  ;;  %v5324_v24 = vadd.f32 %v8393_v63, %v5224_v57  ;;  %v5525_v0 = vcombine.low %v5322_v28, %v5323_v51  ;;  %v5088_v44 = vadd.f32 %v4897_v45, %v8706_v6 }
 0x200   : > { %v5087_v27 = vadd.f32 %v4898_v60, %v8702_v23  ;;  %v5523_v1 = vrot.slane %v5509_v8, %v8254_v13  ;;  %v5169_v58 = vadd.f32 %v8264_v43, %v5086_v11  ;;  %v5089_v53 = vadd.f32 %v4899_v16, %v8709_v38 }
 0x201   : > { %v5712_v26 = vrot.slane %v5711_v47, 1  ;;  %v5539_v33 = vrot.slane %v5324_v24, %v8254_v13  ;;  %v5532_v32 = vrot.slane %v5525_v0, %v8254_v13  ;;  %v5171_v56 = vadd.f32 %v8269_v22, %v5088_v44 }
 0x202   : > { %v5170_v9 = vadd.f32 %v8280_v40, %v5087_v27  ;;  %v5524_v23 = vcombine.low %v8771_v52, %v5523_v1  ;;  %v5225_v34 = vmax.f32 %v5169_v58, 0.0  ;;  %v4244_v6 = vrot.slane %v8622_v15, %v8254_v13  ;;  %v9429_v27 = vld [vmem:[#allocation38_spill] sm:$0xff]  ;;  %v9431_v58 = vld [vmem:[#allocation33_spill] sm:$0xff] }
 0x203   : > { %v5713_v3 = vmax.f32 %v5711_v47, %v5712_v26  ;;  %v5540_v35 = vcombine.low %v5532_v32, %v5539_v33  ;;  %v5172_v5 = vadd.f32 %v8289_v59, %v5089_v53  ;;  %v5227_v48 = vmax.f32 %v5171_v56, 0.0  ;;  %v9430_v26 = vld [vmem:[#allocation39_spill] sm:$0xff]  ;;  %v9432_v53 = vld [vmem:[#allocation26_spill] sm:$0xff] }
 0x204   : > { %v5226_v57 = vmax.f32 %v5170_v9, 0.0  ;;  %v5325_v28 = vadd.f32 %v8304_v61, %v5225_v34  ;;  %v4251_v45 = vrot.slane %v4237_v50, %v8254_v13  ;;  %v4252_v8 = vcombine.high %v4244_v6, %v4244_v6 }
 0x205   : > { %v8822_v51 = vsel %vm5764_vm3, %v5713_v3, %v8743_v7  ;;  %v6277_v38 = vpack.c.bf16 %v5713_v3, %v5713_v3  ;;  %v5714_v52 = vsel %vm5689_vm0, %v5540_v35, -inf  ;;  %v5228_v60 = vmax.f32 %v5172_v5, 0.0 }
 0x206   : > { %v5326_v11 = vadd.f32 %v8323_v62, %v5226_v57  ;;  %v5327_v15 = vadd.f32 %v8307_v12, %v5227_v48  ;;  %v5715_v24 = vmax.f32 %v5524_v23, %v5714_v52  ;;  %v4253_v0 = vcombine.high %v4251_v45, %v4251_v45 }
 0x207   : > { %v5812_v47 = vunpack.c.l.b16 %v6277_v38  ;;  %v5328_v16 = vadd.f32 %v8361_v46, %v5228_v60  ;;  %v8831_v44 = vadd.f32 %v4244_v6, %v9429_v27  ;;  %v8834_v1 = vadd.f32 %v4251_v45, %v9430_v26  ;;  %v9433_v60 = vld [vmem:[#allocation28_spill] sm:$0xff] }
 0x208   : > { %v5541_v7 = vcombine.low %v5325_v28, %v5326_v11  ;;  %v5716_v33 = vrot.slane %v5715_v24, 4  ;;  %v8841_v32 = vadd.f32 %v4252_v8, %v9431_v58  ;;  %v8844_v9 = vadd.f32 %v4253_v0, %v9432_v53 }
 0x209   : > { %v8838_v50 = vsel %vm5764_vm3, %v5812_v47, %v8768_v42  ;;  %v5542_v56 = vcombine.low %v5327_v15, %v5328_v16  ;;  %v4900_v23 = vcombine.high %v8618_v39, %v8618_v39  ;;  %v4907_v34 = vrot.slane %v8618_v39, %v8254_v13 }
 0x20a   : > { %v8847_v3 = vrot.slane %v5541_v7, %v8254_v13  ;;  %v5717_v42 = vmax.f32 %v5715_v24, %v5716_v33  ;;  %v4254_v6 = vcombine.high %v8638_v17, %v8638_v17  ;;  %v4261_v35 = vrot.slane %v8638_v17, %v8254_v13 }
 0x20b   : > { %v4917_v5 = vcombine.high %v8633_v18, %v8633_v18  ;;  %v8860_v57 = vrot.slane %v5542_v56, %v8254_v13  ;;  %v4914_v48 = vrot.slane %v4900_v23, %v8254_v13  ;;  %v4915_v38 = vcombine.high %v4907_v34, %v4907_v34 }
 0x20c   : > { %v5090_v28 = vadd.f32 %v4907_v34, %v8739_v29  ;;  %v5718_v45 = vrot.slane %v5717_v42, 2  ;;  %v4268_v39 = vrot.slane %v4254_v6, %v8254_v13  ;;  %v4269_v52 = vcombine.high %v4261_v35, %v4261_v35 }
 0x20d   : > { %v8866_v11 = vadd.f32 %v4261_v35, %v9433_v60  ;;  %v5557_v17 = vcombine.low %v8847_v3, %v8860_v57  ;;  %v4916_v15 = vcombine.high %v4914_v48, %v4914_v48  ;;  %v5091_v47 = vadd.f32 %v4915_v38, %v8748_v19 }
 0x20e   : > { %v5092_v24 = vadd.f32 %v4914_v48, %v8751_v49  ;;  %v5719_v8 = vmax.f32 %v5717_v42, %v5718_v45  ;;  %v5173_v0 = vadd.f32 %v8264_v43, %v5090_v28  ;;  %v4270_v16 = vcombine.high %v4268_v39, %v4268_v39 }
 0x20f   : > { %v8874_v29 = vadd.f32 %v4269_v52, %v8458_v21  ;;  %v5093_v7 = vadd.f32 %v4916_v15, %v8754_v31  ;;  %v5174_v27 = vadd.f32 %v8280_v40, %v5091_v47  ;;  %v8880_v33 = vadd.f32 %v4268_v39, %v8460_v2 }
 0x210   : > { %v5175_v26 = vadd.f32 %v8269_v22, %v5092_v24  ;;  %v5720_v58 = vrot.slane %v5719_v8, 1  ;;  %v5229_v19 = vmax.f32 %v5173_v0, 0.0  ;;  %v8883_v49 = vadd.f32 %v4270_v16, %v8465_v36 }
 0x211   : > { %v4924_v53 = vrot.slane %v8633_v18, %v8254_v13  ;;  %v5176_v21 = vadd.f32 %v8264_v43, %v5093_v7  ;;  %v5230_v56 = vmax.f32 %v5174_v27, 0.0  ;;  %v4931_v31 = vrot.slane %v4917_v5, %v8254_v13 }
 0x212   : > { %v5231_v3 = vmax.f32 %v5175_v26, 0.0  ;;  %v5721_v23 = vmax.f32 %v5719_v8, %v5720_v58  ;;  %v5329_v34 = vadd.f32 %v8390_v4, %v5229_v19  ;;  %v4278_v16 = vrot.slane %v8657_v41, %v8254_v13 }
 0x213   : > { %v4932_v42 = vcombine.high %v4924_v53, %v4924_v53  ;;  %v5094_v2 = vadd.f32 %v4924_v53, %v8779_v10  ;;  %v5232_v6 = vmax.f32 %v5176_v21, 0.0  ;;  %v5330_v35 = vadd.f32 %v8424_v25, %v5230_v56 }
 0x214   : > { %v5331_v36 = vadd.f32 %v8393_v63, %v5231_v3  ;;  %v4933_v57 = vcombine.high %v4931_v31, %v4931_v31  ;;  %v8895_v18 = vsel %vm5766_vm4, %v5721_v23, %v8822_v51  ;;  %v6278_v48 = vpack.c.bf16 %v5721_v23, %v5721_v23  ;;  %v9434_v23 = vld [vmem:[#allocation30_spill] sm:$0xff] }
 0x215   : > { %v5095_v38 = vadd.f32 %v4932_v42, %v8786_v30  ;;  %v5096_v5 = vadd.f32 %v4931_v31, %v8789_v14  ;;  %v5558_v28 = vcombine.low %v5329_v34, %v5330_v35  ;;  %v5177_v39 = vadd.f32 %v8280_v40, %v5094_v2  ;;  %v9435_v2 = vld [vmem:[#allocation27_spill] sm:$0xff] }
 0x216   : > { %v5572_v45 = vrot.slane %v5331_v36, %v8254_v13  ;;  %v5097_v10 = vadd.f32 %v4933_v57, %v8793_v54  ;;  %v5813_v52 = vunpack.c.l.b16 %v6278_v48  ;;  %v5332_v51 = vadd.f32 %v8304_v61, %v5232_v6 }
 0x217   : > { %v5178_v60 = vadd.f32 %v8269_v22, %v5095_v38  ;;  %v5179_v15 = vadd.f32 %v8289_v59, %v5096_v5  ;;  %v5565_v47 = vrot.slane %v5558_v28, %v8254_v13  ;;  %v5233_v24 = vmax.f32 %v5177_v39, 0.0  ;;  %v9437_v39 = vld [vmem:[#allocation58_spill] sm:$0xff] }
 0x218   : > { %v5180_v30 = vadd.f32 %v8264_v43, %v5097_v10  ;;  %v4271_v14 = vcombine.high %v8657_v41, %v8657_v41  ;;  %v8911_v54 = vsel %vm5766_vm4, %v5813_v52, %v8838_v50  ;;  %v4286_v21 = vcombine.high %v4278_v16, %v4278_v16 }
 0x219   : > { %v5234_v8 = vmax.f32 %v5178_v60, 0.0  ;;  %v5235_v0 = vmax.f32 %v5179_v15, 0.0  ;;  %v5573_v7 = vcombine.low %v5565_v47, %v5572_v45  ;;  %v5333_v26 = vadd.f32 %v8323_v62, %v5233_v24 }
 0x21a   : > { %v5236_v27 = vmax.f32 %v5180_v30, 0.0  ;;  %v4285_v58 = vrot.slane %v4271_v14, %v8254_v13  ;;  %v8920_v56 = vadd.f32 %v4278_v16, %v8463_v55  ;;  %v8927_v6 = vadd.f32 %v4286_v21, %v9435_v2  ;;  %v9436_v55 = vld [vmem:[#allocation29_spill] sm:$0xff]  ;;  %v9442_v2 = vld [vmem:[#allocation75_spill] sm:$0xff] }
 0x21b   : > { %v5334_v19 = vadd.f32 %v8307_v12, %v5234_v8  ;;  %v5335_v53 = vadd.f32 %v8361_v46, %v5235_v0  ;;  %v5722_v50 = vsel %vm5689_vm0, %v5573_v7, -inf  ;;  %v5574_v3 = vcombine.low %v5332_v51, %v5333_v26  ;;  %v9438_v7 = vld [vmem:[#allocation52_spill] sm:$0xff] }
 0x21c   : > { %v4287_v31 = vcombine.high %v4285_v58, %v4285_v58  ;;  %v8924_v41 = vadd.f32 %v4285_v58, %v9434_v23  ;;  %v5723_v34 = vmax.f32 %v5557_v17, %v5722_v50  ;;  %v4934_v35 = vcombine.high %v8647_v20, %v8647_v20 }
 0x21d   : > { %v5575_v42 = vcombine.low %v5334_v19, %v5335_v53  ;;  %v8932_v36 = vrot.slane %v5574_v3, %v8254_v13  ;;  %v4941_v48 = vrot.slane %v8647_v20, %v8254_v13  ;;  %v5336_v28 = vadd.f32 %v8390_v4, %v5236_v27  ;;  %v9440_v3 = vld [vmem:[#allocation32_spill] sm:$0xff] }
 0x21e   : > { %v8935_v57 = vadd.f32 %v4287_v31, %v9436_v55  ;;  %v5724_v38 = vrot.slane %v5723_v34, 4  ;;  %v4948_v17 = vrot.slane %v4934_v35, %v8254_v13  ;;  %v4288_v52 = vcombine.high %v9437_v39, %v9437_v39 }
 0x21f   : > { %v8940_v5 = vrot.slane %v5575_v42, %v8254_v13  ;;  %v4949_v45 = vcombine.high %v4941_v48, %v4941_v48  ;;  %v5098_v10 = vadd.f32 %v4941_v48, %v8831_v44  ;;  %v4295_v60 = vrot.slane %v9437_v39, %v8254_v13 }
 0x220   : > { %v5725_v15 = vmax.f32 %v5723_v34, %v5724_v38  ;;  %v4950_v51 = vcombine.high %v4948_v17, %v4948_v17  ;;  %v5100_v47 = vadd.f32 %v4948_v17, %v8834_v1  ;;  %v4302_v14 = vrot.slane %v4288_v52, %v8254_v13  ;;  %v9439_v1 = vld [vmem:[#allocation31_spill] sm:$0xff] }
 0x221   : > { %v5590_v20 = vcombine.low %v8932_v36, %v8940_v5  ;;  %v5099_v30 = vadd.f32 %v4949_v45, %v8841_v32  ;;  %v5181_v24 = vadd.f32 %v8280_v40, %v5098_v10  ;;  %v4303_v44 = vcombine.high %v4295_v60, %v4295_v60  ;;  %v9441_v34 = vld [vmem:[#allocation59_spill] sm:$0xff] }
 0x222   : > { %v5726_v8 = vrot.slane %v5725_v15, 2  ;;  %v5101_v0 = vadd.f32 %v4950_v51, %v8844_v9  ;;  %v5183_v16 = vadd.f32 %v8264_v43, %v5100_v47  ;;  %v8958_v27 = vadd.f32 %v4295_v60, %v9438_v7 }
 0x223   : > { %v5182_v26 = vadd.f32 %v8269_v22, %v5099_v30  ;;  %v5237_v58 = vmax.f32 %v5181_v24, 0.0  ;;  %v4304_v19 = vcombine.high %v4302_v14, %v4302_v14  ;;  %v8962_v53 = vadd.f32 %v4303_v44, %v9439_v1 }
 0x224   : > { %v5727_v32 = vmax.f32 %v5725_v15, %v5726_v8  ;;  %v5184_v21 = vadd.f32 %v8280_v40, %v5101_v0  ;;  %v5239_v50 = vmax.f32 %v5183_v16, 0.0  ;;  %v8966_v31 = vadd.f32 %v4302_v14, %v9440_v3 }
 0x225   : > { %v5238_v9 = vmax.f32 %v5182_v26, 0.0  ;;  %v5337_v23 = vadd.f32 %v8424_v25, %v5237_v58  ;;  %v8970_v42 = vadd.f32 %v4304_v19, %v9441_v34  ;;  %v4951_v35 = vcombine.high %v9442_v2, %v9442_v2 }
 0x226   : > { %v5728_v36 = vrot.slane %v5727_v32, 1  ;;  %v5240_v55 = vmax.f32 %v5184_v21, 0.0  ;;  %v5339_v48 = vadd.f32 %v8304_v61, %v5239_v50  ;;  %v4958_v38 = vrot.slane %v9442_v2, %v8254_v13 }
 0x227   : > { %v5338_v5 = vadd.f32 %v8393_v63, %v5238_v9  ;;  %v5591_v17 = vcombine.low %v5336_v28, %v5337_v23  ;;  %v4965_v45 = vrot.slane %v4951_v35, %v8254_v13  ;;  %v4968_v10 = vcombine.high %v8698_v37, %v8698_v37 }
 0x228   : > { %v5729_v39 = vmax.f32 %v5727_v32, %v5728_v36  ;;  %v5340_v52 = vadd.f32 %v8323_v62, %v5240_v55  ;;  %v4966_v60 = vcombine.high %v4958_v38, %v4958_v38  ;;  %v5102_v15 = vadd.f32 %v4958_v38, %v8866_v11 }
 0x229   : > { %v5598_v51 = vrot.slane %v5591_v17, %v8254_v13  ;;  %v5605_v47 = vrot.slane %v5338_v5, %v8254_v13  ;;  %v4967_v30 = vcombine.high %v4965_v45, %v4965_v45  ;;  %v5104_v24 = vadd.f32 %v4965_v45, %v8880_v33 }
 0x22a   : > { %v8988_v28 = vsel %vm5768_vm5, %v5729_v39, %v8895_v18  ;;  %v6279_v14 = vpack.c.bf16 %v5729_v39, %v5729_v39  ;;  %v5607_v44 = vcombine.low %v5339_v48, %v5340_v52  ;;  %v5103_v8 = vadd.f32 %v4966_v60, %v8874_v29 }
 0x22b   : > { %v5606_v0 = vcombine.low %v5598_v51, %v5605_v47  ;;  %v5105_v16 = vadd.f32 %v4967_v30, %v8883_v49  ;;  %v5185_v11 = vadd.f32 %v8269_v22, %v5102_v15  ;;  %v5187_v7 = vadd.f32 %v8264_v43, %v5104_v24 }
 0x22c   : > { %v5814_v26 = vunpack.c.l.b16 %v6279_v14  ;;  %v5186_v58 = vadd.f32 %v8289_v59, %v5103_v8  ;;  %v4975_v33 = vrot.slane %v8698_v37, %v8254_v13  ;;  %v4982_v50 = vrot.slane %v4968_v10, %v8254_v13 }
 0x22d   : > { %v5730_v18 = vsel %vm5689_vm0, %v5606_v0, -inf  ;;  %v5188_v19 = vadd.f32 %v8280_v40, %v5105_v16  ;;  %v5241_v1 = vmax.f32 %v5185_v11, 0.0  ;;  %v5243_v32 = vmax.f32 %v5187_v7, 0.0 }
 0x22e   : > { %v9001_v29 = vsel %vm5768_vm5, %v5814_v26, %v8911_v54  ;;  %v5731_v49 = vmax.f32 %v5590_v20, %v5730_v18  ;;  %v5242_v21 = vmax.f32 %v5186_v58, 0.0  ;;  %v5615_v3 = vrot.slane %v5607_v44, %v8254_v13 }
 0x22f   : > { %v5244_v9 = vmax.f32 %v5188_v19, 0.0  ;;  %v5341_v23 = vadd.f32 %v8307_v12, %v5241_v1  ;;  %v4983_v37 = vcombine.high %v4975_v33, %v4975_v33  ;;  %v4984_v35 = vcombine.high %v4982_v50, %v4982_v50 }
 0x230   : > { %v5732_v34 = vrot.slane %v5731_v49, 4  ;;  %v5342_v2 = vadd.f32 %v8361_v46, %v5242_v21  ;;  %v5106_v36 = vadd.f32 %v4975_v33, %v8920_v56  ;;  %v5343_v55 = vadd.f32 %v8390_v4, %v5243_v32  ;;  %v9443_v56 = vld [vmem:[#allocation54_spill] sm:$0xff] }
 0x231   : > { %v5344_v54 = vadd.f32 %v8424_v25, %v5244_v9  ;;  %v5107_v20 = vadd.f32 %v4983_v37, %v8927_v6  ;;  %v5108_v48 = vadd.f32 %v4982_v50, %v8924_v41  ;;  %v5109_v17 = vadd.f32 %v4984_v35, %v8935_v57 }
 0x232   : > { %v5733_v38 = vmax.f32 %v5731_v49, %v5732_v34  ;;  %v5608_v5 = vcombine.low %v5341_v23, %v5342_v2  ;;  %v5189_v45 = vadd.f32 %v8269_v22, %v5106_v36  ;;  %v4985_v60 = vcombine.high %v9443_v56, %v9443_v56 }
 0x233   : > { %v5624_v10 = vcombine.low %v5343_v55, %v5344_v54  ;;  %v5190_v39 = vadd.f32 %v8264_v43, %v5107_v20  ;;  %v5191_v52 = vadd.f32 %v8280_v40, %v5108_v48  ;;  %v5192_v6 = vadd.f32 %v8269_v22, %v5109_v17 }
 0x234   : > { %v5734_v15 = vrot.slane %v5733_v38, 2  ;;  %v5622_v51 = vrot.slane %v5608_v5, %v8254_v13  ;;  %v5245_v41 = vmax.f32 %v5189_v45, 0.0  ;;  %v4992_v24 = vrot.slane %v9443_v56, %v8254_v13 }
 0x235   : > { %v5246_v47 = vmax.f32 %v5190_v39, 0.0  ;;  %v5247_v30 = vmax.f32 %v5191_v52, 0.0  ;;  %v5631_v57 = vrot.slane %v5624_v10, %v8254_v13  ;;  %v5248_v8 = vmax.f32 %v5192_v6, 0.0 }
 0x236   : > { %v5735_v14 = vmax.f32 %v5733_v38, %v5734_v15  ;;  %v5623_v44 = vcombine.low %v5615_v3, %v5622_v51  ;;  %v5345_v0 = vadd.f32 %v8393_v63, %v5245_v41  ;;  %v4999_v7 = vrot.slane %v4985_v60, %v8254_v13 }
 0x237   : > { %v5346_v16 = vadd.f32 %v8304_v61, %v5246_v47  ;;  %v5347_v11 = vadd.f32 %v8323_v62, %v5247_v30  ;;  %v5000_v26 = vcombine.high %v4992_v24, %v4992_v24  ;;  %v5110_v18 = vadd.f32 %v4992_v24, %v8958_v27 }
 0x238   : > { %v5736_v58 = vrot.slane %v5735_v14, 1  ;;  %v5638_v33 = vrot.slane %v5345_v0, %v8254_v13  ;;  %v5001_v1 = vcombine.high %v4999_v7, %v4999_v7  ;;  %v5112_v49 = vadd.f32 %v4999_v7, %v8966_v31 }
 0x239   : > { %v5640_v19 = vcombine.low %v5346_v16, %v5347_v11  ;;  %v5111_v32 = vadd.f32 %v5000_v26, %v8962_v53  ;;  %v5193_v61 = vadd.f32 %v8289_v59, %v5110_v18  ;;  %v5348_v23 = vadd.f32 %v8307_v12, %v5248_v8 }
 0x23a   : > { %v5737_v21 = vmax.f32 %v5735_v14, %v5736_v58  ;;  %v5639_v50 = vcombine.low %v5631_v57, %v5638_v33  ;;  %v5113_v62 = vadd.f32 %v5001_v1, %v8970_v42  ;;  %v5195_v9 = vadd.f32 %v8280_v40, %v5112_v49 }
 0x23b   : > { %v5194_v3 = vadd.f32 %v8264_v43, %v5111_v32  ;;  %v5249_v34 = vmax.f32 %v5193_v61, 0.0 }
 0x23c   : > { %v5771_v27 = vsel %vm5770_vm6, %v5737_v21, %v8988_v28  ;;  %v6280_v37 = vpack.c.bf16 %v5737_v21, %v5737_v21  ;;  %v5738_v53 = vsel %vm5689_vm0, %v5639_v50, -inf  ;;  %v5196_v2 = vadd.f32 %v8269_v22, %v5113_v62 }
 0x23d   : > { %v5739_v31 = vmax.f32 %v5623_v44, %v5738_v53  ;;  %v5250_v35 = vmax.f32 %v5194_v3, 0.0  ;;  %v5251_v59 = vmax.f32 %v5195_v9, 0.0  ;;  %v5349_v42 = vadd.f32 %v8361_v46, %v5249_v34 }
 0x23e   : > { %v5815_v36 = vunpack.c.l.b16 %v6280_v37  ;;  %v5252_v55 = vmax.f32 %v5196_v2, 0.0  ;;  %v5648_v22 = vrot.slane %v5640_v19, %v8254_v13 }
 0x23f   : > { %v5740_v43 = vrot.slane %v5739_v31, 4  ;;  %v5350_v40 = vadd.f32 %v8390_v4, %v5250_v35  ;;  %v5351_v12 = vadd.f32 %v8424_v25, %v5251_v59  ;;  %v5641_v54 = vcombine.low %v5348_v23, %v5349_v42 }
 0x240   : > { %v5822_v28 = vsel %vm5770_vm6, %v5815_v36, %v9001_v29  ;;  %v5352_v48 = vadd.f32 %v8393_v63, %v5252_v55 }
 0x241   : > { %v5741_v20 = vmax.f32 %v5739_v31, %v5740_v43  ;;  %v5657_v38 = vcombine.low %v5350_v40, %v5351_v12  ;;  %v5655_v5 = vrot.slane %v5641_v54, %v8254_v13 }
 0x242   : > { %v5671_v45 = vrot.slane %v5352_v48, %v8254_v13 }
 0x243   : > { %v5742_v17 = vrot.slane %v5741_v20, 2  ;;  %v5664_v46 = vrot.slane %v5657_v38, %v8254_v13  ;;  %v5656_v4 = vcombine.low %v5648_v22, %v5655_v5 }
 0x245   : > { %v5743_v10 = vmax.f32 %v5741_v20, %v5742_v17  ;;  %v5672_v25 = vcombine.low %v5664_v46, %v5671_v45 }
 0x247   : > { %v5744_v39 = vrot.slane %v5743_v10, 1  ;;  %v5746_v29 = vsel %vm5689_vm0, %v5672_v25, -inf }
 0x248   : > { %v5747_v52 = vmax.f32 %v5656_v4, %v5746_v29 }
 0x249   : > { %v5745_v56 = vmax.f32 %v5743_v10, %v5744_v39 }
 0x24a   : > { %v5748_v63 = vrot.slane %v5747_v52, 4 }
 0x24b   : > { %v5773_v60 = vsel %vm5772_vm7, %v5745_v56, %v5771_v27  ;;  %v6281_v15 = vpack.c.bf16 %v5745_v56, %v5745_v56 }
 0x24c   : > { %v5749_v51 = vmax.f32 %v5747_v52, %v5748_v63 }
 0x24d   : > { %v5816_v6 = vunpack.c.l.b16 %v6281_v15 }
 0x24e   : > { %v5750_v41 = vrot.slane %v5749_v51, 2 }
 0x24f   : > { %v5823_v47 = vsel %vm5772_vm7, %v5816_v6, %v5822_v28 }
 0x250   : > { %v5751_v30 = vmax.f32 %v5749_v51, %v5750_v41 }
 0x252   : > { %v5752_v57 = vrot.slane %v5751_v30, 1 }
 0x254   : > { %v5753_v13 = vmax.f32 %v5751_v30, %v5752_v57 }
 0x256   : > { %v5775_v24 = vsel %vm5774_vm8, %v5753_v13, %v5773_v60  ;;  %v6282_v14 = vpack.c.bf16 %v5753_v13, %v5753_v13 }
 0x257   : > { %5777 = vst [vmem:[#allocation8] sm:$0xff] %v5775_v24 }
 0x258   : > { %v5817_v44 = vunpack.c.l.b16 %v6282_v14 }
 0x25a   : > { %v5824_v8 = vsel %vm5774_vm8, %v5817_v44, %v5823_v47 }
 0x25b   : > { %v5825_v0 = vpack.c.b16 %v5824_v8, %v5824_v8 }
 0x25d   : > { %5827 = vst [vmem:[#allocation2] sm:$0xf] %v5825_v0 }
 0x25e PF: > { %v6592_v16 = vld [vmem:[%s6915_s8 + $0x38] sm:$0xff]   ;;  %v6743_v11 = vmov 0.0   ;;  %v6593_v7 = vld [vmem:[%s6915_s8 + $0x30] sm:$0xff]   ;;  %vm6744_vm9 = vmmov 0   ;;  %v6594_v26 = vld [vmem:[%s6915_s8 + $0x28] sm:$0xff]   ;;  %s6745_s10 = smov [#allocation8]  }
 0x25f   : > { %6482 = vmatprep.subr.bf16.mxu0 %v6743_v11  ;;  %6498 = vmatprep.mubr.msk.bf16.mxu0 %vm6744_vm9, %v6743_v11  ;;  %v6595_v58 = vld [vmem:[%s6915_s8 + $0x20] sm:$0xff]   ;;  %v6596_v33 = vld [vmem:[%s6915_s8 + $0x18] sm:$0xff]   ;;  %v6597_v18 = vld [vmem:[%s6915_s8 + $0x10] sm:$0xff]   ;;  %s5970_s14 = sshll.u32 %s6745_s10, 4  ;;  %p9444_p12 = scmp.ne.s32.totalorder %s9228_s11, 0  ;;  %s5971_s14 = int_to_ptr.vmem [resolvable:$true] %s5970_s14 }
 0x260   : > { %6483 = vmatpush3.bf16.msra.mxu0 %v6592_v16  ;;  %v6598_v19 = vld [vmem:[%s6915_s8 + $0x8] sm:$0xff]   ;;  %v6599_v1 = vld [vmem:[%s6915_s8] sm:$0xff]   ;;  %s6626_s19 = scalar_lea.vmem %s5971_s14, 128  ;;  %p6633_p1 = scmp.lt.s32.totalorder %s5971_s14, %s5971_s14 }
 0x261   : > { %6484 = vmatprep.subr.bf16.mxu0 %v6743_v11  ;;  %p6627_p11 = scmp.ne.s32.totalorder %s5971_s14, %s6626_s19  ;;  %p6634_p2 = scmp.lt.s32.totalorder %s6626_s19, %s6626_s19 }
 0x263   : > { %p6628_p13 = pnand %p6627_p11, %p9444_p12  ;;  %p6635_p6 = por %p6634_p2, %p6633_p1 }
 0x264   : > { %6485 = vmatpush3.bf16.msra.mxu0 %v6593_v7  ;;  %v5828_v32 = vld [vmem:[#allocation2] sm:$0xf] }
 0x265   : > { %6486 = vmatprep.subr.bf16.mxu0 %v6743_v11  ;;  %p6629_p0 = pneg %p6628_p13 }
 0x267   : > { %p6636_p7 = pnand %p6635_p6, %p6629_p0 }
 0x268   : > { %6487 = vmatpush3.bf16.msra.mxu0 %v6594_v26 }
 0x269   : > { %6488 = vmatprep.subr.bf16.mxu0 %v6743_v11 }
 0x26c   : > { %6489 = vmatpush3.bf16.msra.mxu0 %v6595_v58 }
 0x26d   : > { %6490 = vmatprep.subr.bf16.mxu0 %v6743_v11 }
 0x270   : > { %6491 = vmatpush3.bf16.msra.mxu0 %v6596_v33 }
 0x271   : > { %6492 = vmatprep.subr.bf16.mxu0 %v6743_v11 }
 0x274   : > { %6493 = vmatpush3.bf16.msra.mxu0 %v6597_v18 }
 0x275   : > { %6494 = vmatprep.subr.bf16.mxu0 %v6743_v11 }
 0x278   : > { %6495 = vmatpush3.bf16.msra.mxu0 %v6598_v19 }
 0x279   : > { %6496 = vmatprep.subr.bf16.mxu0 %v6743_v11 }
 0x27c   : > { %6497 = vmatpush3.bf16.msra.mxu0 %v6599_v1 }
 0x27f   : > { %6499 = vmatmul.mubr.bf16.vlgmr.msra.gmra.mxu0 %v5828_v32 }
 0x280   : > { %6639 = shalt.err (!%p6636_p7)
}
 0x281   : > { %6510 = dma.vmem_to_hbm [thread:$0]  (%p9444_p12), %s5971_s14, 128, %s9136_s7, [#allocation9]   ;;  %v6260_v49 = vld [vmem:[%s451_s30] ss:$0 sm:$0xff] }
 0x282   : > { %s6270_s20 = sshll.u32 %s6726_s27, 7  ;;  %s5957_s17 = sshll.u32 %s6917_s18, 4  ;;  %s9078_s17 = int_to_ptr.vmem [resolvable:$true] %s5957_s17 }
 0x283   : > { %s9076_s19 = scalar_lea.hbm %s9135_s6, %s6270_s20  ;;  %s5942_s14 = scalar_lea.sflag [#allocation5], %s6903_s9 }
 0x284   : > { %s6650_s22 = scalar_lea.vmem %s9078_s17, 128  ;;  %p9445_p9 = scmp.ne.s32.totalorder %s9231_s13, 0 }
 0x285   : > { %p6651_p8 = scmp.ne.s32.totalorder %s9078_s17, %s6650_s22  ;;  %s6746_s27 = smov [#allocation7]  }
 0x286   : > { %s6654_s30 = sshll.u32 %s6746_s27, 4  ;;  %s6655_s30 = int_to_ptr.vmem [resolvable:$false] %s6654_s30 }
 0x287   : > { %p6652_p10 = pnand %p6651_p8, %p9445_p9  ;;  %s6656_s8 = scalar_lea.vmem %s6655_s30, 256 }
 0x288   : > { %p6657_p5 = scmp.lt.s32.totalorder %s9078_s17, %s6655_s30  ;;  %p6658_p11 = scmp.lt.s32.totalorder %s6656_s8, %s6650_s22 }
 0x289   : > { %p6653_p4 = pneg %p6652_p10 }
 0x28a   : > { %p6659_p13 = por %p6658_p11, %p6657_p5 }
 0x28c   : > { %p6660_p0 = pnand %p6659_p13, %p6653_p4 }
 0x33f   : > { %v5934_v21 = vpop.f32.mrf.mxu0 }
 0x340   : > { %v5935_v50 = vadd.f32 %v6260_v49, %v5934_v21 }
 0x341   : > { %v6500_v61 = vpop.f32.mrf.mxu0 }
 0x342   : > { %5940 = vst [vmem:[%s6917_s18] sm:$0xff] %v5935_v50 }
 0x343   : > { %v5937_v62 = vpop.f32.mrf.mxu0 }
 0x344   : > { %6663 = shalt.err (!%p6660_p0)
}
 0x345   : > { %s6664_s18 = scalar_lea.hbm %s9076_s19, 128  ;;  %s6668_s12 = scalar_lea.hbm %s9135_s6, 256 }
 0x346   : > { %p6665_p1 = scmp.ne.s32.totalorder %s9076_s19, %s6664_s18  ;;  %p6669_p7 = scmp.lt.s32.totalorder %s9076_s19, %s9135_s6 }
 0x347   : > { %p6670_p8 = scmp.lt.s32.totalorder %s6668_s12, %s6664_s18 }
 0x348   : > { %p6666_p2 = pnand %p6665_p1, %p9445_p9 }
 0x349   : > { %p6671_p10 = por %p6670_p8, %p6669_p7 }
 0x34a   : > { %p6667_p6 = pneg %p6666_p2 }
 0x34c   : > { %p6672_p4 = pnand %p6671_p10, %p6667_p6 }
 0x34e   : > { %6675 = shalt.err (!%p6672_p4)
}
 0x34f   : > { %6508 = dma.vmem_to_hbm [thread:$0]  (%p9445_p9), %s9078_s17, 128, %s9076_s19, %s5942_s14   ;;  %v6501_v3 = vpop.f32.mrf.mxu0 }
 0x350   : > { %6705 = dma.done.wait (%p9444_p12), [#allocation9], 128  }
 0x351   : > { %6707 = vsyncadd (%p9444_p12), [#allocation9], 4294967168 }
 0x352 PF: > { %s5986_s23 = sand.u32 1, %s6714_s24   ;;  %p9446_p5 = scmp.ne.s32.totalorder %s9233_s16, 0 }
 0x353   : > { %s5987_s13 = scalar_lea.sflag [#allocation5], %s5986_s23 }
 0x354   : > { %p6519_p11 = pnand %p6099_p3, %p9446_p5 }
 0x356   : > { %p6520_p13 = pneg %p6519_p11 }
 0x358   : > { %6709 = dma.done.wait (%p6520_p13), %s5987_s13, 128  }
 0x359   : > { %6711 = vsyncadd (%p6520_p13), %s5987_s13, 4294967168  ;;  %s23_s29 = sadd.s32 1, %s6734_s29   ;;  %s9447_s17 = sld [smem:[#allocation14_spill]] }
 0x35a   : > { %p20_p9 = scmp.ge.s32.totalorder %s23_s29, 4   ;;  %s9448_s11 = sld [smem:[#allocation13_spill]] }
 0x35b   : > { %s9449_s24 = smov %s6718_s25  ;;  %s9450_s25 = smov %s6722_s26 }
 0x35c   : > { %s9452_s27 = smov %s6730_s28  ;;  %22 = sbr.rel (!%p20_p9) target bundleno = 6 (0x6), region = 149 }
 0x35f   : > { %s9451_s26 = smov %s9447_s17 }
 0x360   : > { %s9453_s28 = smov %s9448_s11 }
 0x361   :  { %5992 = vsyncpa [#allocation4], 1 }
 0x362   :  { %5994 = vsyncpa [#allocation4 + $0x1], 1 }
 0x363   :  { %5995 = vsyncpa [#allocation5], 1 }
 0x364   :  { %5997 = vsyncpa [#allocation5 + $0x1], 1 }
 0x365   :  { %5998 = vsyncpa [#allocation9], 1 }

</bundles_post_ra>
